<compile_context>
chip_gen: v6e
topology: v6e:2x2x1
jax: 0.10.0
libtpu: 0.0.40
codegen_flags: <defaults>
</compile_context>

<pallas_src>
import functools

import jax
import jax.numpy as jnp
from jax.experimental import pallas as pl
from jax.experimental.pallas import tpu as pltpu

BN_EPS = 1e-3


# ----------------------------- in-kernel math -----------------------------

def _softplus(x):
    # matches torch.nn.functional.softplus (beta=1, threshold=20); the min()
    # clamp keeps exp() finite even though both where-branches are evaluated.
    # log(1+exp) instead of log1p(exp): Mosaic-safe, diff < 1e-7 absolute.
    return jnp.where(x > 20.0, x, jnp.log(1.0 + jnp.exp(jnp.minimum(x, 20.0))))


def _sigmoid(x):
    # exact sigmoid (no approx reciprocal) for parity with torch.sigmoid.
    return 1.0 / (1.0 + jnp.exp(-x))


def _fill_patch(patch_ref, x, mask_ref, *, width, ksize):
    """Write the K*K shifted/masked views of the (C, M) slab into patch_ref.

    patch_ref has shape (K*K*C, M) and is reused for both convs of a step.
    The shifts are static lane rolls of the flat M = B*H*W axis; mask_ref
    zeroes contributions that would cross an image-row / image / batch
    boundary, reproducing zero padding.
    """
    c, m = x.shape
    p = ksize // 2
    for kh in range(ksize):
        for kw in range(ksize):
            d = (kh - p) * width + (kw - p)      # flat-index offset of this tap
            kk = kh * ksize + kw
            if d == 0:
                col = x                          # centre tap: always valid
            else:
                col = pltpu.roll(x, (-d) % m, axis=1) * mask_ref[kk]
            patch_ref[kk * c:(kk + 1) * c, :] = col


def _matmul_bn(w, patch, bn_w, bn_b):
    """(C, K*K*C) @ (K*K*C, M) conv matmul + train-mode BN (single-pass stats)."""
    acc = jnp.dot(w, patch, preferred_element_type=jnp.float32)
    inv_m = 1.0 / acc.shape[1]
    mean = jnp.sum(acc, axis=1, keepdims=True) * inv_m
    mean_sq = jnp.sum(acc * acc, axis=1, keepdims=True) * inv_m
    var = jnp.maximum(mean_sq - mean * mean, 0.0)
    scale = jax.lax.rsqrt(var + BN_EPS) * bn_w          # per-channel (C, 1)
    shift = bn_b - mean * scale
    return acc * scale + shift                          # one FMA pass


def _hgru_seq_kernel(mask_ref, inp_ref, inh0_ref, exc0_ref,
                     w_inh_ref, w_exc_ref,
                     bn_w0_ref, bn_b0_ref, bn_w1_ref, bn_b1_ref,
                     gate_w_ref, gate_b_ref,
                     alpha_ref, mu_ref, kappa_ref, gamma_ref,
                     new_inh_ref, new_exc_ref,
                     inh_st, exc_st, gate_scr, patch,
                     *, width, ksize):
    """One hConvGRU cell step per grid iteration; state stays in VMEM scratch."""
    t = pl.program_id(0)
    c = inp_ref.shape[0]

    @pl.when(t == 0)
    def _():
        inh_st[...] = inh0_ref[...]
        exc_st[...] = exc0_ref[...]
        gate_scr[0:c, :] = inp_ref[...]        # input block constant over T

    inp = inp_ref[...]
    inh = inh_st[...]
    exc = exc_st[...]

    # ---- both gates from the OLD state: one (2C, 3C) @ (3C, M) matmul ------
    gate_scr[c:2 * c, :] = inh
    gate_scr[2 * c:3 * c, :] = exc
    gates = _sigmoid(jnp.dot(gate_w_ref[...], gate_scr[...],
                             preferred_element_type=jnp.float32)
                     + gate_b_ref[...])
    inh_gate = gates[:c]
    exc_gate = gates[c:]

    # ---- inhibition half-update --------------------------------------------
    _fill_patch(patch, exc, mask_ref, width=width, ksize=ksize)
    inh_intx = _matmul_bn(w_inh_ref[...], patch[...],
                          bn_w0_ref[0], bn_b0_ref[0])
    inh_hat = _softplus(inp - _softplus(inh_intx * (alpha_ref[...] * inh
                                                    + mu_ref[...])))
    new_inh = (1.0 - inh_gate) * inh + inh_gate * inh_hat
    inh_st[...] = new_inh

    # ---- excitation half-update (consumes new_inh straight from vregs) -----
    _fill_patch(patch, new_inh, mask_ref, width=width, ksize=ksize)
    exc_intx = _matmul_bn(w_exc_ref[...], patch[...],
                          bn_w1_ref[0], bn_b1_ref[0])
    exc_hat = _softplus(new_inh + _softplus(exc_intx * (kappa_ref[...] * new_inh
                                                        + gamma_ref[...])))
    exc_st[...] = (1.0 - exc_gate) * exc + exc_gate * exc_hat

    # ---- store outputs once, on the last timestep ---------------------------
    @pl.when(t == pl.num_programs(0) - 1)
    def _():
        new_inh_ref[...] = inh_st[...]
        new_exc_ref[...] = exc_st[...]


# ------------------------------ pallas glue -------------------------------

def _nchw_to_cm(x):
    b, c, h, w = x.shape
    return jnp.transpose(x, (1, 0, 2, 3)).reshape(c, b * h * w)


def _cm_to_nchw(x_cm, b, h, w):
    c = x_cm.shape[0]
    return jnp.transpose(x_cm.reshape(c, b, h, w), (1, 0, 2, 3))


def make_shift_masks(batch, height, width, ksize):
    """(K*K, 1, B*H*W) {0,1} validity masks for each conv tap (zero padding)."""
    p = ksize // 2
    m = batch * height * width
    idx = jnp.arange(m, dtype=jnp.int32)
    w_idx = idx % width
    h_idx = (idx // width) % height
    masks = []
    for kh in range(ksize):
        for kw in range(ksize):
            dh, dw = kh - p, kw - p
            ok = ((h_idx + dh >= 0) & (h_idx + dh < height) &
                  (w_idx + dw >= 0) & (w_idx + dw < width))
            masks.append(ok.astype(jnp.float32))
    return jnp.stack(masks, axis=0)[:, None, :]


def pack_params(params):
    """Prepack weights for the fused kernel (do once, reuse every timestep)."""
    c, _, k, _ = params['w_inh'].shape

    def conv_pack(w):                      # OIHW -> (Co, K*K*Ci), tap-major
        return jnp.transpose(w, (0, 2, 3, 1)).reshape(c, k * k * c)

    def g(w):                              # (Co, Ci, 1, 1) -> (Co, Ci)
        return w[:, :, 0, 0]

    zeros = jnp.zeros((c, c), jnp.float32)
    # Fused gate weight: [inh_gate; exc_gate] = sigmoid(W @ [inp; inh; exc] + b)
    gate_w = jnp.concatenate([
        jnp.concatenate([g(params['i_w_w']), g(params['i_u_w']), zeros], 1),
        jnp.concatenate([zeros, g(params['e_w_w']), g(params['e_u_w'])], 1),
    ], axis=0)                                              # (2C, 3C)
    gate_b = jnp.concatenate([params['i_w_b'] + params['i_u_b'],
                              params['e_w_b'] + params['e_u_b']])[:, None]

    return {
        'w_inh_p': conv_pack(params['w_inh']),
        'w_exc_p': conv_pack(params['w_exc']),
        'gate_w': gate_w, 'gate_b': gate_b,
        'alpha': params['alpha'][:, 0, 0][:, None],
        'mu': params['mu'][:, 0, 0][:, None],
        'kappa': params['kappa'][:, 0, 0][:, None],
        'gamma': params['gamma'][:, 0, 0][:, None],
        # BN params split by branch, one row per timestep: (T, C, 1)
        'bn_w0': params['bn_w'][0::2][:, :, None],
        'bn_b0': params['bn_b'][0::2][:, :, None],
        'bn_w1': params['bn_w'][1::2][:, :, None],
        'bn_b1': params['bn_b'][1::2][:, :, None],
        'ksize': k, 'hidden': c,
    }


def _run_hgru(inp_cm, inh_cm, exc_cm, packed, masks, width,
              bn_w0, bn_b0, bn_w1, bn_b1):
    """Run n_steps = bn_w0.shape[0] cell steps in ONE pallas_call (grid=(T,))."""
    c, m = inp_cm.shape
    k = packed['ksize']
    n_steps = bn_w0.shape[0]
    kernel = functools.partial(_hgru_seq_kernel, width=width, ksize=k)

    def const_spec(shape):
        nd = len(shape)
        return pl.BlockSpec(shape, lambda t, _nd=nd: (0,) * _nd)

    bn_spec = pl.BlockSpec((1, c, 1), lambda t: (t, 0, 0))

    args = (masks, inp_cm, inh_cm, exc_cm,
            packed['w_inh_p'], packed['w_exc_p'],
            bn_w0, bn_b0, bn_w1, bn_b1,
            packed['gate_w'], packed['gate_b'],
            packed['alpha'], packed['mu'], packed['kappa'], packed['gamma'])
    in_specs = [const_spec(masks.shape), const_spec((c, m)),
                const_spec((c, m)), const_spec((c, m)),
                const_spec(packed['w_inh_p'].shape),
                const_spec(packed['w_exc_p'].shape),
                bn_spec, bn_spec, bn_spec, bn_spec,
                const_spec(packed['gate_w'].shape),
                const_spec(packed['gate_b'].shape),
                const_spec((c, 1)), const_spec((c, 1)),
                const_spec((c, 1)), const_spec((c, 1))]

    new_inh, new_exc = pl.pallas_call(
        kernel,
        out_shape=(jax.ShapeDtypeStruct((c, m), jnp.float32),
                   jax.ShapeDtypeStruct((c, m), jnp.float32)),
        grid=(n_steps,),
        in_specs=in_specs,
        out_specs=(const_spec((c, m)), const_spec((c, m))),
        scratch_shapes=[pltpu.VMEM((c, m), jnp.float32),        # inh state
                        pltpu.VMEM((c, m), jnp.float32),        # exc state
                        pltpu.VMEM((3 * c, m), jnp.float32),    # [inp;inh;exc]
                        pltpu.VMEM((k * k * c, m), jnp.float32)],  # conv patch
        compiler_params=pltpu.CompilerParams(
            dimension_semantics=("arbitrary",)),
    )(*args)
    return new_inh, new_exc


def hconvgru_cell_forward(t_i, input_, inhibition, excitation, params):
    """JAX/Pallas equivalent of hConvGRUCell.forward (default config), NCHW API.

    Returns (new_inhibition, new_excitation, weights_to_check).
    """
    b, c, h, w = input_.shape
    packed = pack_params(params)
    masks = make_shift_masks(b, h, w, packed['ksize'])
    inp_cm = _nchw_to_cm(input_)
    inh_cm = _nchw_to_cm(inhibition)
    exc_cm = _nchw_to_cm(excitation)
    ni_cm, ne_cm = _run_hgru(
        inp_cm, inh_cm, exc_cm, packed, masks, w,
        packed['bn_w0'][t_i:t_i + 1], packed['bn_b0'][t_i:t_i + 1],
        packed['bn_w1'][t_i:t_i + 1], packed['bn_b1'][t_i:t_i + 1])
    weights_to_check = {
        'w_exc': params['w_exc'], 'w_inh': params['w_inh'],
        'kappa': params['kappa'], 'gamma': params['gamma'],
        'mu': params['mu'], 'alpha': params['alpha'],
        'i_w_gate': params['i_w_w'], 'i_u_gate': params['i_u_w'],
        'e_w_gate': params['e_w_w'], 'e_u_gate': params['e_u_w'],
    }
    return (_cm_to_nchw(ni_cm, b, h, w), _cm_to_nchw(ne_cm, b, h, w),
            weights_to_check)


def hconvgru_sequence_forward(input_, inhibition, excitation, params,
                              timesteps=None):
    """Fully fused T-step recurrence (constant input each step): ONE pallas_call.

    State, weights and masks stay resident in VMEM across all timesteps;
    NCHW conversion happens only at the sequence boundary.
    """
    b, c, h, w = input_.shape
    packed = pack_params(params)
    masks = make_shift_masks(b, h, w, packed['ksize'])
    t = packed['bn_w0'].shape[0] if timesteps is None else timesteps
    ni_cm, ne_cm = _run_hgru(
        _nchw_to_cm(input_), _nchw_to_cm(inhibition), _nchw_to_cm(excitation),
        packed, masks, w,
        packed['bn_w0'][:t], packed['bn_b0'][:t],
        packed['bn_w1'][:t], packed['bn_b1'][:t])
    return _cm_to_nchw(ni_cm, b, h, w), _cm_to_nchw(ne_cm, b, h, w)


# --------------------------- pure-JAX reference ----------------------------

def _ref_forward(t_i, input_, inhibition, excitation, params):
    hp = jax.lax.Precision.HIGHEST

    def conv(x, wt):
        return jax.lax.conv_general_dilated(
            x, wt, (1, 1), 'SAME',
            dimension_numbers=('NCHW', 'OIHW', 'NCHW'), precision=hp)

    def bn(x, g, bb):
        mean = jnp.mean(x, axis=(0, 2, 3), keepdims=True)
        var = jnp.mean((x - mean) ** 2, axis=(0, 2, 3), keepdims=True)
        return ((x - mean) / jnp.sqrt(var + BN_EPS)
                * g[None, :, None, None] + bb[None, :, None, None])

    def conv1x1(x, wt, bb):
        return conv(x, wt) + bb[None, :, None, None]

    def sp(x):
        return jnp.where(x > 20.0, x, jnp.log1p(jnp.exp(jnp.minimum(x, 20.0))))

    def sg(x):
        return 1.0 / (1.0 + jnp.exp(-x))

    alpha = params['alpha'][None]; mu = params['mu'][None]
    kappa = params['kappa'][None]; gamma = params['gamma'][None]

    inh_intx = bn(conv(excitation, params['w_inh']),
                  params['bn_w'][2 * t_i], params['bn_b'][2 * t_i])
    inhibition_hat = sp(input_ - sp(inh_intx * (alpha * inhibition + mu)))
    inh_gate = sg(conv1x1(input_, params['i_w_w'], params['i_w_b'])
                  + conv1x1(inhibition, params['i_u_w'], params['i_u_b']))
    new_inh = (1 - inh_gate) * inhibition + inh_gate * inhibition_hat

    exc_gate = sg(conv1x1(inhibition, params['e_w_w'], params['e_w_b'])
                  + conv1x1(excitation, params['e_u_w'], params['e_u_b']))
    exc_intx = bn(conv(new_inh, params['w_exc']),
                  params['bn_w'][2 * t_i + 1], params['bn_b'][2 * t_i + 1])
    excitation_hat = sp(new_inh + sp(exc_intx * (kappa * new_inh + gamma)))
    new_exc = (1 - exc_gate) * excitation + exc_gate * excitation_hat
    return new_inh, new_exc


# --------------------------------- main ------------------------------------

if __name__ == "__main__":
    B, C, H, W = 2, 32, 16, 16      # batch, hidden_size, spatial
    K, T = 3, 8                     # kernel_size, timesteps
    t_i = 0

    key = jax.random.PRNGKey(0)
    ks = jax.random.split(key, 12)

    def w_init(kk, shape, scale=0.1):
        return scale * jax.random.normal(kk, shape, jnp.float32)

    # PyTorch init: uniform(1, T-1) for the gate biases (the .log() in the
    # module is not in-place, so the biases stay uniform).
    i_w_b = jax.random.uniform(ks[6], (C,), jnp.float32, 1.0, float(T - 1))
    i_u_b = jax.random.uniform(ks[7], (C,), jnp.float32, 1.0, float(T - 1))

    params = {
        'w_inh': w_init(ks[0], (C, C, K, K)),
        'w_exc': w_init(ks[1], (C, C, K, K)),
        'i_w_w': w_init(ks[2], (C, C, 1, 1)),
        'i_u_w': w_init(ks[3], (C, C, 1, 1)),
        'e_w_w': w_init(ks[4], (C, C, 1, 1)),
        'e_u_w': w_init(ks[5], (C, C, 1, 1)),
        'i_w_b': i_w_b, 'i_u_b': i_u_b,
        'e_w_b': -i_w_b, 'e_u_b': -i_u_b,     # matches the PyTorch init
        'alpha': jnp.ones((C, 1, 1), jnp.float32),
        'mu': jnp.zeros((C, 1, 1), jnp.float32),
        'gamma': jnp.zeros((C, 1, 1), jnp.float32),
        'kappa': jnp.ones((C, 1, 1), jnp.float32),
        'bn_w': jnp.full((T * 2, C), 0.1, jnp.float32),
        'bn_b': jnp.zeros((T * 2, C), jnp.float32),
    }

    x = jax.random.normal(ks[8], (B, C, H, W), jnp.float32)
    inhibition0 = jnp.zeros((B, C, H, W), jnp.float32)
    excitation0 = 0.5 * jax.random.normal(ks[9], (B, C, H, W), jnp.float32)

    # --- single cell step (module forward) ---------------------------------
    new_inh, new_exc, _ = hconvgru_cell_forward(t_i, x, inhibition0,
                                                excitation0, params)
    jax.block_until_ready((new_inh, new_exc))

    ref_inh, ref_exc = _ref_forward(t_i, x, inhibition0, excitation0, params)
    # Compiled Mosaic path agrees to ~1e-5 (full-f32 MXU matmuls); the 2e-2
    # bound covers the interpret fallback where in-kernel dots run at XLA
    # DEFAULT (bf16-pass) precision.
    assert bool(jnp.allclose(new_inh, ref_inh, rtol=2e-2, atol=2e-2)), \
        float(jnp.max(jnp.abs(new_inh - ref_inh)))
    assert bool(jnp.allclose(new_exc, ref_exc, rtol=2e-2, atol=2e-2)), \
        float(jnp.max(jnp.abs(new_exc - ref_exc)))

    # --- fully fused T-step recurrence: ONE pallas_call, state in VMEM ------
    seq_inh, seq_exc = hconvgru_sequence_forward(x, inhibition0, excitation0,
                                                 params, timesteps=T)
    jax.block_until_ready((seq_inh, seq_exc))

    ref_i, ref_e = inhibition0, excitation0
    for step in range(T):
        ref_i, ref_e = _ref_forward(step, x, ref_i, ref_e, params)
    assert bool(jnp.all(jnp.isfinite(seq_inh))) and \
        bool(jnp.all(jnp.isfinite(seq_exc)))
    # Loose bound: on the compiled path the 8-step recurrence matches to ~1e-5;
    # interpret-mode DEFAULT-precision dots compound over the recurrence.
    assert bool(jnp.allclose(seq_inh, ref_i, rtol=1e-1, atol=1e-1)), \
        float(jnp.max(jnp.abs(seq_inh - ref_i)))
    assert bool(jnp.allclose(seq_exc, ref_e, rtol=1e-1, atol=1e-1)), \
        float(jnp.max(jnp.abs(seq_exc - ref_e)))

    print("KERNEL_OK")
</pallas_src>

<mosaic_0001>
module attributes {stable_mosaic.version = 11 : i64} {
  func.func @_hgru_seq_kernel(%arg0: i32, %arg1: memref<9x1x512xf32, #tpu.memory_space<vmem>>, %arg2: memref<32x512xf32, #tpu.memory_space<vmem>>, %arg3: memref<32x512xf32, #tpu.memory_space<vmem>>, %arg4: memref<32x512xf32, #tpu.memory_space<vmem>>, %arg5: memref<32x288xf32, #tpu.memory_space<vmem>>, %arg6: memref<32x288xf32, #tpu.memory_space<vmem>>, %arg7: memref<1x32x1xf32, #tpu.memory_space<vmem>>, %arg8: memref<1x32x1xf32, #tpu.memory_space<vmem>>, %arg9: memref<1x32x1xf32, #tpu.memory_space<vmem>>, %arg10: memref<1x32x1xf32, #tpu.memory_space<vmem>>, %arg11: memref<64x96xf32, #tpu.memory_space<vmem>>, %arg12: memref<64x1xf32, #tpu.memory_space<vmem>>, %arg13: memref<32x1xf32, #tpu.memory_space<vmem>>, %arg14: memref<32x1xf32, #tpu.memory_space<vmem>>, %arg15: memref<32x1xf32, #tpu.memory_space<vmem>>, %arg16: memref<32x1xf32, #tpu.memory_space<vmem>>, %arg17: memref<32x512xf32, #tpu.memory_space<vmem>>, %arg18: memref<32x512xf32, #tpu.memory_space<vmem>>, %arg19: memref<32x512xf32, #tpu.memory_space<vmem>>, %arg20: memref<32x512xf32, #tpu.memory_space<vmem>>, %arg21: memref<96x512xf32, #tpu.memory_space<vmem>>, %arg22: memref<288x512xf32, #tpu.memory_space<vmem>>) attributes {dimension_semantics = [#tpu.dimension_semantics<arbitrary>], iteration_bounds = array<i64: 1>, scalar_prefetch = 0 : i64, scratch_operands = 4 : i64, tpu.core_type = #tpu.core_type<tc>, window_params = [{pipeline_mode = #tpu.pipeline_mode<synchronous>, transform_indices = @transform_0, window_bounds = array<i64: 9, 1, 512>}, {pipeline_mode = #tpu.pipeline_mode<synchronous>, transform_indices = @transform_1, window_bounds = array<i64: 32, 512>}, {pipeline_mode = #tpu.pipeline_mode<synchronous>, transform_indices = @transform_2, window_bounds = array<i64: 32, 512>}, {pipeline_mode = #tpu.pipeline_mode<synchronous>, transform_indices = @transform_3, window_bounds = array<i64: 32, 512>}, {pipeline_mode = #tpu.pipeline_mode<synchronous>, transform_indices = @transform_4, window_bounds = array<i64: 32, 288>}, {pipeline_mode = #tpu.pipeline_mode<synchronous>, transform_indices = @transform_5, window_bounds = array<i64: 32, 288>}, {transform_indices = @transform_6, window_bounds = array<i64: 1, 32, 1>}, {transform_indices = @transform_7, window_bounds = array<i64: 1, 32, 1>}, {transform_indices = @transform_8, window_bounds = array<i64: 1, 32, 1>}, {transform_indices = @transform_9, window_bounds = array<i64: 1, 32, 1>}, {pipeline_mode = #tpu.pipeline_mode<synchronous>, transform_indices = @transform_10, window_bounds = array<i64: 64, 96>}, {pipeline_mode = #tpu.pipeline_mode<synchronous>, transform_indices = @transform_11, window_bounds = array<i64: 64, 1>}, {pipeline_mode = #tpu.pipeline_mode<synchronous>, transform_indices = @transform_12, window_bounds = array<i64: 32, 1>}, {pipeline_mode = #tpu.pipeline_mode<synchronous>, transform_indices = @transform_13, window_bounds = array<i64: 32, 1>}, {pipeline_mode = #tpu.pipeline_mode<synchronous>, transform_indices = @transform_14, window_bounds = array<i64: 32, 1>}, {pipeline_mode = #tpu.pipeline_mode<synchronous>, transform_indices = @transform_15, window_bounds = array<i64: 32, 1>}, {pipeline_mode = #tpu.pipeline_mode<synchronous>, transform_indices = @transform_16, window_bounds = array<i64: 32, 512>}, {pipeline_mode = #tpu.pipeline_mode<synchronous>, transform_indices = @transform_17, window_bounds = array<i64: 32, 512>}]} {
    %c0_i32 = arith.constant 0 : i32
    %0 = arith.cmpi eq, %arg0, %c0_i32 : i32
    %1 = arith.extui %0 : i1 to i32
    %c0_i32_0 = arith.constant 0 : i32
    %2 = arith.cmpi ne, %1, %c0_i32_0 : i32
    scf.if %2 {
      %c0_158 = arith.constant 0 : index
      %c0_159 = arith.constant 0 : index
      %248 = vector.load %arg3[%c0_158, %c0_159] : memref<32x512xf32, #tpu.memory_space<vmem>>, vector<32x512xf32>
      %c0_160 = arith.constant 0 : index
      %c0_161 = arith.constant 0 : index
      %249 = vector.load %arg19[%c0_160, %c0_161] : memref<32x512xf32, #tpu.memory_space<vmem>>, vector<32x512xf32>
      tpu.vector_store %arg19[%c0_160, %c0_161], %248 {strides = array<i32>} : memref<32x512xf32, #tpu.memory_space<vmem>>, vector<32x512xf32>,
      %c0_162 = arith.constant 0 : index
      %c0_163 = arith.constant 0 : index
      %250 = vector.load %arg4[%c0_162, %c0_163] : memref<32x512xf32, #tpu.memory_space<vmem>>, vector<32x512xf32>
      %c0_164 = arith.constant 0 : index
      %c0_165 = arith.constant 0 : index
      %251 = vector.load %arg20[%c0_164, %c0_165] : memref<32x512xf32, #tpu.memory_space<vmem>>, vector<32x512xf32>
      tpu.vector_store %arg20[%c0_164, %c0_165], %250 {strides = array<i32>} : memref<32x512xf32, #tpu.memory_space<vmem>>, vector<32x512xf32>,
      %c0_166 = arith.constant 0 : index
      %c0_167 = arith.constant 0 : index
      %252 = vector.load %arg2[%c0_166, %c0_167] : memref<32x512xf32, #tpu.memory_space<vmem>>, vector<32x512xf32>
      %c0_168 = arith.constant 0 : index
      %c0_169 = arith.constant 0 : index
      %253 = vector.load %arg21[%c0_168, %c0_169] : memref<96x512xf32, #tpu.memory_space<vmem>>, vector<32x512xf32>
      tpu.vector_store %arg21[%c0_168, %c0_169], %252 {strides = array<i32>} : memref<96x512xf32, #tpu.memory_space<vmem>>, vector<32x512xf32>,
    } else {
    }
    %c0 = arith.constant 0 : index
    %c0_1 = arith.constant 0 : index
    %3 = vector.load %arg2[%c0, %c0_1] : memref<32x512xf32, #tpu.memory_space<vmem>>, vector<32x512xf32>
    %c0_2 = arith.constant 0 : index
    %c0_3 = arith.constant 0 : index
    %4 = vector.load %arg19[%c0_2, %c0_3] : memref<32x512xf32, #tpu.memory_space<vmem>>, vector<32x512xf32>
    %c0_4 = arith.constant 0 : index
    %c0_5 = arith.constant 0 : index
    %5 = vector.load %arg20[%c0_4, %c0_5] : memref<32x512xf32, #tpu.memory_space<vmem>>, vector<32x512xf32>
    %c32 = arith.constant 32 : index
    %c0_6 = arith.constant 0 : index
    %6 = vector.load %arg21[%c32, %c0_6] : memref<96x512xf32, #tpu.memory_space<vmem>>, vector<32x512xf32>
    tpu.vector_store %arg21[%c32, %c0_6], %4 {strides = array<i32>} : memref<96x512xf32, #tpu.memory_space<vmem>>, vector<32x512xf32>,
    %c64 = arith.constant 64 : index
    %c0_7 = arith.constant 0 : index
    %7 = vector.load %arg21[%c64, %c0_7] : memref<96x512xf32, #tpu.memory_space<vmem>>, vector<32x512xf32>
    tpu.vector_store %arg21[%c64, %c0_7], %5 {strides = array<i32>} : memref<96x512xf32, #tpu.memory_space<vmem>>, vector<32x512xf32>,
    %c0_8 = arith.constant 0 : index
    %c0_9 = arith.constant 0 : index
    %8 = vector.load %arg11[%c0_8, %c0_9] : memref<64x96xf32, #tpu.memory_space<vmem>>, vector<64x96xf32>
    %c0_10 = arith.constant 0 : index
    %c0_11 = arith.constant 0 : index
    %9 = vector.load %arg21[%c0_10, %c0_11] : memref<96x512xf32, #tpu.memory_space<vmem>>, vector<96x512xf32>
    %cst = arith.constant dense<0.000000e+00> : vector<64x512xf32>
    %10 = tpu.matmul %8, %9, %cst {dimension_numbers = #tpu.dot_dimension_numbers<[1], [0], [0], [1], [0, 0, 1, 1], [], []>} : vector<64x96xf32>, vector<96x512xf32>, vector<64x512xf32> -> vector<64x512xf32>
    %c0_12 = arith.constant 0 : index
    %c0_13 = arith.constant 0 : index
    %11 = vector.load %arg12[%c0_12, %c0_13] : memref<64x1xf32, #tpu.memory_space<vmem>>, vector<64x1xf32>
    %12 = vector.broadcast %11 : vector<64x1xf32> to vector<64x512xf32>
    %13 = arith.addf %10, %12 : vector<64x512xf32>
    %cst_14 = arith.constant 0.000000e+00 : f32
    %14 = vector.broadcast %cst_14 : f32 to vector<64x512xf32>
    %15 = arith.subf %14, %13 : vector<64x512xf32>
    %16 = math.exp %15 : vector<64x512xf32>
    %cst_15 = arith.constant 1.000000e+00 : f32
    %17 = vector.broadcast %cst_15 : f32 to vector<64x512xf32>
    %18 = arith.addf %17, %16 : vector<64x512xf32>
    %cst_16 = arith.constant 1.000000e+00 : f32
    %19 = vector.broadcast %cst_16 : f32 to vector<64x512xf32>
    %20 = arith.divf %19, %18 : vector<64x512xf32>
    %21 = vector.extract_strided_slice %20 {offsets = [0, 0], sizes = [32, 512], strides = [1, 1]} : vector<64x512xf32> to vector<32x512xf32>
    %22 = vector.extract_strided_slice %20 {offsets = [32, 0], sizes = [32, 512], strides = [1, 1]} : vector<64x512xf32> to vector<32x512xf32>
    %c17_i32 = arith.constant 17 : i32
    %23 = tpu.dynamic_rotate %5 by %c17_i32 dim 1 : vector<32x512xf32>, i32 -> vector<32x512xf32>
    %c0_17 = arith.constant 0 : index
    %c0_18 = arith.constant 0 : index
    %c0_19 = arith.constant 0 : index
    %24 = vector.load %arg1[%c0_17, %c0_18, %c0_19] : memref<9x1x512xf32, #tpu.memory_space<vmem>>, vector<1x1x512xf32>
    %25 = vector.shape_cast %24 : vector<1x1x512xf32> to vector<1x512xf32>
    %26 = vector.broadcast %25 : vector<1x512xf32> to vector<32x512xf32>
    %27 = arith.mulf %23, %26 : vector<32x512xf32>
    %c0_20 = arith.constant 0 : index
    %c0_21 = arith.constant 0 : index
    %28 = vector.load %arg22[%c0_20, %c0_21] : memref<288x512xf32, #tpu.memory_space<vmem>>, vector<32x512xf32>
    tpu.vector_store %arg22[%c0_20, %c0_21], %27 {strides = array<i32>} : memref<288x512xf32, #tpu.memory_space<vmem>>, vector<32x512xf32>,
    %c16_i32 = arith.constant 16 : i32
    %29 = tpu.dynamic_rotate %5 by %c16_i32 dim 1 : vector<32x512xf32>, i32 -> vector<32x512xf32>
    %c1 = arith.constant 1 : index
    %c0_22 = arith.constant 0 : index
    %c0_23 = arith.constant 0 : index
    %30 = vector.load %arg1[%c1, %c0_22, %c0_23] : memref<9x1x512xf32, #tpu.memory_space<vmem>>, vector<1x1x512xf32>
    %31 = vector.shape_cast %30 : vector<1x1x512xf32> to vector<1x512xf32>
    %32 = vector.broadcast %31 : vector<1x512xf32> to vector<32x512xf32>
    %33 = arith.mulf %29, %32 : vector<32x512xf32>
    %c32_24 = arith.constant 32 : index
    %c0_25 = arith.constant 0 : index
    %34 = vector.load %arg22[%c32_24, %c0_25] : memref<288x512xf32, #tpu.memory_space<vmem>>, vector<32x512xf32>
    tpu.vector_store %arg22[%c32_24, %c0_25], %33 {strides = array<i32>} : memref<288x512xf32, #tpu.memory_space<vmem>>, vector<32x512xf32>,
    %c15_i32 = arith.constant 15 : i32
    %35 = tpu.dynamic_rotate %5 by %c15_i32 dim 1 : vector<32x512xf32>, i32 -> vector<32x512xf32>
    %c2 = arith.constant 2 : index
    %c0_26 = arith.constant 0 : index
    %c0_27 = arith.constant 0 : index
    %36 = vector.load %arg1[%c2, %c0_26, %c0_27] : memref<9x1x512xf32, #tpu.memory_space<vmem>>, vector<1x1x512xf32>
    %37 = vector.shape_cast %36 : vector<1x1x512xf32> to vector<1x512xf32>
    %38 = vector.broadcast %37 : vector<1x512xf32> to vector<32x512xf32>
    %39 = arith.mulf %35, %38 : vector<32x512xf32>
    %c64_28 = arith.constant 64 : index
    %c0_29 = arith.constant 0 : index
    %40 = vector.load %arg22[%c64_28, %c0_29] : memref<288x512xf32, #tpu.memory_space<vmem>>, vector<32x512xf32>
    tpu.vector_store %arg22[%c64_28, %c0_29], %39 {strides = array<i32>} : memref<288x512xf32, #tpu.memory_space<vmem>>, vector<32x512xf32>,
    %c1_i32 = arith.constant 1 : i32
    %41 = tpu.dynamic_rotate %5 by %c1_i32 dim 1 : vector<32x512xf32>, i32 -> vector<32x512xf32>
    %c3 = arith.constant 3 : index
    %c0_30 = arith.constant 0 : index
    %c0_31 = arith.constant 0 : index
    %42 = vector.load %arg1[%c3, %c0_30, %c0_31] : memref<9x1x512xf32, #tpu.memory_space<vmem>>, vector<1x1x512xf32>
    %43 = vector.shape_cast %42 : vector<1x1x512xf32> to vector<1x512xf32>
    %44 = vector.broadcast %43 : vector<1x512xf32> to vector<32x512xf32>
    %45 = arith.mulf %41, %44 : vector<32x512xf32>
    %c96 = arith.constant 96 : index
    %c0_32 = arith.constant 0 : index
    %46 = vector.load %arg22[%c96, %c0_32] : memref<288x512xf32, #tpu.memory_space<vmem>>, vector<32x512xf32>
    tpu.vector_store %arg22[%c96, %c0_32], %45 {strides = array<i32>} : memref<288x512xf32, #tpu.memory_space<vmem>>, vector<32x512xf32>,
    %c128 = arith.constant 128 : index
    %c0_33 = arith.constant 0 : index
    %47 = vector.load %arg22[%c128, %c0_33] : memref<288x512xf32, #tpu.memory_space<vmem>>, vector<32x512xf32>
    tpu.vector_store %arg22[%c128, %c0_33], %5 {strides = array<i32>} : memref<288x512xf32, #tpu.memory_space<vmem>>, vector<32x512xf32>,
    %c511_i32 = arith.constant 511 : i32
    %48 = tpu.dynamic_rotate %5 by %c511_i32 dim 1 : vector<32x512xf32>, i32 -> vector<32x512xf32>
    %c5 = arith.constant 5 : index
    %c0_34 = arith.constant 0 : index
    %c0_35 = arith.constant 0 : index
    %49 = vector.load %arg1[%c5, %c0_34, %c0_35] : memref<9x1x512xf32, #tpu.memory_space<vmem>>, vector<1x1x512xf32>
    %50 = vector.shape_cast %49 : vector<1x1x512xf32> to vector<1x512xf32>
    %51 = vector.broadcast %50 : vector<1x512xf32> to vector<32x512xf32>
    %52 = arith.mulf %48, %51 : vector<32x512xf32>
    %c160 = arith.constant 160 : index
    %c0_36 = arith.constant 0 : index
    %53 = vector.load %arg22[%c160, %c0_36] : memref<288x512xf32, #tpu.memory_space<vmem>>, vector<32x512xf32>
    tpu.vector_store %arg22[%c160, %c0_36], %52 {strides = array<i32>} : memref<288x512xf32, #tpu.memory_space<vmem>>, vector<32x512xf32>,
    %c497_i32 = arith.constant 497 : i32
    %54 = tpu.dynamic_rotate %5 by %c497_i32 dim 1 : vector<32x512xf32>, i32 -> vector<32x512xf32>
    %c6 = arith.constant 6 : index
    %c0_37 = arith.constant 0 : index
    %c0_38 = arith.constant 0 : index
    %55 = vector.load %arg1[%c6, %c0_37, %c0_38] : memref<9x1x512xf32, #tpu.memory_space<vmem>>, vector<1x1x512xf32>
    %56 = vector.shape_cast %55 : vector<1x1x512xf32> to vector<1x512xf32>
    %57 = vector.broadcast %56 : vector<1x512xf32> to vector<32x512xf32>
    %58 = arith.mulf %54, %57 : vector<32x512xf32>
    %c192 = arith.constant 192 : index
    %c0_39 = arith.constant 0 : index
    %59 = vector.load %arg22[%c192, %c0_39] : memref<288x512xf32, #tpu.memory_space<vmem>>, vector<32x512xf32>
    tpu.vector_store %arg22[%c192, %c0_39], %58 {strides = array<i32>} : memref<288x512xf32, #tpu.memory_space<vmem>>, vector<32x512xf32>,
    %c496_i32 = arith.constant 496 : i32
    %60 = tpu.dynamic_rotate %5 by %c496_i32 dim 1 : vector<32x512xf32>, i32 -> vector<32x512xf32>
    %c7 = arith.constant 7 : index
    %c0_40 = arith.constant 0 : index
    %c0_41 = arith.constant 0 : index
    %61 = vector.load %arg1[%c7, %c0_40, %c0_41] : memref<9x1x512xf32, #tpu.memory_space<vmem>>, vector<1x1x512xf32>
    %62 = vector.shape_cast %61 : vector<1x1x512xf32> to vector<1x512xf32>
    %63 = vector.broadcast %62 : vector<1x512xf32> to vector<32x512xf32>
    %64 = arith.mulf %60, %63 : vector<32x512xf32>
    %c224 = arith.constant 224 : index
    %c0_42 = arith.constant 0 : index
    %65 = vector.load %arg22[%c224, %c0_42] : memref<288x512xf32, #tpu.memory_space<vmem>>, vector<32x512xf32>
    tpu.vector_store %arg22[%c224, %c0_42], %64 {strides = array<i32>} : memref<288x512xf32, #tpu.memory_space<vmem>>, vector<32x512xf32>,
    %c495_i32 = arith.constant 495 : i32
    %66 = tpu.dynamic_rotate %5 by %c495_i32 dim 1 : vector<32x512xf32>, i32 -> vector<32x512xf32>
    %c8 = arith.constant 8 : index
    %c0_43 = arith.constant 0 : index
    %c0_44 = arith.constant 0 : index
    %67 = vector.load %arg1[%c8, %c0_43, %c0_44] : memref<9x1x512xf32, #tpu.memory_space<vmem>>, vector<1x1x512xf32>
    %68 = vector.shape_cast %67 : vector<1x1x512xf32> to vector<1x512xf32>
    %69 = vector.broadcast %68 : vector<1x512xf32> to vector<32x512xf32>
    %70 = arith.mulf %66, %69 : vector<32x512xf32>
    %c256 = arith.constant 256 : index
    %c0_45 = arith.constant 0 : index
    %71 = vector.load %arg22[%c256, %c0_45] : memref<288x512xf32, #tpu.memory_space<vmem>>, vector<32x512xf32>
    tpu.vector_store %arg22[%c256, %c0_45], %70 {strides = array<i32>} : memref<288x512xf32, #tpu.memory_space<vmem>>, vector<32x512xf32>,
    %c0_46 = arith.constant 0 : index
    %c0_47 = arith.constant 0 : index
    %72 = vector.load %arg5[%c0_46, %c0_47] : memref<32x288xf32, #tpu.memory_space<vmem>>, vector<32x288xf32>
    %c0_48 = arith.constant 0 : index
    %c0_49 = arith.constant 0 : index
    %73 = vector.load %arg22[%c0_48, %c0_49] : memref<288x512xf32, #tpu.memory_space<vmem>>, vector<288x512xf32>
    %c0_50 = arith.constant 0 : index
    %c0_51 = arith.constant 0 : index
    %c0_52 = arith.constant 0 : index
    %74 = vector.load %arg7[%c0_50, %c0_51, %c0_52] : memref<1x32x1xf32, #tpu.memory_space<vmem>>, vector<1x32x1xf32>
    %75 = vector.shape_cast %74 : vector<1x32x1xf32> to vector<32x1xf32>
    %c0_53 = arith.constant 0 : index
    %c0_54 = arith.constant 0 : index
    %c0_55 = arith.constant 0 : index
    %76 = vector.load %arg8[%c0_53, %c0_54, %c0_55] : memref<1x32x1xf32, #tpu.memory_space<vmem>>, vector<1x32x1xf32>
    %77 = vector.shape_cast %76 : vector<1x32x1xf32> to vector<32x1xf32>
    %cst_56 = arith.constant dense<0.000000e+00> : vector<32x512xf32>
    %78 = tpu.matmul %72, %73, %cst_56 {dimension_numbers = #tpu.dot_dimension_numbers<[1], [0], [0], [1], [0, 0, 1, 1], [], []>} : vector<32x288xf32>, vector<288x512xf32>, vector<32x512xf32> -> vector<32x512xf32>
    %cst_57 = arith.constant dense<0.000000e+00> : vector<32xf32>
    %79 = vector.multi_reduction <add>, %78, %cst_57 [1] : vector<32x512xf32> to vector<32xf32>
    %80 = vector.shape_cast %79 : vector<32xf32> to vector<32x1xf32>
    %cst_58 = arith.constant 0.001953125 : f32
    %81 = vector.broadcast %cst_58 : f32 to vector<32x1xf32>
    %82 = arith.mulf %80, %81 : vector<32x1xf32>
    %83 = arith.mulf %78, %78 : vector<32x512xf32>
    %cst_59 = arith.constant dense<0.000000e+00> : vector<32xf32>
    %84 = vector.multi_reduction <add>, %83, %cst_59 [1] : vector<32x512xf32> to vector<32xf32>
    %85 = vector.shape_cast %84 : vector<32xf32> to vector<32x1xf32>
    %cst_60 = arith.constant 0.001953125 : f32
    %86 = vector.broadcast %cst_60 : f32 to vector<32x1xf32>
    %87 = arith.mulf %85, %86 : vector<32x1xf32>
    %88 = arith.mulf %82, %82 : vector<32x1xf32>
    %89 = arith.subf %87, %88 : vector<32x1xf32>
    %cst_61 = arith.constant 0.000000e+00 : f32
    %90 = vector.broadcast %cst_61 : f32 to vector<32x1xf32>
    %91 = arith.maximumf %89, %90 : vector<32x1xf32>
    %cst_62 = arith.constant 1.000000e-03 : f32
    %92 = vector.broadcast %cst_62 : f32 to vector<32x1xf32>
    %93 = arith.addf %91, %92 : vector<32x1xf32>
    %94 = math.rsqrt %93 : vector<32x1xf32>
    %95 = arith.mulf %94, %75 : vector<32x1xf32>
    %96 = arith.mulf %82, %95 : vector<32x1xf32>
    %97 = arith.subf %77, %96 : vector<32x1xf32>
    %98 = vector.broadcast %95 : vector<32x1xf32> to vector<32x512xf32>
    %99 = arith.mulf %78, %98 : vector<32x512xf32>
    %100 = vector.broadcast %97 : vector<32x1xf32> to vector<32x512xf32>
    %101 = arith.addf %99, %100 : vector<32x512xf32>
    %c0_63 = arith.constant 0 : index
    %c0_64 = arith.constant 0 : index
    %102 = vector.load %arg13[%c0_63, %c0_64] : memref<32x1xf32, #tpu.memory_space<vmem>>, vector<32x1xf32>
    %103 = vector.broadcast %102 : vector<32x1xf32> to vector<32x512xf32>
    %104 = arith.mulf %103, %4 : vector<32x512xf32>
    %c0_65 = arith.constant 0 : index
    %c0_66 = arith.constant 0 : index
    %105 = vector.load %arg14[%c0_65, %c0_66] : memref<32x1xf32, #tpu.memory_space<vmem>>, vector<32x1xf32>
    %106 = vector.broadcast %105 : vector<32x1xf32> to vector<32x512xf32>
    %107 = arith.addf %104, %106 : vector<32x512xf32>
    %108 = arith.mulf %101, %107 : vector<32x512xf32>
    %cst_67 = arith.constant 2.000000e+01 : f32
    %109 = vector.broadcast %cst_67 : f32 to vector<32x512xf32>
    %110 = arith.cmpf ogt, %108, %109 : vector<32x512xf32>
    %cst_68 = arith.constant 2.000000e+01 : f32
    %111 = vector.broadcast %cst_68 : f32 to vector<32x512xf32>
    %112 = arith.minimumf %108, %111 : vector<32x512xf32>
    %113 = math.exp %112 : vector<32x512xf32>
    %cst_69 = arith.constant 1.000000e+00 : f32
    %114 = vector.broadcast %cst_69 : f32 to vector<32x512xf32>
    %115 = arith.addf %114, %113 : vector<32x512xf32>
    %116 = math.log %115 : vector<32x512xf32>
    %117 = arith.select %110, %108, %116 : vector<32x512xi1>, vector<32x512xf32>
    %118 = arith.subf %3, %117 : vector<32x512xf32>
    %cst_70 = arith.constant 2.000000e+01 : f32
    %119 = vector.broadcast %cst_70 : f32 to vector<32x512xf32>
    %120 = arith.cmpf ogt, %118, %119 : vector<32x512xf32>
    %cst_71 = arith.constant 2.000000e+01 : f32
    %121 = vector.broadcast %cst_71 : f32 to vector<32x512xf32>
    %122 = arith.minimumf %118, %121 : vector<32x512xf32>
    %123 = math.exp %122 : vector<32x512xf32>
    %cst_72 = arith.constant 1.000000e+00 : f32
    %124 = vector.broadcast %cst_72 : f32 to vector<32x512xf32>
    %125 = arith.addf %124, %123 : vector<32x512xf32>
    %126 = math.log %125 : vector<32x512xf32>
    %127 = arith.select %120, %118, %126 : vector<32x512xi1>, vector<32x512xf32>
    %cst_73 = arith.constant 1.000000e+00 : f32
    %128 = vector.broadcast %cst_73 : f32 to vector<32x512xf32>
    %129 = arith.subf %128, %21 : vector<32x512xf32>
    %130 = arith.mulf %129, %4 : vector<32x512xf32>
    %131 = arith.mulf %21, %127 : vector<32x512xf32>
    %132 = arith.addf %130, %131 : vector<32x512xf32>
    %c0_74 = arith.constant 0 : index
    %c0_75 = arith.constant 0 : index
    %133 = vector.load %arg19[%c0_74, %c0_75] : memref<32x512xf32, #tpu.memory_space<vmem>>, vector<32x512xf32>
    tpu.vector_store %arg19[%c0_74, %c0_75], %132 {strides = array<i32>} : memref<32x512xf32, #tpu.memory_space<vmem>>, vector<32x512xf32>,
    %c17_i32_76 = arith.constant 17 : i32
    %134 = tpu.dynamic_rotate %132 by %c17_i32_76 dim 1 : vector<32x512xf32>, i32 -> vector<32x512xf32>
    %c0_77 = arith.constant 0 : index
    %c0_78 = arith.constant 0 : index
    %c0_79 = arith.constant 0 : index
    %135 = vector.load %arg1[%c0_77, %c0_78, %c0_79] : memref<9x1x512xf32, #tpu.memory_space<vmem>>, vector<1x1x512xf32>
    %136 = vector.shape_cast %135 : vector<1x1x512xf32> to vector<1x512xf32>
    %137 = vector.broadcast %136 : vector<1x512xf32> to vector<32x512xf32>
    %138 = arith.mulf %134, %137 : vector<32x512xf32>
    %c0_80 = arith.constant 0 : index
    %c0_81 = arith.constant 0 : index
    %139 = vector.load %arg22[%c0_80, %c0_81] : memref<288x512xf32, #tpu.memory_space<vmem>>, vector<32x512xf32>
    tpu.vector_store %arg22[%c0_80, %c0_81], %138 {strides = array<i32>} : memref<288x512xf32, #tpu.memory_space<vmem>>, vector<32x512xf32>,
    %c16_i32_82 = arith.constant 16 : i32
    %140 = tpu.dynamic_rotate %132 by %c16_i32_82 dim 1 : vector<32x512xf32>, i32 -> vector<32x512xf32>
    %c1_83 = arith.constant 1 : index
    %c0_84 = arith.constant 0 : index
    %c0_85 = arith.constant 0 : index
    %141 = vector.load %arg1[%c1_83, %c0_84, %c0_85] : memref<9x1x512xf32, #tpu.memory_space<vmem>>, vector<1x1x512xf32>
    %142 = vector.shape_cast %141 : vector<1x1x512xf32> to vector<1x512xf32>
    %143 = vector.broadcast %142 : vector<1x512xf32> to vector<32x512xf32>
    %144 = arith.mulf %140, %143 : vector<32x512xf32>
    %c32_86 = arith.constant 32 : index
    %c0_87 = arith.constant 0 : index
    %145 = vector.load %arg22[%c32_86, %c0_87] : memref<288x512xf32, #tpu.memory_space<vmem>>, vector<32x512xf32>
    tpu.vector_store %arg22[%c32_86, %c0_87], %144 {strides = array<i32>} : memref<288x512xf32, #tpu.memory_space<vmem>>, vector<32x512xf32>,
    %c15_i32_88 = arith.constant 15 : i32
    %146 = tpu.dynamic_rotate %132 by %c15_i32_88 dim 1 : vector<32x512xf32>, i32 -> vector<32x512xf32>
    %c2_89 = arith.constant 2 : index
    %c0_90 = arith.constant 0 : index
    %c0_91 = arith.constant 0 : index
    %147 = vector.load %arg1[%c2_89, %c0_90, %c0_91] : memref<9x1x512xf32, #tpu.memory_space<vmem>>, vector<1x1x512xf32>
    %148 = vector.shape_cast %147 : vector<1x1x512xf32> to vector<1x512xf32>
    %149 = vector.broadcast %148 : vector<1x512xf32> to vector<32x512xf32>
    %150 = arith.mulf %146, %149 : vector<32x512xf32>
    %c64_92 = arith.constant 64 : index
    %c0_93 = arith.constant 0 : index
    %151 = vector.load %arg22[%c64_92, %c0_93] : memref<288x512xf32, #tpu.memory_space<vmem>>, vector<32x512xf32>
    tpu.vector_store %arg22[%c64_92, %c0_93], %150 {strides = array<i32>} : memref<288x512xf32, #tpu.memory_space<vmem>>, vector<32x512xf32>,
    %c1_i32_94 = arith.constant 1 : i32
    %152 = tpu.dynamic_rotate %132 by %c1_i32_94 dim 1 : vector<32x512xf32>, i32 -> vector<32x512xf32>
    %c3_95 = arith.constant 3 : index
    %c0_96 = arith.constant 0 : index
    %c0_97 = arith.constant 0 : index
    %153 = vector.load %arg1[%c3_95, %c0_96, %c0_97] : memref<9x1x512xf32, #tpu.memory_space<vmem>>, vector<1x1x512xf32>
    %154 = vector.shape_cast %153 : vector<1x1x512xf32> to vector<1x512xf32>
    %155 = vector.broadcast %154 : vector<1x512xf32> to vector<32x512xf32>
    %156 = arith.mulf %152, %155 : vector<32x512xf32>
    %c96_98 = arith.constant 96 : index
    %c0_99 = arith.constant 0 : index
    %157 = vector.load %arg22[%c96_98, %c0_99] : memref<288x512xf32, #tpu.memory_space<vmem>>, vector<32x512xf32>
    tpu.vector_store %arg22[%c96_98, %c0_99], %156 {strides = array<i32>} : memref<288x512xf32, #tpu.memory_space<vmem>>, vector<32x512xf32>,
    %c128_100 = arith.constant 128 : index
    %c0_101 = arith.constant 0 : index
    %158 = vector.load %arg22[%c128_100, %c0_101] : memref<288x512xf32, #tpu.memory_space<vmem>>, vector<32x512xf32>
    tpu.vector_store %arg22[%c128_100, %c0_101], %132 {strides = array<i32>} : memref<288x512xf32, #tpu.memory_space<vmem>>, vector<32x512xf32>,
    %c511_i32_102 = arith.constant 511 : i32
    %159 = tpu.dynamic_rotate %132 by %c511_i32_102 dim 1 : vector<32x512xf32>, i32 -> vector<32x512xf32>
    %c5_103 = arith.constant 5 : index
    %c0_104 = arith.constant 0 : index
    %c0_105 = arith.constant 0 : index
    %160 = vector.load %arg1[%c5_103, %c0_104, %c0_105] : memref<9x1x512xf32, #tpu.memory_space<vmem>>, vector<1x1x512xf32>
    %161 = vector.shape_cast %160 : vector<1x1x512xf32> to vector<1x512xf32>
    %162 = vector.broadcast %161 : vector<1x512xf32> to vector<32x512xf32>
    %163 = arith.mulf %159, %162 : vector<32x512xf32>
    %c160_106 = arith.constant 160 : index
    %c0_107 = arith.constant 0 : index
    %164 = vector.load %arg22[%c160_106, %c0_107] : memref<288x512xf32, #tpu.memory_space<vmem>>, vector<32x512xf32>
    tpu.vector_store %arg22[%c160_106, %c0_107], %163 {strides = array<i32>} : memref<288x512xf32, #tpu.memory_space<vmem>>, vector<32x512xf32>,
    %c497_i32_108 = arith.constant 497 : i32
    %165 = tpu.dynamic_rotate %132 by %c497_i32_108 dim 1 : vector<32x512xf32>, i32 -> vector<32x512xf32>
    %c6_109 = arith.constant 6 : index
    %c0_110 = arith.constant 0 : index
    %c0_111 = arith.constant 0 : index
    %166 = vector.load %arg1[%c6_109, %c0_110, %c0_111] : memref<9x1x512xf32, #tpu.memory_space<vmem>>, vector<1x1x512xf32>
    %167 = vector.shape_cast %166 : vector<1x1x512xf32> to vector<1x512xf32>
    %168 = vector.broadcast %167 : vector<1x512xf32> to vector<32x512xf32>
    %169 = arith.mulf %165, %168 : vector<32x512xf32>
    %c192_112 = arith.constant 192 : index
    %c0_113 = arith.constant 0 : index
    %170 = vector.load %arg22[%c192_112, %c0_113] : memref<288x512xf32, #tpu.memory_space<vmem>>, vector<32x512xf32>
    tpu.vector_store %arg22[%c192_112, %c0_113], %169 {strides = array<i32>} : memref<288x512xf32, #tpu.memory_space<vmem>>, vector<32x512xf32>,
    %c496_i32_114 = arith.constant 496 : i32
    %171 = tpu.dynamic_rotate %132 by %c496_i32_114 dim 1 : vector<32x512xf32>, i32 -> vector<32x512xf32>
    %c7_115 = arith.constant 7 : index
    %c0_116 = arith.constant 0 : index
    %c0_117 = arith.constant 0 : index
    %172 = vector.load %arg1[%c7_115, %c0_116, %c0_117] : memref<9x1x512xf32, #tpu.memory_space<vmem>>, vector<1x1x512xf32>
    %173 = vector.shape_cast %172 : vector<1x1x512xf32> to vector<1x512xf32>
    %174 = vector.broadcast %173 : vector<1x512xf32> to vector<32x512xf32>
    %175 = arith.mulf %171, %174 : vector<32x512xf32>
    %c224_118 = arith.constant 224 : index
    %c0_119 = arith.constant 0 : index
    %176 = vector.load %arg22[%c224_118, %c0_119] : memref<288x512xf32, #tpu.memory_space<vmem>>, vector<32x512xf32>
    tpu.vector_store %arg22[%c224_118, %c0_119], %175 {strides = array<i32>} : memref<288x512xf32, #tpu.memory_space<vmem>>, vector<32x512xf32>,
    %c495_i32_120 = arith.constant 495 : i32
    %177 = tpu.dynamic_rotate %132 by %c495_i32_120 dim 1 : vector<32x512xf32>, i32 -> vector<32x512xf32>
    %c8_121 = arith.constant 8 : index
    %c0_122 = arith.constant 0 : index
    %c0_123 = arith.constant 0 : index
    %178 = vector.load %arg1[%c8_121, %c0_122, %c0_123] : memref<9x1x512xf32, #tpu.memory_space<vmem>>, vector<1x1x512xf32>
    %179 = vector.shape_cast %178 : vector<1x1x512xf32> to vector<1x512xf32>
    %180 = vector.broadcast %179 : vector<1x512xf32> to vector<32x512xf32>
    %181 = arith.mulf %177, %180 : vector<32x512xf32>
    %c256_124 = arith.constant 256 : index
    %c0_125 = arith.constant 0 : index
    %182 = vector.load %arg22[%c256_124, %c0_125] : memref<288x512xf32, #tpu.memory_space<vmem>>, vector<32x512xf32>
    tpu.vector_store %arg22[%c256_124, %c0_125], %181 {strides = array<i32>} : memref<288x512xf32, #tpu.memory_space<vmem>>, vector<32x512xf32>,
    %c0_126 = arith.constant 0 : index
    %c0_127 = arith.constant 0 : index
    %183 = vector.load %arg6[%c0_126, %c0_127] : memref<32x288xf32, #tpu.memory_space<vmem>>, vector<32x288xf32>
    %c0_128 = arith.constant 0 : index
    %c0_129 = arith.constant 0 : index
    %184 = vector.load %arg22[%c0_128, %c0_129] : memref<288x512xf32, #tpu.memory_space<vmem>>, vector<288x512xf32>
    %c0_130 = arith.constant 0 : index
    %c0_131 = arith.constant 0 : index
    %c0_132 = arith.constant 0 : index
    %185 = vector.load %arg9[%c0_130, %c0_131, %c0_132] : memref<1x32x1xf32, #tpu.memory_space<vmem>>, vector<1x32x1xf32>
    %186 = vector.shape_cast %185 : vector<1x32x1xf32> to vector<32x1xf32>
    %c0_133 = arith.constant 0 : index
    %c0_134 = arith.constant 0 : index
    %c0_135 = arith.constant 0 : index
    %187 = vector.load %arg10[%c0_133, %c0_134, %c0_135] : memref<1x32x1xf32, #tpu.memory_space<vmem>>, vector<1x32x1xf32>
    %188 = vector.shape_cast %187 : vector<1x32x1xf32> to vector<32x1xf32>
    %cst_136 = arith.constant dense<0.000000e+00> : vector<32x512xf32>
    %189 = tpu.matmul %183, %184, %cst_136 {dimension_numbers = #tpu.dot_dimension_numbers<[1], [0], [0], [1], [0, 0, 1, 1], [], []>} : vector<32x288xf32>, vector<288x512xf32>, vector<32x512xf32> -> vector<32x512xf32>
    %cst_137 = arith.constant dense<0.000000e+00> : vector<32xf32>
    %190 = vector.multi_reduction <add>, %189, %cst_137 [1] : vector<32x512xf32> to vector<32xf32>
    %191 = vector.shape_cast %190 : vector<32xf32> to vector<32x1xf32>
    %cst_138 = arith.constant 0.001953125 : f32
    %192 = vector.broadcast %cst_138 : f32 to vector<32x1xf32>
    %193 = arith.mulf %191, %192 : vector<32x1xf32>
    %194 = arith.mulf %189, %189 : vector<32x512xf32>
    %cst_139 = arith.constant dense<0.000000e+00> : vector<32xf32>
    %195 = vector.multi_reduction <add>, %194, %cst_139 [1] : vector<32x512xf32> to vector<32xf32>
    %196 = vector.shape_cast %195 : vector<32xf32> to vector<32x1xf32>
    %cst_140 = arith.constant 0.001953125 : f32
    %197 = vector.broadcast %cst_140 : f32 to vector<32x1xf32>
    %198 = arith.mulf %196, %197 : vector<32x1xf32>
    %199 = arith.mulf %193, %193 : vector<32x1xf32>
    %200 = arith.subf %198, %199 : vector<32x1xf32>
    %cst_141 = arith.constant 0.000000e+00 : f32
    %201 = vector.broadcast %cst_141 : f32 to vector<32x1xf32>
    %202 = arith.maximumf %200, %201 : vector<32x1xf32>
    %cst_142 = arith.constant 1.000000e-03 : f32
    %203 = vector.broadcast %cst_142 : f32 to vector<32x1xf32>
    %204 = arith.addf %202, %203 : vector<32x1xf32>
    %205 = math.rsqrt %204 : vector<32x1xf32>
    %206 = arith.mulf %205, %186 : vector<32x1xf32>
    %207 = arith.mulf %193, %206 : vector<32x1xf32>
    %208 = arith.subf %188, %207 : vector<32x1xf32>
    %209 = vector.broadcast %206 : vector<32x1xf32> to vector<32x512xf32>
    %210 = arith.mulf %189, %209 : vector<32x512xf32>
    %211 = vector.broadcast %208 : vector<32x1xf32> to vector<32x512xf32>
    %212 = arith.addf %210, %211 : vector<32x512xf32>
    %c0_143 = arith.constant 0 : index
    %c0_144 = arith.constant 0 : index
    %213 = vector.load %arg15[%c0_143, %c0_144] : memref<32x1xf32, #tpu.memory_space<vmem>>, vector<32x1xf32>
    %214 = vector.broadcast %213 : vector<32x1xf32> to vector<32x512xf32>
    %215 = arith.mulf %214, %132 : vector<32x512xf32>
    %c0_145 = arith.constant 0 : index
    %c0_146 = arith.constant 0 : index
    %216 = vector.load %arg16[%c0_145, %c0_146] : memref<32x1xf32, #tpu.memory_space<vmem>>, vector<32x1xf32>
    %217 = vector.broadcast %216 : vector<32x1xf32> to vector<32x512xf32>
    %218 = arith.addf %215, %217 : vector<32x512xf32>
    %219 = arith.mulf %212, %218 : vector<32x512xf32>
    %cst_147 = arith.constant 2.000000e+01 : f32
    %220 = vector.broadcast %cst_147 : f32 to vector<32x512xf32>
    %221 = arith.cmpf ogt, %219, %220 : vector<32x512xf32>
    %cst_148 = arith.constant 2.000000e+01 : f32
    %222 = vector.broadcast %cst_148 : f32 to vector<32x512xf32>
    %223 = arith.minimumf %219, %222 : vector<32x512xf32>
    %224 = math.exp %223 : vector<32x512xf32>
    %cst_149 = arith.constant 1.000000e+00 : f32
    %225 = vector.broadcast %cst_149 : f32 to vector<32x512xf32>
    %226 = arith.addf %225, %224 : vector<32x512xf32>
    %227 = math.log %226 : vector<32x512xf32>
    %228 = arith.select %221, %219, %227 : vector<32x512xi1>, vector<32x512xf32>
    %229 = arith.addf %132, %228 : vector<32x512xf32>
    %cst_150 = arith.constant 2.000000e+01 : f32
    %230 = vector.broadcast %cst_150 : f32 to vector<32x512xf32>
    %231 = arith.cmpf ogt, %229, %230 : vector<32x512xf32>
    %cst_151 = arith.constant 2.000000e+01 : f32
    %232 = vector.broadcast %cst_151 : f32 to vector<32x512xf32>
    %233 = arith.minimumf %229, %232 : vector<32x512xf32>
    %234 = math.exp %233 : vector<32x512xf32>
    %cst_152 = arith.constant 1.000000e+00 : f32
    %235 = vector.broadcast %cst_152 : f32 to vector<32x512xf32>
    %236 = arith.addf %235, %234 : vector<32x512xf32>
    %237 = math.log %236 : vector<32x512xf32>
    %238 = arith.select %231, %229, %237 : vector<32x512xi1>, vector<32x512xf32>
    %cst_153 = arith.constant 1.000000e+00 : f32
    %239 = vector.broadcast %cst_153 : f32 to vector<32x512xf32>
    %240 = arith.subf %239, %22 : vector<32x512xf32>
    %241 = arith.mulf %240, %5 : vector<32x512xf32>
    %242 = arith.mulf %22, %238 : vector<32x512xf32>
    %243 = arith.addf %241, %242 : vector<32x512xf32>
    %c0_154 = arith.constant 0 : index
    %c0_155 = arith.constant 0 : index
    %244 = vector.load %arg20[%c0_154, %c0_155] : memref<32x512xf32, #tpu.memory_space<vmem>>, vector<32x512xf32>
    tpu.vector_store %arg20[%c0_154, %c0_155], %243 {strides = array<i32>} : memref<32x512xf32, #tpu.memory_space<vmem>>, vector<32x512xf32>,
    %c0_i32_156 = arith.constant 0 : i32
    %245 = arith.cmpi eq, %arg0, %c0_i32_156 : i32
    %246 = arith.extui %245 : i1 to i32
    %c0_i32_157 = arith.constant 0 : i32
    %247 = arith.cmpi ne, %246, %c0_i32_157 : i32
    scf.if %247 {
      %c0_158 = arith.constant 0 : index
      %c0_159 = arith.constant 0 : index
      %248 = vector.load %arg19[%c0_158, %c0_159] : memref<32x512xf32, #tpu.memory_space<vmem>>, vector<32x512xf32>
      %c0_160 = arith.constant 0 : index
      %c0_161 = arith.constant 0 : index
      %249 = vector.load %arg17[%c0_160, %c0_161] : memref<32x512xf32, #tpu.memory_space<vmem>>, vector<32x512xf32>
      tpu.vector_store %arg17[%c0_160, %c0_161], %248 {strides = array<i32>} : memref<32x512xf32, #tpu.memory_space<vmem>>, vector<32x512xf32>,
      %c0_162 = arith.constant 0 : index
      %c0_163 = arith.constant 0 : index
      %250 = vector.load %arg20[%c0_162, %c0_163] : memref<32x512xf32, #tpu.memory_space<vmem>>, vector<32x512xf32>
      %c0_164 = arith.constant 0 : index
      %c0_165 = arith.constant 0 : index
      %251 = vector.load %arg18[%c0_164, %c0_165] : memref<32x512xf32, #tpu.memory_space<vmem>>, vector<32x512xf32>
      tpu.vector_store %arg18[%c0_164, %c0_165], %250 {strides = array<i32>} : memref<32x512xf32, #tpu.memory_space<vmem>>, vector<32x512xf32>,
    } else {
    }
    return
  }
  func.func @transform_0(%arg0: i32) -> (i32, i32, i32) {
    %c0_i32 = arith.constant 0 : i32
    %c0_i32_0 = arith.constant 0 : i32
    %c0_i32_1 = arith.constant 0 : i32
    %c0_i32_2 = arith.constant 0 : i32
    return %c0_i32, %c0_i32_0, %c0_i32_1 : i32, i32, i32
  }
  func.func @transform_1(%arg0: i32) -> (i32, i32) {
    %c0_i32 = arith.constant 0 : i32
    %c0_i32_0 = arith.constant 0 : i32
    %c0_i32_1 = arith.constant 0 : i32
    return %c0_i32, %c0_i32_0 : i32, i32
  }
  func.func @transform_2(%arg0: i32) -> (i32, i32) {
    %c0_i32 = arith.constant 0 : i32
    %c0_i32_0 = arith.constant 0 : i32
    %c0_i32_1 = arith.constant 0 : i32
    return %c0_i32, %c0_i32_0 : i32, i32
  }
  func.func @transform_3(%arg0: i32) -> (i32, i32) {
    %c0_i32 = arith.constant 0 : i32
    %c0_i32_0 = arith.constant 0 : i32
    %c0_i32_1 = arith.constant 0 : i32
    return %c0_i32, %c0_i32_0 : i32, i32
  }
  func.func @transform_4(%arg0: i32) -> (i32, i32) {
    %c0_i32 = arith.constant 0 : i32
    %c0_i32_0 = arith.constant 0 : i32
    %c0_i32_1 = arith.constant 0 : i32
    return %c0_i32, %c0_i32_0 : i32, i32
  }
  func.func @transform_5(%arg0: i32) -> (i32, i32) {
    %c0_i32 = arith.constant 0 : i32
    %c0_i32_0 = arith.constant 0 : i32
    %c0_i32_1 = arith.constant 0 : i32
    return %c0_i32, %c0_i32_0 : i32, i32
  }
  func.func @transform_6(%arg0: i32) -> (i32, i32, i32) {
    %c0_i32 = arith.constant 0 : i32
    %c0_i32_0 = arith.constant 0 : i32
    %c0_i32_1 = arith.constant 0 : i32
    return %arg0, %c0_i32, %c0_i32_0 : i32, i32, i32
  }
  func.func @transform_7(%arg0: i32) -> (i32, i32, i32) {
    %c0_i32 = arith.constant 0 : i32
    %c0_i32_0 = arith.constant 0 : i32
    %c0_i32_1 = arith.constant 0 : i32
    return %arg0, %c0_i32, %c0_i32_0 : i32, i32, i32
  }
  func.func @transform_8(%arg0: i32) -> (i32, i32, i32) {
    %c0_i32 = arith.constant 0 : i32
    %c0_i32_0 = arith.constant 0 : i32
    %c0_i32_1 = arith.constant 0 : i32
    return %arg0, %c0_i32, %c0_i32_0 : i32, i32, i32
  }
  func.func @transform_9(%arg0: i32) -> (i32, i32, i32) {
    %c0_i32 = arith.constant 0 : i32
    %c0_i32_0 = arith.constant 0 : i32
    %c0_i32_1 = arith.constant 0 : i32
    return %arg0, %c0_i32, %c0_i32_0 : i32, i32, i32
  }
  func.func @transform_10(%arg0: i32) -> (i32, i32) {
    %c0_i32 = arith.constant 0 : i32
    %c0_i32_0 = arith.constant 0 : i32
    %c0_i32_1 = arith.constant 0 : i32
    return %c0_i32, %c0_i32_0 : i32, i32
  }
  func.func @transform_11(%arg0: i32) -> (i32, i32) {
    %c0_i32 = arith.constant 0 : i32
    %c0_i32_0 = arith.constant 0 : i32
    %c0_i32_1 = arith.constant 0 : i32
    return %c0_i32, %c0_i32_0 : i32, i32
  }
  func.func @transform_12(%arg0: i32) -> (i32, i32) {
    %c0_i32 = arith.constant 0 : i32
    %c0_i32_0 = arith.constant 0 : i32
    %c0_i32_1 = arith.constant 0 : i32
    return %c0_i32, %c0_i32_0 : i32, i32
  }
  func.func @transform_13(%arg0: i32) -> (i32, i32) {
    %c0_i32 = arith.constant 0 : i32
    %c0_i32_0 = arith.constant 0 : i32
    %c0_i32_1 = arith.constant 0 : i32
    return %c0_i32, %c0_i32_0 : i32, i32
  }
  func.func @transform_14(%arg0: i32) -> (i32, i32) {
    %c0_i32 = arith.constant 0 : i32
    %c0_i32_0 = arith.constant 0 : i32
    %c0_i32_1 = arith.constant 0 : i32
    return %c0_i32, %c0_i32_0 : i32, i32
  }
  func.func @transform_15(%arg0: i32) -> (i32, i32) {
    %c0_i32 = arith.constant 0 : i32
    %c0_i32_0 = arith.constant 0 : i32
    %c0_i32_1 = arith.constant 0 : i32
    return %c0_i32, %c0_i32_0 : i32, i32
  }
  func.func @transform_16(%arg0: i32) -> (i32, i32) {
    %c0_i32 = arith.constant 0 : i32
    %c0_i32_0 = arith.constant 0 : i32
    %c0_i32_1 = arith.constant 0 : i32
    return %c0_i32, %c0_i32_0 : i32, i32
  }
  func.func @transform_17(%arg0: i32) -> (i32, i32) {
    %c0_i32 = arith.constant 0 : i32
    %c0_i32_0 = arith.constant 0 : i32
    %c0_i32_1 = arith.constant 0 : i32
    return %c0_i32, %c0_i32_0 : i32, i32
  }
}

</mosaic_0001>

<bundles_post_ra>
// kernel: tpu_custom_call.1
= control target key start
LH: loop header
LB: loop body
LE: loop exit
PB: predicated region body
PF: predicated region fallthrough
CT: control target
= control target key end

     0   :  { %s9543_s0 = inlined_call_operand.hbm [shape: f32[9,1,512], index: 0, kind: input, shape index: {}]   ;;  %s9544_s1 = inlined_call_operand.vmem [shape: f32[32,512], index: 1, kind: input, shape index: {}]   ;;  %s9545_s2 = inlined_call_operand.vmem [shape: f32[32,512], index: 2, kind: input, shape index: {}]   ;;  %s9546_s3 = inlined_call_operand.hbm [shape: f32[32,512], index: 3, kind: input, shape index: {}]   ;;  %s9547_s4 = inlined_call_operand.hbm [shape: f32[32,288], index: 4, kind: input, shape index: {}]   ;;  %s9548_s5 = inlined_call_operand.hbm [shape: f32[32,288], index: 5, kind: input, shape index: {}]   ;;  %s9549_s6 = inlined_call_operand.vmem [shape: f32[1,32,1], index: 6, kind: input, shape index: {}]   ;;  %s9550_s7 = inlined_call_operand.vmem [shape: f32[1,32,1], index: 7, kind: input, shape index: {}]   ;;  %s9551_s8 = inlined_call_operand.vmem [shape: f32[1,32,1], index: 8, kind: input, shape index: {}]   ;;  %s9552_s9 = inlined_call_operand.vmem [shape: f32[1,32,1], index: 9, kind: input, shape index: {}]   ;;  %s9553_s10 = inlined_call_operand.vmem [shape: f32[64,96], index: 10, kind: input, shape index: {}]   ;;  %s9554_s11 = inlined_call_operand.vmem [shape: f32[64,1], index: 11, kind: input, shape index: {}]   ;;  %s9555_s12 = inlined_call_operand.vmem [shape: f32[32,1], index: 12, kind: input, shape index: {}]   ;;  %s9556_s13 = inlined_call_operand.vmem [shape: f32[32,1], index: 13, kind: input, shape index: {}]   ;;  %s9557_s14 = inlined_call_operand.vmem [shape: f32[32,1], index: 14, kind: input, shape index: {}]   ;;  %s9558_s15 = inlined_call_operand.vmem [shape: f32[32,1], index: 15, kind: input, shape index: {}]   ;;  %s9559_s16 = inlined_call_operand.hbm [shape: f32[32,512], index: 16, kind: output, shape index: {0}]   ;;  %s9560_s17 = inlined_call_operand.hbm [shape: f32[32,512], index: 17, kind: output, shape index: {1}]  }
   0x1   :  { %9658 = sst [smem:[#allocation117_spill]] %s9543_s0 }
   0x2   :  { %9659 = sst [smem:[#allocation118_spill]] %s9544_s1 }
   0x3   :  { %23 = vsyncpa [#allocation7], 0 }
   0x4   :  { %24 = vsyncpa [#allocation10], 0 }
   0x5   :  { %25 = vsyncpa [#allocation13], 0 }
   0x6   :  { %26 = vsyncpa [#allocation8], 0 }
   0x7   :  { %27 = vsyncpa [#allocation16], 0  ;;  %s5574_s24 = smov [#allocation9]  }
   0x8   :  { %s49_s25 = sshll.u32 %s5574_s24, 4  ;;  %s50_s25 = int_to_ptr.vmem [resolvable:$true] %s49_s25 }
   0x9   :  { %s5452_s26 = scalar_lea.vmem %s50_s25, 2048  ;;  %p5457_p1 = scmp.lt.s32.totalorder %s50_s25, %s50_s25 }
   0xa   :  { %p5453_p0 = scmp.ne.s32.totalorder %s50_s25, %s5452_s26  ;;  %p5458_p2 = scmp.lt.s32.totalorder %s5452_s26, %s5452_s26 }
   0xc   :  { %p5459_p3 = por %p5458_p2, %p5457_p1 }
   0xe   :  { %p5460_p4 = pnand %p5459_p3, %p5453_p0 }
  0x10   :  { %5463 = shalt.err (!%p5460_p4)
}
  0x11   :  { %s9562_s27 = smov 512   ;;  %s9566_s28 = smov 32  }
  0x12   :  { %55 = dma.hbm_to_vmem [thread:$0]  %s9546_s3, 2048, %s50_s25, [#allocation10], %s9562_s27, %s9562_s27, %s9566_s28  }
  0x13   :  { %s5577_s30 = smov [#allocation6]  }
  0x14   :  { %s33_s18 = sshll.u32 %s5577_s30, 4  ;;  %s34_s18 = int_to_ptr.vmem [resolvable:$true] %s33_s18 }
  0x15   :  { %s5472_s19 = scalar_lea.vmem %s34_s18, 576  ;;  %p5477_p6 = scmp.lt.s32.totalorder %s34_s18, %s34_s18 }
  0x16   :  { %p5473_p5 = scmp.ne.s32.totalorder %s34_s18, %s5472_s19  ;;  %p5478_p7 = scmp.lt.s32.totalorder %s5472_s19, %s5472_s19 }
  0x18   :  { %p5479_p8 = por %p5478_p7, %p5477_p6 }
  0x1a   :  { %p5480_p9 = pnand %p5479_p8, %p5473_p5 }
  0x1c   :  { %5483 = shalt.err (!%p5480_p9)
}
  0x1d   :  { %s5578_s1 = smov 64   ;;  %s5579_s20 = smov 4  }
  0x1e   :  { %s9660_s23 = sld [smem:[#allocation117_spill]]  ;;  %s5580_s24 = smov [#allocation11]  }
  0x1f   :  { %s61_s26 = sshll.u32 %s5580_s24, 4  ;;  %s62_s26 = int_to_ptr.vmem [resolvable:$true] %s61_s26 }
  0x20   :  { %s5492_s3 = scalar_lea.vmem %s62_s26, 1536  ;;  %p5497_p11 = scmp.lt.s32.totalorder %s62_s26, %s62_s26 }
  0x21   :  { %p5493_p10 = scmp.ne.s32.totalorder %s62_s26, %s5492_s3  ;;  %p5498_p12 = scmp.lt.s32.totalorder %s5492_s3, %s5492_s3 }
  0x23   :  { %p5499_p13 = por %p5498_p12, %p5497_p11 }
  0x24   :  { %39 = dma.hbm_to_vmem [thread:$0]  %s9660_s23, 576, %s34_s18, [#allocation7], %s5578_s1, %s5578_s1, %s5579_s20  }
  0x25   :  { %p5500_p0 = pnand %p5499_p13, %p5493_p10 }
  0x27   :  { %5503 = shalt.err (!%p5500_p0)
}
  0x28   :  { %s5581_s25 = smov 384   ;;  %s5582_s29 = smov 24  }
  0x29   :  { %67 = dma.hbm_to_vmem [thread:$0]  %s9547_s4, 1536, %s62_s26, [#allocation10], %s5581_s25, %s5581_s25, %s5582_s29  }
  0x2a   :  { %s5583_s19 = smov [#allocation12]  }
  0x2b   :  { %s73_s27 = sshll.u32 %s5583_s19, 4  ;;  %s74_s27 = int_to_ptr.vmem [resolvable:$true] %s73_s27 }
  0x2c   :  { %s5512_s18 = scalar_lea.vmem %s74_s27, 1536  ;;  %p5517_p2 = scmp.lt.s32.totalorder %s74_s27, %s74_s27 }
  0x2d   :  { %p5513_p1 = scmp.ne.s32.totalorder %s74_s27, %s5512_s18  ;;  %p5518_p3 = scmp.lt.s32.totalorder %s5512_s18, %s5512_s18 }
  0x2f   :  { %p5519_p4 = por %p5518_p3, %p5517_p2 }
  0x31   :  { %p5520_p5 = pnand %p5519_p4, %p5513_p1 }
  0x33   :  { %5523 = shalt.err (!%p5520_p5)
}
  0x34   :  { %79 = dma.hbm_to_vmem [thread:$0]  %s9548_s5, 1536, %s74_s27, [#allocation13], %s5581_s25, %s5581_s25, %s5582_s29  }
  0x35   :  { %5564 = dma.done.wait [#allocation7], 576  }
  0x36   :  { %5565 = vsyncadd [#allocation7], 4294966720 }
  0x37   :  { %5566 = dma.done.wait [#allocation10], 3584  }
  0x38   :  { %5567 = vsyncadd [#allocation10], 4294963712 }
  0x39   :  { %5568 = dma.done.wait [#allocation13], 1536  }
  0x3a   :  { %5569 = vsyncadd [#allocation13], 4294965760  ;;  %v9564_v0 = vmov 0.0   ;;  %v5703_v1 = vld [vmem:[#allocation9 + $0x78] sm:$0xff]  ;;  %v5705_v2 = vld [vmem:[#allocation9 + $0x60] sm:$0xff]  ;;  %s5585_s4 = smov 1   ;;  %v871_v57 = vlaneseq }
  0x3b   :  { %485 = vmatprep.mubr.f32.mxu0 %v9564_v0  ;;  %598 = vmatprep.mubr.f32.mxu1 %v9564_v0  ;;  %v5711_v3 = vld [vmem:[#allocation9 + $0x68] sm:$0xff]  ;;  %v5713_v4 = vld [vmem:[#allocation9 + $0x40] sm:$0xff]  ;;  %v5725_v6 = vld [vmem:[#allocation9 + $0x70] sm:$0xff]  ;;  %s9661_s1 = sld [smem:[#allocation118_spill]]  ;;  %s5586_s18 = smov 15   ;;  %vm396_vm0 = vcmask 785408  }
  0x3c   :  { %1182 = vrot.lane.b32.xlu1 %v5703_v1, %s5585_s4  ;;  %1158 = vrot.lane.b32.xlu0 %v5705_v2, %s5585_s4  ;;  %v5717_v5 = vld [vmem:[#allocation9 + $0x48] sm:$0xff]  ;;  %v5727_v7 = vld [vmem:[#allocation9 + $0x58] sm:$0xff]  ;;  %v5733_v9 = vld [vmem:[#allocation9 + $0x20] sm:$0xff]  ;;  %s5587_s30 = smov 111   ;;  %s5588_s29 = smov 16   ;;  %v6014_v58 = vshrl.u32 %v871_v57, 7 }
  0x3d   :  { %429 = vmatprep.subr.mxu0 %v5711_v3  ;;  %542 = vmatprep.subr.mxu1 %v5703_v1  ;;  %v5729_v8 = vld [vmem:[#allocation9 + $0x28] sm:$0xff]  ;;  %v5735_v10 = vld [vmem:[#allocation9 + $0x50] sm:$0xff]  ;;  %v5745_v11 = vld [vmem:[#allocation9 + $0x38] sm:$0xff]  ;;  %v6016_v59 = vand.u32 127, %v871_v57  ;;  %s5590_s0 = smov 112   ;;  %s5591_s19 = smov 113  }
  0x3e   :  { %430 = vmatpush1.msra.mxu0 %v5705_v2  ;;  %543 = vmatpush1.msra.mxu1 %v5725_v6  ;;  %v5747_v12 = vld [vmem:[#allocation9 + $0x8] sm:$0xff]  ;;  %v5752_v14 = vld [vmem:[#allocation9] sm:$0xff]  ;;  %v5754_v15 = vld [vmem:[#allocation9 + $0x30] sm:$0xff]  ;;  %v6023_v60 = vsub.s32 1, %v6014_v58  ;;  %v6026_v61 = vsub.s32 0, %v6014_v58  ;;  %vm1852_vm5 = vcmask 261120  }
  0x3f   :  { %431 = vmatprep.subr.mxu0 %v5717_v5  ;;  %544 = vmatprep.subr.mxu1 %v5727_v7  ;;  %v129_v13 = vld [vmem:[%s9545_s2 + $0x68] sm:$0xff]  ;;  %v5758_v16 = vld [vmem:[#allocation9 + $0x18] sm:$0xff]  ;;  %v5776_v20 = vld [vmem:[#allocation9 + $0x10] sm:$0xff]  ;;  %9662 = vst [vmem:[#allocation22_spill] sm:$0xff] %v6016_v59  ;;  %vm1184_vm1 = vcmp.lt.s32.totalorder %v6016_v59, 1  ;;  %vm1080_vm2 = vcmp.lt.s32.totalorder %v6016_v59, 15 }
  0x40   :  { %1166 = vrot.lane.b32.xlu0 %v5711_v3, %s5585_s4  ;;  %1156 = vrot.lane.b32.xlu1 %v5713_v4, %s5585_s4  ;;  %v128_v17 = vld [vmem:[%s9545_s2 + $0x60] sm:$0xff]  ;;  %v125_v18 = vld [vmem:[%s9545_s2 + $0x48] sm:$0xff]  ;;  %9663 = vst [vmem:[#allocation23_spill] sm:$0xff] %v6023_v60  ;;  %9664 = vst [vmem:[#allocation24_spill] sm:$0xff] %v6026_v61  ;;  %vm1616_vm3 = vcmp.lt.s32.totalorder %v6016_v59, 111  ;;  %vm976_vm4 = vcmp.lt.s32.totalorder %v6016_v59, 16 }
  0x41   :  { %432 = vmatpush1.msra.mxu0 %v5713_v4  ;;  %545 = vmatpush1.msra.mxu1 %v5735_v10  ;;  %v131_v19 = vld [vmem:[%s9545_s2 + $0x78] sm:$0xff]  ;;  %v124_v21 = vld [vmem:[%s9545_s2 + $0x40] sm:$0xff]  ;;  %v130_v22 = vld [vmem:[%s9545_s2 + $0x70] sm:$0xff]  ;;  %s5592_s20 = smov 127   ;;  %vm873_vm6 = vcmp.lt.s32.totalorder %v6016_v59, 17  ;;  %vm1512_vm7 = vcmp.lt.s32.totalorder %v6016_v59, 112 }
  0x42   :  { %433 = vmatprep.subr.mxu0 %v5729_v8  ;;  %546 = vmatprep.subr.mxu1 %v5745_v11  ;;  %v121_v23 = vld [vmem:[%s9545_s2 + $0x28] sm:$0xff]  ;;  %v127_v24 = vld [vmem:[%s9545_s2 + $0x58] sm:$0xff]  ;;  %v120_v25 = vld [vmem:[%s9545_s2 + $0x20] sm:$0xff]  ;;  %vm1408_vm8 = vcmp.lt.s32.totalorder %v6016_v59, 113  ;;  %vm1304_vm9 = vcmp.lt.s32.totalorder %v6016_v59, 127 }
  0x43   :  { %434 = vmatpush1.msra.mxu0 %v5733_v9  ;;  %547 = vmatpush1.msra.mxu1 %v5754_v15  ;;  %v126_v26 = vld [vmem:[%s9545_s2 + $0x50] sm:$0xff]  ;;  %v117_v27 = vld [vmem:[%s9545_s2 + $0x8] sm:$0xff]  ;;  %v123_v28 = vld [vmem:[%s9545_s2 + $0x38] sm:$0xff] }
  0x44   :  { %1164 = vrot.lane.b32.xlu0 %v5717_v5, %s5585_s4  ;;  %1180 = vrot.lane.b32.xlu1 %v5727_v7, %s5585_s4  ;;  %v116_v29 = vld [vmem:[%s9545_s2] sm:$0xff]  ;;  %v122_v30 = vld [vmem:[%s9545_s2 + $0x30] sm:$0xff]  ;;  %v6030_v63 = vld [vmem:[#allocation6 + $0xc] sm:$0xf] }
  0x45   :  { %435 = vmatprep.subr.mxu0 %v5747_v12  ;;  %548 = vmatprep.subr.mxu1 %v5758_v16  ;;  %v193_v31 = vld [vmem:[%s9661_s1 + $0x68] sm:$0xff]  ;;  %v119_v32 = vld [vmem:[%s9545_s2 + $0x18] sm:$0xff]  ;;  %v192_v33 = vld [vmem:[%s9661_s1 + $0x60] sm:$0xff] }
  0x46   :  { %436 = vmatpush1.msra.mxu0 %v5752_v14  ;;  %549 = vmatpush1.msra.mxu1 %v5776_v20  ;;  %v118_v34 = vld [vmem:[%s9545_s2 + $0x10] sm:$0xff]  ;;  %v189_v35 = vld [vmem:[%s9661_s1 + $0x48] sm:$0xff]  ;;  %v195_v36 = vld [vmem:[%s9661_s1 + $0x78] sm:$0xff] }
  0x47   :  { %437 = vmatprep.subr.mxu0 %v129_v13  ;;  %550 = vmatprep.subr.mxu1 %v131_v19  ;;  %v188_v37 = vld [vmem:[%s9661_s1 + $0x40] sm:$0xff]  ;;  %v194_v38 = vld [vmem:[%s9661_s1 + $0x70] sm:$0xff]  ;;  %v185_v39 = vld [vmem:[%s9661_s1 + $0x28] sm:$0xff] }
  0x48   :  { %1162 = vrot.lane.b32.xlu1 %v5729_v8, %s5585_s4  ;;  %1154 = vrot.lane.b32.xlu0 %v5733_v9, %s5585_s4  ;;  %v191_v40 = vld [vmem:[%s9661_s1 + $0x58] sm:$0xff]  ;;  %v184_v41 = vld [vmem:[%s9661_s1 + $0x20] sm:$0xff] }
  0x49   :  { %438 = vmatpush1.msra.mxu0 %v128_v17  ;;  %551 = vmatpush1.msra.mxu1 %v130_v22  ;;  %v190_v42 = vld [vmem:[%s9661_s1 + $0x50] sm:$0xff]  ;;  %v181_v43 = vld [vmem:[%s9661_s1 + $0x8] sm:$0xff]  ;;  %v187_v44 = vld [vmem:[%s9661_s1 + $0x38] sm:$0xff]  ;;  %v1211_v17 = vrot.slane %v6030_v63, %v6023_v60 }
  0x4a   :  { %439 = vmatprep.subr.mxu0 %v125_v18  ;;  %552 = vmatprep.subr.mxu1 %v127_v24  ;;  %v180_v45 = vld [vmem:[%s9661_s1] sm:$0xff]  ;;  %v186_v46 = vld [vmem:[%s9661_s1 + $0x30] sm:$0xff]  ;;  %v183_v48 = vld [vmem:[%s9661_s1 + $0x18] sm:$0xff]  ;;  %v1207_v18 = vrot.slane %v6030_v63, %v6026_v61 }
  0x4b   :  { %440 = vmatpush1.msra.mxu0 %v124_v21  ;;  %553 = vmatpush1.msra.mxu1 %v126_v26  ;;  %v292_v47 = vld [vmem:[%s9553_s10] sm:$0xff]  ;;  %v182_v49 = vld [vmem:[%s9661_s1 + $0x10] sm:$0xff]  ;;  %v293_v50 = vld [vmem:[%s9553_s10 + $0x8] sm:$0xff] }
  0x4c   :  { %1178 = vrot.lane.b32.xlu0 %v5745_v11, %s5585_s4  ;;  %1152 = vrot.lane.b32.xlu1 %v5752_v14, %s5585_s4  ;;  %v294_v51 = vld [vmem:[%s9553_s10 + $0x10] sm:$0xff]  ;;  %v295_v52 = vld [vmem:[%s9553_s10 + $0x18] sm:$0xff] }
  0x4d   :  { %441 = vmatprep.subr.mxu0 %v121_v23  ;;  %554 = vmatprep.subr.mxu1 %v123_v28  ;;  %v296_v53 = vld [vmem:[%s9553_s10 + $0x20] sm:$0xff]  ;;  %v297_v54 = vld [vmem:[%s9553_s10 + $0x28] sm:$0xff]  ;;  %v298_v55 = vld [vmem:[%s9553_s10 + $0x30] sm:$0xff] }
  0x4e   :  { %442 = vmatpush1.msra.mxu0 %v120_v25  ;;  %555 = vmatpush1.msra.mxu1 %v122_v30  ;;  %v299_v56 = vld [vmem:[%s9553_s10 + $0x38] sm:$0xff]  ;;  %s5589_s10 = smov 17  }
  0x4f   :  { %443 = vmatprep.subr.mxu0 %v117_v27  ;;  %556 = vmatprep.subr.mxu1 %v119_v32 }
  0x50   :  { %1160 = vrot.lane.b32.xlu0 %v5747_v12, %s5585_s4  ;;  %1176 = vrot.lane.b32.xlu1 %v5758_v16, %s5585_s4 }
  0x51   :  { %444 = vmatpush1.msra.mxu0 %v116_v29  ;;  %557 = vmatpush1.msra.mxu1 %v118_v34 }
  0x52   :  { %445 = vmatprep.subr.mxu0 %v193_v31  ;;  %558 = vmatprep.subr.mxu1 %v195_v36 }
  0x53   :  { %446 = vmatpush1.msra.mxu0 %v192_v33  ;;  %559 = vmatpush1.msra.mxu1 %v194_v38 }
  0x54   :  { %1054 = vrot.lane.b32.xlu0 %v5705_v2, %s5586_s18  ;;  %1062 = vrot.lane.b32.xlu1 %v5711_v3, %s5586_s18 }
  0x55   :  { %447 = vmatprep.subr.mxu0 %v189_v35  ;;  %560 = vmatprep.subr.mxu1 %v191_v40  ;;  %v6085_v40 = vld [vmem:[#allocation6 + $0x8] sm:$0xf] }
  0x56   :  { %448 = vmatpush1.msra.mxu0 %v188_v37  ;;  %561 = vmatpush1.msra.mxu1 %v190_v42  ;;  %v6131_v57 = vrot.slane %v6085_v40, %v6026_v61 }
  0x57   :  { %449 = vmatprep.subr.mxu0 %v185_v39  ;;  %562 = vmatprep.subr.mxu1 %v187_v44 }
  0x58   :  { %1598 = vrot.lane.b32.xlu0 %v5711_v3, %s5587_s30  ;;  %1606 = vrot.lane.b32.xlu1 %v5725_v6, %s5587_s30 }
  0x59   :  { %450 = vmatpush1.msra.mxu0 %v184_v41  ;;  %563 = vmatpush1.msra.mxu1 %v186_v46 }
  0x5a   :  { %451 = vmatprep.subr.mxu0 %v181_v43  ;;  %564 = vmatprep.subr.mxu1 %v183_v48  ;;  %v1634_v48 = vld [vmem:[#allocation6 + $0x20] sm:$0xf] }
  0x5b   :  { %452 = vmatpush1.msra.mxu0 %v180_v45  ;;  %565 = vmatpush1.msra.mxu1 %v182_v49 }
  0x5c   :  { %1078 = vrot.lane.b32.xlu0 %v5703_v1, %s5586_s18  ;;  %1590 = vrot.lane.b32.xlu1 %v5705_v2, %s5587_s30 }
  0x5d   :  { %4919 = vmatmul.mubr.msk.f32.vlgmr.msra.gmra.mxu0 %vm396_vm0, %v292_v47  ;;  %4927 = vmatmul.mubr.msk.f32.vlgmr.msra.gmra.mxu1 %vm396_vm0, %v292_v47  ;;  %v6104_v47 = vrot.slane %v6085_v40, %v6023_v60 }
  0x5e   :  { %491 = vmatprep.mubr.f32.mxu0 %v9564_v0  ;;  %604 = vmatprep.mubr.f32.mxu1 %v9564_v0 }
  0x60   :  { %1052 = vrot.lane.b32.xlu0 %v5713_v4, %s5586_s18  ;;  %1060 = vrot.lane.b32.xlu1 %v5717_v5, %s5586_s18 }
  0x61   :  { %4928 = vmatmul.mubr.msk.f32.gmra.mxu1 %vm396_vm0, %v293_v50  ;;  %4920 = vmatmul.mubr.msk.f32.gmra.mxu0 %vm396_vm0, %v293_v50 }
  0x62   :  { %610 = vmatprep.mubr.f32.mxu1 %v9564_v0  ;;  %497 = vmatprep.mubr.f32.mxu0 %v9564_v0 }
  0x64   :  { %1596 = vrot.lane.b32.xlu0 %v5717_v5, %s5587_s30  ;;  %1604 = vrot.lane.b32.xlu1 %v5735_v10, %s5587_s30 }
  0x65   :  { %4929 = vmatmul.mubr.msk.f32.gmra.mxu1 %vm396_vm0, %v294_v51  ;;  %4921 = vmatmul.mubr.msk.f32.gmra.mxu0 %vm396_vm0, %v294_v51 }
  0x66   :  { %616 = vmatprep.mubr.f32.mxu1 %v9564_v0  ;;  %503 = vmatprep.mubr.f32.mxu0 %v9564_v0 }
  0x68   :  { %1076 = vrot.lane.b32.xlu0 %v5727_v7, %s5586_s18  ;;  %1588 = vrot.lane.b32.xlu1 %v5713_v4, %s5587_s30 }
  0x69   :  { %4930 = vmatmul.mubr.msk.f32.gmra.mxu1 %vm396_vm0, %v295_v52  ;;  %4922 = vmatmul.mubr.msk.f32.gmra.mxu0 %vm396_vm0, %v295_v52 }
  0x6a   :  { %622 = vmatprep.mubr.f32.mxu1 %v9564_v0  ;;  %509 = vmatprep.mubr.f32.mxu0 %v9564_v0 }
  0x6c   :  { %1050 = vrot.lane.b32.xlu0 %v5733_v9, %s5586_s18  ;;  %1058 = vrot.lane.b32.xlu1 %v5729_v8, %s5586_s18 }
  0x6d   :  { %4931 = vmatmul.mubr.msk.f32.gmra.mxu1 %vm396_vm0, %v296_v53  ;;  %4923 = vmatmul.mubr.msk.f32.gmra.mxu0 %vm396_vm0, %v296_v53  ;;  %v6118_v53 = vrot.slane %v1634_v48, %v6023_v60 }
  0x6e   :  { %628 = vmatprep.mubr.f32.mxu1 %v9564_v0  ;;  %515 = vmatprep.mubr.f32.mxu0 %v9564_v0 }
  0x70   :  { %1594 = vrot.lane.b32.xlu0 %v5729_v8, %s5587_s30  ;;  %1602 = vrot.lane.b32.xlu1 %v5754_v15, %s5587_s30 }
  0x71   :  { %4932 = vmatmul.mubr.msk.f32.gmra.mxu1 %vm396_vm0, %v297_v54  ;;  %4924 = vmatmul.mubr.msk.f32.gmra.mxu0 %vm396_vm0, %v297_v54 }
  0x72   :  { %634 = vmatprep.mubr.f32.mxu1 %v9564_v0  ;;  %521 = vmatprep.mubr.f32.mxu0 %v9564_v0 }
  0x74   :  { %1074 = vrot.lane.b32.xlu0 %v5745_v11, %s5586_s18  ;;  %1586 = vrot.lane.b32.xlu1 %v5733_v9, %s5587_s30 }
  0x75   :  { %4933 = vmatmul.mubr.msk.f32.gmra.mxu1 %vm396_vm0, %v298_v55  ;;  %4925 = vmatmul.mubr.msk.f32.gmra.mxu0 %vm396_vm0, %v298_v55 }
  0x76   :  { %640 = vmatprep.mubr.f32.mxu1 %v9564_v0  ;;  %527 = vmatprep.mubr.f32.mxu0 %v9564_v0 }
  0x78   :  { %1048 = vrot.lane.b32.xlu0 %v5752_v14, %s5586_s18  ;;  %1056 = vrot.lane.b32.xlu1 %v5747_v12, %s5586_s18 }
  0x79   :  { %4934 = vmatmul.mubr.msk.f32.gmra.mxu1 %vm396_vm0, %v299_v56  ;;  %4926 = vmatmul.mubr.msk.f32.gmra.mxu0 %vm396_vm0, %v299_v56 }
  0x7a   :  { %2018 = vmatprep.mubr.f32.mxu1 %v9564_v0 }
  0x7c   :  { %1592 = vrot.lane.b32.xlu0 %v5747_v12, %s5587_s30  ;;  %1600 = vrot.lane.b32.xlu1 %v5776_v20, %s5587_s30 }
  0x80   :  { %1072 = vrot.lane.b32.xlu0 %v5758_v16, %s5586_s18  ;;  %1584 = vrot.lane.b32.xlu1 %v5752_v14, %s5587_s30 }
  0x84   :  { %950 = vrot.lane.b32.xlu0 %v5705_v2, %s5588_s29  ;;  %958 = vrot.lane.b32.xlu1 %v5711_v3, %s5588_s29 }
  0x88   :  { %1174 = vrot.lane.b32.xlu0 %v5725_v6, %s5585_s4  ;;  %974 = vrot.lane.b32.xlu1 %v5703_v1, %s5588_s29 }
  0x8c   :  { %948 = vrot.lane.b32.xlu0 %v5713_v4, %s5588_s29  ;;  %956 = vrot.lane.b32.xlu1 %v5717_v5, %s5588_s29 }
  0x90   :  { %1172 = vrot.lane.b32.xlu0 %v5735_v10, %s5585_s4  ;;  %972 = vrot.lane.b32.xlu1 %v5727_v7, %s5588_s29 }
  0x94   :  { %946 = vrot.lane.b32.xlu0 %v5733_v9, %s5588_s29  ;;  %954 = vrot.lane.b32.xlu1 %v5729_v8, %s5588_s29 }
  0x98   :  { %1170 = vrot.lane.b32.xlu0 %v5754_v15, %s5585_s4  ;;  %970 = vrot.lane.b32.xlu1 %v5745_v11, %s5588_s29 }
  0x9c   :  { %944 = vrot.lane.b32.xlu0 %v5752_v14, %s5588_s29  ;;  %952 = vrot.lane.b32.xlu1 %v5747_v12, %s5588_s29 }
  0xa0   :  { %1168 = vrot.lane.b32.xlu0 %v5776_v20, %s5585_s4  ;;  %968 = vrot.lane.b32.xlu1 %v5758_v16, %s5588_s29 }
  0xa4   :  { %845 = vrot.lane.b32.xlu0 %v5705_v2, %s5589_s10  ;;  %853 = vrot.lane.b32.xlu1 %v5711_v3, %s5589_s10 }
  0xa8   :  { %1070 = vrot.lane.b32.xlu0 %v5725_v6, %s5586_s18  ;;  %869 = vrot.lane.b32.xlu1 %v5703_v1, %s5589_s10 }
  0xac   :  { %843 = vrot.lane.b32.xlu0 %v5713_v4, %s5589_s10  ;;  %851 = vrot.lane.b32.xlu1 %v5717_v5, %s5589_s10 }
  0xae   :  { %v6028_v62 = vpop.permute.xlu1 %1182  ;;  %v1159_v13 = vpop.permute.xlu0 %1158 }
  0xaf   :  { %v1200_v19 = vsel %vm1184_vm1, %v6028_v62, %v1159_v13 }
  0xb0   :  { %1068 = vrot.lane.b32.xlu0 %v5735_v10, %s5586_s18  ;;  %867 = vrot.lane.b32.xlu1 %v5727_v7, %s5589_s10  ;;  %v1236_v25 = vmul.f32 %v1207_v18, %v1200_v19 }
  0xb2   :  { %v6044_v21 = vpop.permute.xlu0 %1166  ;;  %v1157_v22 = vpop.permute.xlu1 %1156 }
  0xb3   :  { %v1196_v23 = vsel %vm1184_vm1, %v1159_v13, %v6044_v21  ;;  %v6134_v13 = vrot.slane %v1634_v48, %v6026_v61 }
  0xb4   :  { %841 = vrot.lane.b32.xlu0 %v5733_v9, %s5589_s10  ;;  %849 = vrot.lane.b32.xlu1 %v5729_v8, %s5589_s10  ;;  %v1237_v24 = vmul.f32 %v1211_v17, %v1196_v23 }
  0xb6   :  { %v6053_v26 = vpop.permute.xlu0 %1164  ;;  %v6055_v27 = vpop.permute.xlu1 %1180  ;;  %1865 = vmatprep.subr.mxu0 %v1237_v24 }
  0xb7   :  { %v1195_v28 = vsel %vm1184_vm1, %v1157_v22, %v6053_v26  ;;  %v1199_v29 = vsel %vm1184_vm1, %v6055_v27, %v1157_v22  ;;  %1866 = vmatpush1.msra.mxu0 %v1236_v25 }
  0xb8   :  { %v1232_v30 = vmul.f32 %v1207_v18, %v1199_v29  ;;  %1066 = vrot.lane.b32.xlu0 %v5754_v15, %s5586_s18  ;;  %865 = vrot.lane.b32.xlu1 %v5745_v11, %s5589_s10  ;;  %v1233_v31 = vmul.f32 %v1211_v17, %v1195_v28 }
  0xba   :  { %v6067_v32 = vpop.permute.xlu1 %1162  ;;  %v1155_v33 = vpop.permute.xlu0 %1154  ;;  %1867 = vmatprep.subr.mxu0 %v1233_v31 }
  0xbb   :  { %v1194_v34 = vsel %vm1184_vm1, %v1155_v33, %v6067_v32  ;;  %1868 = vmatpush1.msra.mxu0 %v1232_v30 }
  0xbc   :  { %839 = vrot.lane.b32.xlu0 %v5752_v14, %s5589_s10  ;;  %847 = vrot.lane.b32.xlu1 %v5747_v12, %s5589_s10  ;;  %v1229_v35 = vmul.f32 %v1211_v17, %v1194_v34 }
  0xbe   :  { %v6076_v36 = vpop.permute.xlu0 %1178  ;;  %v1153_v37 = vpop.permute.xlu1 %1152  ;;  %1869 = vmatprep.subr.mxu0 %v1229_v35 }
  0xbf   :  { %v1198_v38 = vsel %vm1184_vm1, %v6076_v36, %v1155_v33 }
  0xc0   :  { %v1228_v39 = vmul.f32 %v1207_v18, %v1198_v38  ;;  %1064 = vrot.lane.b32.xlu0 %v5776_v20, %s5586_s18  ;;  %863 = vrot.lane.b32.xlu1 %v5758_v16, %s5589_s10 }
  0xc2   :  { %v6087_v41 = vpop.permute.xlu0 %1160  ;;  %v6089_v42 = vpop.permute.xlu1 %1176  ;;  %1870 = vmatpush1.msra.mxu0 %v1228_v39 }
  0xc3   :  { %v1193_v43 = vsel %vm1184_vm1, %v1153_v37, %v6087_v41  ;;  %v1197_v44 = vsel %vm1184_vm1, %v6089_v42, %v1153_v37 }
  0xc4   :  { %v1224_v45 = vmul.f32 %v1207_v18, %v1197_v44  ;;  %966 = vrot.lane.b32.xlu0 %v5725_v6, %s5588_s29  ;;  %1494 = vrot.lane.b32.xlu1 %v5711_v3, %s5590_s0  ;;  %v1225_v46 = vmul.f32 %v1211_v17, %v1193_v43 }
  0xc6   :  { %v1055_v49 = vpop.permute.xlu0 %1054  ;;  %v6106_v50 = vpop.permute.xlu1 %1062  ;;  %1871 = vmatprep.subr.mxu0 %v1225_v46 }
  0xc7   :  { %v1092_v51 = vsel %vm1080_vm2, %v1055_v49, %v6106_v50  ;;  %1872 = vmatpush1.msra.mxu0 %v1224_v45 }
  0xc8   :  { %1502 = vrot.lane.b32.xlu0 %v5725_v6, %s5590_s0  ;;  %1486 = vrot.lane.b32.xlu1 %v5705_v2, %s5590_s0  ;;  %v1133_v52 = vmul.f32 %v6104_v47, %v1092_v51 }
  0xca   :  { %v1599_v54 = vpop.permute.xlu0 %1598  ;;  %v6120_v55 = vpop.permute.xlu1 %1606  ;;  %1873 = vmatprep.subr.mxu0 %v1133_v52 }
  0xcb   :  { %v1624_v56 = vsel %vm1616_vm3, %v1599_v54, %v6120_v55 }
  0xcc   :  { %964 = vrot.lane.b32.xlu0 %v5735_v10, %s5588_s29  ;;  %1492 = vrot.lane.b32.xlu1 %v5717_v5, %s5590_s0  ;;  %v1669_v17 = vmul.f32 %v6118_v53, %v1624_v56 }
  0xce   :  { %v6137_v18 = vpop.permute.xlu0 %1078  ;;  %v6139_v19 = vpop.permute.xlu1 %1590  ;;  %1978 = vmatprep.subr.mxu1 %v1669_v17 }
  0xcf   :  { %v1096_v22 = vsel %vm1080_vm2, %v6137_v18, %v1055_v49  ;;  %v1628_v23 = vsel %vm1616_vm3, %v6139_v19, %v1599_v54 }
  0xd0   :  { %v1132_v24 = vmul.f32 %v6131_v57, %v1096_v22  ;;  %v1668_v25 = vmul.f32 %v6134_v13, %v1628_v23  ;;  %1500 = vrot.lane.b32.xlu0 %v5735_v10, %s5590_s0  ;;  %1484 = vrot.lane.b32.xlu1 %v5713_v4, %s5590_s0 }
  0xd2   :  { %v1053_v28 = vpop.permute.xlu0 %1052  ;;  %v6153_v29 = vpop.permute.xlu1 %1060  ;;  %1874 = vmatpush1.msra.mxu0 %v1132_v24  ;;  %1979 = vmatpush1.msra.mxu1 %v1668_v25 }
  0xd3   :  { %v1091_v30 = vsel %vm1080_vm2, %v1053_v28, %v6153_v29 }
  0xd4   :  { %962 = vrot.lane.b32.xlu0 %v5754_v15, %s5588_s29  ;;  %1490 = vrot.lane.b32.xlu1 %v5729_v8, %s5590_s0  ;;  %v1129_v31 = vmul.f32 %v6104_v47, %v1091_v30 }
  0xd6   :  { %v1597_v33 = vpop.permute.xlu0 %1596  ;;  %v6163_v34 = vpop.permute.xlu1 %1604  ;;  %1875 = vmatprep.subr.mxu0 %v1129_v31 }
  0xd7   :  { %v1623_v35 = vsel %vm1616_vm3, %v1597_v33, %v6163_v34 }
  0xd8   :  { %1498 = vrot.lane.b32.xlu0 %v5754_v15, %s5590_s0  ;;  %1482 = vrot.lane.b32.xlu1 %v5733_v9, %s5590_s0  ;;  %v1665_v37 = vmul.f32 %v6118_v53, %v1623_v35 }
  0xda   :  { %v6173_v38 = vpop.permute.xlu0 %1076  ;;  %v6175_v39 = vpop.permute.xlu1 %1588  ;;  %1980 = vmatprep.subr.mxu1 %v1665_v37 }
  0xdb   :  { %v1095_v43 = vsel %vm1080_vm2, %v6173_v38, %v1053_v28  ;;  %v1627_v44 = vsel %vm1616_vm3, %v6175_v39, %v1597_v33 }
  0xdc   :  { %v1128_v45 = vmul.f32 %v6131_v57, %v1095_v43  ;;  %v1664_v46 = vmul.f32 %v6134_v13, %v1627_v44  ;;  %960 = vrot.lane.b32.xlu0 %v5776_v20, %s5588_s29  ;;  %1488 = vrot.lane.b32.xlu1 %v5747_v12, %s5590_s0 }
  0xde   :  { %v1051_v48 = vpop.permute.xlu0 %1050  ;;  %v6189_v49 = vpop.permute.xlu1 %1058  ;;  %1876 = vmatpush1.msra.mxu0 %v1128_v45  ;;  %1981 = vmatpush1.msra.mxu1 %v1664_v46 }
  0xdf   :  { %v1090_v51 = vsel %vm1080_vm2, %v1051_v48, %v6189_v49 }
  0xe0   :  { %1496 = vrot.lane.b32.xlu0 %v5776_v20, %s5590_s0  ;;  %1480 = vrot.lane.b32.xlu1 %v5752_v14, %s5590_s0  ;;  %v1125_v52 = vmul.f32 %v6104_v47, %v1090_v51  ;;  %v6245_v51 = vld [vmem:[#allocation6 + $0x4] sm:$0xf] }
  0xe2   :  { %v1595_v54 = vpop.permute.xlu0 %1594  ;;  %v6199_v56 = vpop.permute.xlu1 %1602  ;;  %1877 = vmatprep.subr.mxu0 %v1125_v52 }
  0xe3   :  { %v1622_v17 = vsel %vm1616_vm3, %v1595_v54, %v6199_v56 }
  0xe4   :  { %861 = vrot.lane.b32.xlu0 %v5725_v6, %s5589_s10  ;;  %1390 = vrot.lane.b32.xlu1 %v5711_v3, %s5591_s19  ;;  %v1661_v22 = vmul.f32 %v6118_v53, %v1622_v17 }
  0xe6   :  { %v6209_v23 = vpop.permute.xlu0 %1074  ;;  %v6211_v24 = vpop.permute.xlu1 %1586  ;;  %1982 = vmatprep.subr.mxu1 %v1661_v22  ;;  %v6259_v22 = vsub.s32 2, %v6014_v58 }
  0xe7   :  { %v1094_v25 = vsel %vm1080_vm2, %v6209_v23, %v1051_v48  ;;  %v1626_v28 = vsel %vm1616_vm3, %v6211_v24, %v1595_v54 }
  0xe8   :  { %v1124_v30 = vmul.f32 %v6131_v57, %v1094_v25  ;;  %v1660_v31 = vmul.f32 %v6134_v13, %v1626_v28  ;;  %1398 = vrot.lane.b32.xlu0 %v5725_v6, %s5591_s19  ;;  %1382 = vrot.lane.b32.xlu1 %v5705_v2, %s5591_s19  ;;  %9665 = vst [vmem:[#allocation25_spill] sm:$0xff] %v6259_v22 }
  0xea   :  { %v1049_v33 = vpop.permute.xlu0 %1048  ;;  %v6225_v35 = vpop.permute.xlu1 %1056  ;;  %1878 = vmatpush1.msra.mxu0 %v1124_v30  ;;  %1983 = vmatpush1.msra.mxu1 %v1660_v31  ;;  %v6272_v30 = vsub.s32 3, %v6014_v58  ;;  %v1690_v31 = vld [vmem:[#allocation11 + $0x10] sm:$0xff]  ;;  %v6290_v58 = vrot.slane %v6245_v51, %v6026_v61 }
  0xeb   :  { %v1089_v37 = vsel %vm1080_vm2, %v1049_v33, %v6225_v35 }
  0xec   :  { %859 = vrot.lane.b32.xlu0 %v5735_v10, %s5589_s10  ;;  %1388 = vrot.lane.b32.xlu1 %v5717_v5, %s5591_s19  ;;  %v1121_v43 = vmul.f32 %v6104_v47, %v1089_v37  ;;  %9666 = vst [vmem:[#allocation26_spill] sm:$0xff] %v6272_v30 }
  0xee   :  { %v1593_v44 = vpop.permute.xlu0 %1592  ;;  %v6235_v45 = vpop.permute.xlu1 %1600  ;;  %1879 = vmatprep.subr.mxu0 %v1121_v43 }
  0xef   :  { %v1621_v46 = vsel %vm1616_vm3, %v1593_v44, %v6235_v45 }
  0xf0   :  { %1396 = vrot.lane.b32.xlu0 %v5735_v10, %s5591_s19  ;;  %1380 = vrot.lane.b32.xlu1 %v5713_v4, %s5591_s19  ;;  %v1657_v48 = vmul.f32 %v6118_v53, %v1621_v46  ;;  %v6263_v53 = vrot.slane %v6245_v51, %v6023_v60 }
  0xf2   :  { %v6248_v47 = vpop.permute.xlu0 %1072  ;;  %v6250_v52 = vpop.permute.xlu1 %1584  ;;  %1984 = vmatprep.subr.mxu1 %v1657_v48 }
  0xf3   :  { %v1093_v54 = vsel %vm1080_vm2, %v6248_v47, %v1049_v33  ;;  %v1625_v17 = vsel %vm1616_vm3, %v6250_v52, %v1593_v44  ;;  %v6295_v44 = vrot.slane %v6030_v63, %v6272_v30 }
  0xf4   :  { %v1120_v25 = vmul.f32 %v6131_v57, %v1093_v54  ;;  %v1656_v28 = vmul.f32 %v6134_v13, %v1625_v17  ;;  %857 = vrot.lane.b32.xlu0 %v5754_v15, %s5589_s10  ;;  %1386 = vrot.lane.b32.xlu1 %v5729_v8, %s5591_s19  ;;  %v6281_v13 = vrot.slane %v6030_v63, %v6259_v22 }
  0xf6   :  { %v951_v33 = vpop.permute.xlu0 %950  ;;  %v6274_v37 = vpop.permute.xlu1 %958  ;;  %1880 = vmatpush1.msra.mxu0 %v1120_v25  ;;  %1985 = vmatpush1.msra.mxu1 %v1656_v28 }
  0xf7   :  { %v988_v57 = vsel %vm976_vm4, %v951_v33, %v6274_v37  ;;  %4935 = vmatmul.mubr.msk.f32.vlgmr.msra.gmra.mxu1 %vm1852_vm5, %v1690_v31 }
  0xf8   :  { %1394 = vrot.lane.b32.xlu0 %v5754_v15, %s5591_s19  ;;  %1378 = vrot.lane.b32.xlu1 %v5733_v9, %s5591_s19  ;;  %v1029_v43 = vmul.f32 %v6263_v53, %v988_v57 }
  0xf9   :  { %2024 = vmatprep.mubr.f32.mxu1 %v9564_v0 }
  0xfa   :  { %v1175_v46 = vpop.permute.xlu0 %1174  ;;  %v6298_v48 = vpop.permute.xlu1 %974  ;;  %1881 = vmatprep.subr.mxu0 %v1029_v43 }
  0xfb   :  { %v1188_v54 = vsel %vm1184_vm1, %v1175_v46, %v6028_v62  ;;  %v1192_v17 = vsel %vm1184_vm1, %v6044_v21, %v1175_v46  ;;  %v992_v25 = vsel %vm976_vm4, %v6298_v48, %v951_v33 }
  0xfc   :  { %v1238_v63 = vmul.f32 %v6281_v13, %v1192_v17  ;;  %v1028_v28 = vmul.f32 %v6290_v58, %v992_v25  ;;  %855 = vrot.lane.b32.xlu0 %v5776_v20, %s5589_s10  ;;  %1384 = vrot.lane.b32.xlu1 %v5747_v12, %s5591_s19  ;;  %v1239_v62 = vmul.f32 %v6295_v44, %v1188_v54 }
  0xfe   :  { %v949_v31 = vpop.permute.xlu0 %948  ;;  %v6316_v57 = vpop.permute.xlu1 %956  ;;  %1882 = vmatpush1.msra.mxu0 %v1028_v28  ;;  %2043 = vmatprep.subr.mxu1 %v1239_v62 }
  0xff   :  { %v987_v21 = vsel %vm976_vm4, %v949_v31, %v6316_v57  ;;  %2044 = vmatpush1.msra.mxu1 %v1238_v63 }
 0x100   :  { %1392 = vrot.lane.b32.xlu0 %v5776_v20, %s5591_s19  ;;  %1376 = vrot.lane.b32.xlu1 %v5752_v14, %s5591_s19  ;;  %v1025_v33 = vmul.f32 %v6263_v53, %v987_v21 }
 0x102   :  { %v1173_v43 = vpop.permute.xlu0 %1172  ;;  %v6326_v46 = vpop.permute.xlu1 %972  ;;  %1883 = vmatprep.subr.mxu0 %v1025_v33 }
 0x103   :  { %v1187_v54 = vsel %vm1184_vm1, %v1173_v43, %v6055_v27  ;;  %v1191_v17 = vsel %vm1184_vm1, %v6053_v26, %v1173_v43  ;;  %v991_v25 = vsel %vm976_vm4, %v6326_v46, %v949_v31 }
 0x104   :  { %v1234_v63 = vmul.f32 %v6281_v13, %v1191_v17  ;;  %v1024_v28 = vmul.f32 %v6290_v58, %v991_v25  ;;  %1286 = vrot.lane.b32.xlu0 %v5711_v3, %s5592_s20  ;;  %1294 = vrot.lane.b32.xlu1 %v5725_v6, %s5592_s20  ;;  %v1235_v27 = vmul.f32 %v6295_v44, %v1187_v54 }
 0x106   :  { %v947_v62 = vpop.permute.xlu0 %946  ;;  %v6344_v21 = vpop.permute.xlu1 %954  ;;  %1884 = vmatpush1.msra.mxu0 %v1024_v28  ;;  %2045 = vmatprep.subr.mxu1 %v1235_v27 }
 0x107   :  { %v986_v26 = vsel %vm976_vm4, %v947_v62, %v6344_v21  ;;  %2046 = vmatpush1.msra.mxu1 %v1234_v63 }
 0x108   :  { %1510 = vrot.lane.b32.xlu0 %v5703_v1, %s5590_s0  ;;  %1278 = vrot.lane.b32.xlu1 %v5705_v2, %s5592_s20  ;;  %v1021_v3 = vmul.f32 %v6263_v53, %v986_v26 }
 0x10a   :  { %v1171_v6 = vpop.permute.xlu0 %1170  ;;  %v6354_v31 = vpop.permute.xlu1 %970  ;;  %1885 = vmatprep.subr.mxu0 %v1021_v3 }
 0x10b   :  { %v1186_v33 = vsel %vm1184_vm1, %v1171_v6, %v6076_v36  ;;  %v1190_v43 = vsel %vm1184_vm1, %v6067_v32, %v1171_v6  ;;  %v990_v54 = vsel %vm976_vm4, %v6354_v31, %v947_v62 }
 0x10c   :  { %v1230_v2 = vmul.f32 %v6281_v13, %v1190_v43  ;;  %v1020_v17 = vmul.f32 %v6290_v58, %v990_v54  ;;  %1284 = vrot.lane.b32.xlu0 %v5717_v5, %s5592_s20  ;;  %1292 = vrot.lane.b32.xlu1 %v5735_v10, %s5592_s20  ;;  %v1231_v36 = vmul.f32 %v6295_v44, %v1186_v33  ;;  %v6382_v10 = vld [vmem:[#allocation6] sm:$0xf] }
 0x10e   :  { %v945_v25 = vpop.permute.xlu0 %944  ;;  %v6372_v63 = vpop.permute.xlu1 %952  ;;  %1886 = vmatpush1.msra.mxu0 %v1020_v17  ;;  %2047 = vmatprep.subr.mxu1 %v1231_v36 }
 0x10f   :  { %v985_v32 = vsel %vm976_vm4, %v945_v25, %v6372_v63  ;;  %2048 = vmatpush1.msra.mxu1 %v1230_v2 }
 0x110   :  { %1508 = vrot.lane.b32.xlu0 %v5727_v7, %s5590_s0  ;;  %1276 = vrot.lane.b32.xlu1 %v5713_v4, %s5592_s20  ;;  %v1017_v5 = vmul.f32 %v6263_v53, %v985_v32  ;;  %v6397_v53 = vrot.slane %v6382_v10, %v6023_v60 }
 0x112   :  { %v1169_v28 = vpop.permute.xlu0 %1168  ;;  %v6384_v27 = vpop.permute.xlu1 %968  ;;  %1887 = vmatprep.subr.mxu0 %v1017_v5 }
 0x113   :  { %v1185_v62 = vsel %vm1184_vm1, %v1169_v28, %v6089_v42  ;;  %v1189_v26 = vsel %vm1184_vm1, %v6087_v41, %v1169_v28  ;;  %v989_v4 = vsel %vm976_vm4, %v6384_v27, %v945_v25 }
 0x114   :  { %v1226_v3 = vmul.f32 %v6281_v13, %v1189_v26  ;;  %v1016_v6 = vmul.f32 %v6290_v58, %v989_v4  ;;  %1282 = vrot.lane.b32.xlu0 %v5729_v8, %s5592_s20  ;;  %1290 = vrot.lane.b32.xlu1 %v5754_v15, %s5592_s20  ;;  %v1227_v41 = vmul.f32 %v6295_v44, %v1185_v62 }
 0x115   :  { %v6414_v13 = vrot.slane %v6085_v40, %v6259_v22  ;;  %v6422_v8 = vrot.slane %v6382_v10, %v6026_v61  ;;  %v6427_v58 = vrot.slane %v6085_v40, %v6272_v30 }
 0x116   :  { %v846_v42 = vpop.permute.xlu0 %845  ;;  %v6407_v33 = vpop.permute.xlu1 %853  ;;  %1888 = vmatpush1.msra.mxu0 %v1016_v6  ;;  %2049 = vmatprep.subr.mxu1 %v1227_v41  ;;  %v6475_v6 = vld [vmem:[#allocation11 + $0x28] sm:$0xff] }
 0x117   :  { %v885_v43 = vsel %vm873_vm6, %v846_v42, %v6407_v33  ;;  %2050 = vmatpush1.msra.mxu1 %v1226_v3 }
 0x118   :  { %1506 = vrot.lane.b32.xlu0 %v5745_v11, %s5590_s0  ;;  %1274 = vrot.lane.b32.xlu1 %v5733_v9, %s5592_s20  ;;  %v925_v15 = vmul.f32 %v6397_v53, %v885_v43  ;;  %v6490_v43 = vld [vmem:[#allocation11 + $0x40] sm:$0xff] }
 0x119   :  { %4936 = vmatmul.mubr.msk.f32.gmra.mxu1 %vm1852_vm5, %v6475_v6 }
 0x11a   :  { %v1071_v44 = vpop.permute.xlu0 %1070  ;;  %v6429_v54 = vpop.permute.xlu1 %869  ;;  %1889 = vmatprep.subr.mxu0 %v925_v15  ;;  %2030 = vmatprep.mubr.f32.mxu1 %v9564_v0 }
 0x11b   :  { %v1084_v2 = vsel %vm1080_vm2, %v1071_v44, %v6137_v18  ;;  %v1088_v9 = vsel %vm1080_vm2, %v6106_v50, %v1071_v44  ;;  %v889_v17 = vsel %vm873_vm6, %v6429_v54, %v846_v42  ;;  %v1689_v50 = vld [vmem:[#allocation11 + $0x8] sm:$0xff] }
 0x11c   :  { %v1134_v36 = vmul.f32 %v6414_v13, %v1088_v9  ;;  %v924_v40 = vmul.f32 %v6422_v8, %v889_v17  ;;  %1280 = vrot.lane.b32.xlu0 %v5747_v12, %s5592_s20  ;;  %1288 = vrot.lane.b32.xlu1 %v5776_v20, %s5592_s20  ;;  %v1135_v18 = vmul.f32 %v6427_v58, %v1084_v2 }
 0x11d   :  { %1929 = vmatprep.mubr.f32.mxu0 %v1689_v50  ;;  %4937 = vmatmul.mubr.msk.f32.gmra.mxu1 %vm1852_vm5, %v6490_v43 }
 0x11e   :  { %v844_v25 = vpop.permute.xlu0 %843  ;;  %v6447_v32 = vpop.permute.xlu1 %851  ;;  %1890 = vmatpush1.msra.mxu0 %v924_v40  ;;  %2051 = vmatprep.subr.mxu1 %v1135_v18  ;;  %v6508_v18 = vld [vmem:[#allocation9 + $0x78] sm:$0xff] }
 0x11f   :  { %v884_v5 = vsel %vm873_vm6, %v844_v25, %v6447_v32  ;;  %2052 = vmatpush1.msra.mxu1 %v1134_v36  ;;  %2036 = vmatprep.mubr.f32.mxu1 %v9564_v0 }
 0x120   :  { %1504 = vrot.lane.b32.xlu0 %v5758_v16, %s5590_s0  ;;  %1272 = vrot.lane.b32.xlu1 %v5752_v14, %s5592_s20  ;;  %v921_v12 = vmul.f32 %v6397_v53, %v884_v5 }
 0x122   :  { %v1069_v20 = vpop.permute.xlu0 %1068  ;;  %v6457_v28 = vpop.permute.xlu1 %867  ;;  %1891 = vmatprep.subr.mxu0 %v921_v12 }
 0x123   :  { %v1083_v62 = vsel %vm1080_vm2, %v1069_v20, %v6173_v38  ;;  %v1087_v26 = vsel %vm1080_vm2, %v6153_v29, %v1069_v20  ;;  %v888_v4 = vsel %vm873_vm6, %v6457_v28, %v844_v25  ;;  %v6515_v25 = vld [vmem:[#allocation11 + $0x58] sm:$0xff] }
 0x124   :  { %v1130_v14 = vmul.f32 %v6414_v13, %v1087_v26  ;;  %v920_v3 = vmul.f32 %v6422_v8, %v888_v4  ;;  %1406 = vrot.lane.b32.xlu0 %v5703_v1, %s5591_s19  ;;  %1404 = vrot.lane.b32.xlu1 %v5727_v7, %s5591_s19  ;;  %v1131_v38 = vmul.f32 %v6427_v58, %v1083_v62 }
 0x125   :  { %4938 = vmatmul.mubr.msk.f32.gmra.mxu1 %vm1852_vm5, %v6515_v25  ;;  %v6533_v26 = vrot.slane %v6245_v51, %v6259_v22 }
 0x126   :  { %v842_v29 = vpop.permute.xlu0 %841  ;;  %v6479_v41 = vpop.permute.xlu1 %849  ;;  %1892 = vmatpush1.msra.mxu0 %v920_v3  ;;  %2053 = vmatprep.subr.mxu1 %v1131_v38  ;;  %v6557_v3 = vld [vmem:[#allocation6 + $0x1c] sm:$0xf] }
 0x127   :  { %v883_v42 = vsel %vm873_vm6, %v842_v29, %v6479_v41  ;;  %2054 = vmatpush1.msra.mxu1 %v1130_v14  ;;  %2107 = vmatprep.mubr.f32.mxu1 %v1689_v50 }
 0x128   :  { %1402 = vrot.lane.b32.xlu0 %v5745_v11, %s5591_s19  ;;  %1400 = vrot.lane.b32.xlu1 %v5758_v16, %s5591_s19  ;;  %v917_v1 = vmul.f32 %v6397_v53, %v883_v42  ;;  %v6571_v42 = vld [vmem:[#allocation9 + $0x38] sm:$0xff] }
 0x12a   :  { %v1067_v15 = vpop.permute.xlu0 %1066  ;;  %v6494_v44 = vpop.permute.xlu1 %865  ;;  %1893 = vmatprep.subr.mxu0 %v917_v1  ;;  %v6575_v1 = vld [vmem:[#allocation9 + $0x18] sm:$0xff] }
 0x12b   :  { %v1082_v2 = vsel %vm1080_vm2, %v1067_v15, %v6209_v23  ;;  %v1086_v9 = vsel %vm1080_vm2, %v6189_v49, %v1067_v15  ;;  %v887_v17 = vsel %vm873_vm6, %v6494_v44, %v842_v29 }
 0x12c   :  { %v1126_v36 = vmul.f32 %v6414_v13, %v1086_v9  ;;  %v916_v40 = vmul.f32 %v6422_v8, %v887_v17  ;;  %1302 = vrot.lane.b32.xlu0 %v6508_v18, %s5592_s20  ;;  %1300 = vrot.lane.b32.xlu1 %v5727_v7, %s5592_s20  ;;  %v1127_v23 = vmul.f32 %v6427_v58, %v1082_v2 }
 0x12e   :  { %v840_v49 = vpop.permute.xlu0 %839  ;;  %v6519_v5 = vpop.permute.xlu1 %847  ;;  %1894 = vmatpush1.msra.mxu0 %v916_v40  ;;  %2055 = vmatprep.subr.mxu1 %v1127_v23 }
 0x12f   :  { %v882_v12 = vsel %vm873_vm6, %v840_v49, %v6519_v5  ;;  %2056 = vmatpush1.msra.mxu1 %v1126_v36 }
 0x130   :  { %1298 = vrot.lane.b32.xlu0 %v5745_v11, %s5592_s20  ;;  %1296 = vrot.lane.b32.xlu1 %v5758_v16, %s5592_s20  ;;  %v913_v7 = vmul.f32 %v6397_v53, %v882_v12  ;;  %v6546_v53 = vrot.slane %v6245_v51, %v6272_v30 }
 0x132   :  { %v1065_v20 = vpop.permute.xlu0 %1064  ;;  %v6529_v62 = vpop.permute.xlu1 %863  ;;  %1895 = vmatprep.subr.mxu0 %v913_v7 }
 0x133   :  { %v1081_v50 = vsel %vm1080_vm2, %v1065_v20, %v6248_v47  ;;  %v1085_v11 = vsel %vm1080_vm2, %v6225_v35, %v1065_v20  ;;  %v886_v16 = vsel %vm873_vm6, %v6529_v62, %v840_v49  ;;  %v6552_v47 = vld [vmem:[#allocation9 + $0x58] sm:$0xff] }
 0x134   :  { %v1122_v4 = vmul.f32 %v6414_v13, %v1085_v11  ;;  %v912_v14 = vmul.f32 %v6422_v8, %v886_v16  ;;  %1614 = vrot.lane.b32.xlu0 %v6508_v18, %s5587_s30  ;;  %1612 = vrot.lane.b32.xlu1 %v6552_v47, %s5587_s30  ;;  %v1123_v35 = vmul.f32 %v6427_v58, %v1081_v50 }
 0x135   :  { %v6567_v8 = vrot.slane %v6557_v3, %v6026_v61 }
 0x136   :  { %v967_v38 = vpop.permute.xlu0 %966  ;;  %v1495_v29 = vpop.permute.xlu1 %1494  ;;  %1896 = vmatpush1.msra.mxu0 %v912_v14  ;;  %2057 = vmatprep.subr.mxu1 %v1123_v35 }
 0x137   :  { %v980_v51 = vsel %vm976_vm4, %v967_v38, %v6298_v48  ;;  %v984_v13 = vsel %vm976_vm4, %v6274_v37, %v967_v38  ;;  %2058 = vmatpush1.msra.mxu1 %v1122_v4  ;;  %v1539_v48 = vrot.slane %v6557_v3, %v6023_v60 }
 0x138   :  { %v1030_v58 = vmul.f32 %v6533_v26, %v984_v13  ;;  %1610 = vrot.lane.b32.xlu0 %v6571_v42, %s5587_s30  ;;  %1608 = vrot.lane.b32.xlu1 %v6575_v1, %s5587_s30  ;;  %v1031_v37 = vmul.f32 %v6546_v53, %v980_v51 }
 0x13a   :  { %v6582_v15 = vpop.permute.xlu0 %1502  ;;  %v6584_v2 = vpop.permute.xlu1 %1486  ;;  %2059 = vmatprep.subr.mxu1 %v1031_v37 }
 0x13b   :  { %v1520_v9 = vsel %vm1512_vm7, %v1495_v29, %v6582_v15  ;;  %v1524_v17 = vsel %vm1512_vm7, %v6584_v2, %v1495_v29  ;;  %2060 = vmatpush1.msra.mxu1 %v1030_v58 }
 0x13c   :  { %v1564_v36 = vmul.f32 %v6567_v8, %v1524_v17  ;;  %v1565_v40 = vmul.f32 %v1539_v48, %v1520_v9 }
 0x13e   :  { %v965_v23 = vpop.permute.xlu0 %964  ;;  %v1493_v49 = vpop.permute.xlu1 %1492  ;;  %1897 = vmatprep.subr.mxu0 %v1565_v40 }
 0x13f   :  { %v979_v12 = vsel %vm976_vm4, %v965_v23, %v6326_v46  ;;  %v983_v7 = vsel %vm976_vm4, %v6316_v57, %v965_v23  ;;  %1898 = vmatpush2.msra.mxu0 %v1564_v36 }
 0x140   :  { %v1026_v20 = vmul.f32 %v6533_v26, %v983_v7  ;;  %v1027_v50 = vmul.f32 %v6546_v53, %v979_v12 }
 0x142   :  { %v6601_v11 = vpop.permute.xlu0 %1500  ;;  %v6603_v16 = vpop.permute.xlu1 %1484  ;;  %2061 = vmatprep.subr.mxu1 %v1027_v50 }
 0x143   :  { %v1519_v4 = vsel %vm1512_vm7, %v1493_v49, %v6601_v11  ;;  %v1523_v46 = vsel %vm1512_vm7, %v6603_v16, %v1493_v49  ;;  %2062 = vmatpush1.msra.mxu1 %v1026_v20 }
 0x144   :  { %v1560_v57 = vmul.f32 %v6567_v8, %v1523_v46  ;;  %v1561_v14 = vmul.f32 %v1539_v48, %v1519_v4 }
 0x146   :  { %v963_v35 = vpop.permute.xlu0 %962  ;;  %v1491_v38 = vpop.permute.xlu1 %1490  ;;  %1899 = vmatprep.subr.mxu0 %v1561_v14  ;;  %v6654_v14 = vld [vmem:[#allocation6 + $0x18] sm:$0xf] }
 0x147   :  { %v978_v29 = vsel %vm976_vm4, %v963_v35, %v6354_v31  ;;  %v982_v51 = vsel %vm976_vm4, %v6344_v21, %v963_v35  ;;  %1900 = vmatpush2.msra.mxu0 %v1560_v57  ;;  %v907_v57 = vrot.slane %v6382_v10, %v6272_v30 }
 0x148   :  { %v1022_v13 = vmul.f32 %v6533_v26, %v982_v51  ;;  %v1023_v58 = vmul.f32 %v6546_v53, %v978_v29 }
 0x14a   :  { %v6620_v37 = vpop.permute.xlu0 %1498  ;;  %v6622_v9 = vpop.permute.xlu1 %1482  ;;  %2063 = vmatprep.subr.mxu1 %v1023_v58 }
 0x14b   :  { %v1518_v17 = vsel %vm1512_vm7, %v1491_v38, %v6620_v37  ;;  %v1522_v31 = vsel %vm1512_vm7, %v6622_v9, %v1491_v38  ;;  %2064 = vmatpush1.msra.mxu1 %v1022_v13  ;;  %v1435_v13 = vrot.slane %v6654_v14, %v6023_v60 }
 0x14c   :  { %v1556_v21 = vmul.f32 %v6567_v8, %v1522_v31  ;;  %v1557_v36 = vmul.f32 %v1539_v48, %v1518_v17 }
 0x14e   :  { %v961_v40 = vpop.permute.xlu0 %960  ;;  %v1489_v23 = vpop.permute.xlu1 %1488  ;;  %1901 = vmatprep.subr.mxu0 %v1557_v36 }
 0x14f   :  { %v977_v49 = vsel %vm976_vm4, %v961_v40, %v6384_v27  ;;  %v981_v12 = vsel %vm976_vm4, %v6372_v63, %v961_v40  ;;  %1902 = vmatpush2.msra.mxu0 %v1556_v21 }
 0x150   :  { %v1018_v7 = vmul.f32 %v6533_v26, %v981_v12  ;;  %v1019_v20 = vmul.f32 %v6546_v53, %v977_v49  ;;  %v903_v26 = vrot.slane %v6382_v10, %v6259_v22  ;;  %v1431_v10 = vrot.slane %v6654_v14, %v6026_v61 }
 0x152   :  { %v6639_v50 = vpop.permute.xlu0 %1496  ;;  %v6641_v4 = vpop.permute.xlu1 %1480  ;;  %2065 = vmatprep.subr.mxu1 %v1019_v20 }
 0x153   :  { %v1517_v46 = vsel %vm1512_vm7, %v1489_v23, %v6639_v50  ;;  %v1521_v27 = vsel %vm1512_vm7, %v6641_v4, %v1489_v23  ;;  %2066 = vmatpush1.msra.mxu1 %v1018_v7 }
 0x154   :  { %v1552_v63 = vmul.f32 %v6567_v8, %v1521_v27  ;;  %v1553_v53 = vmul.f32 %v1539_v48, %v1517_v46 }
 0x156   :  { %v862_v35 = vpop.permute.xlu0 %861  ;;  %v1391_v38 = vpop.permute.xlu1 %1390  ;;  %1903 = vmatprep.subr.mxu0 %v1553_v53 }
 0x157   :  { %v877_v29 = vsel %vm873_vm6, %v862_v35, %v6429_v54  ;;  %v881_v8 = vsel %vm873_vm6, %v6407_v33, %v862_v35  ;;  %1904 = vmatpush2.msra.mxu0 %v1552_v63 }
 0x158   :  { %v926_v48 = vmul.f32 %v903_v26, %v881_v8  ;;  %v927_v51 = vmul.f32 %v907_v57, %v877_v29 }
 0x15a   :  { %v6667_v58 = vpop.permute.xlu0 %1398  ;;  %v6669_v17 = vpop.permute.xlu1 %1382  ;;  %2067 = vmatprep.subr.mxu1 %v927_v51 }
 0x15b   :  { %v1416_v54 = vsel %vm1408_vm8, %v1391_v38, %v6667_v58  ;;  %v1420_v33 = vsel %vm1408_vm8, %v6669_v17, %v1391_v38  ;;  %2068 = vmatpush1.msra.mxu1 %v926_v48 }
 0x15c   :  { %v1460_v31 = vmul.f32 %v1431_v10, %v1420_v33  ;;  %v1461_v21 = vmul.f32 %v1435_v13, %v1416_v54 }
 0x15e   :  { %v860_v36 = vpop.permute.xlu0 %859  ;;  %v1389_v40 = vpop.permute.xlu1 %1388  ;;  %1905 = vmatprep.subr.mxu0 %v1461_v21 }
 0x15f   :  { %v876_v23 = vsel %vm873_vm6, %v860_v36, %v6457_v28  ;;  %v880_v49 = vsel %vm873_vm6, %v6447_v32, %v860_v36  ;;  %1906 = vmatpush2.msra.mxu0 %v1460_v31 }
 0x160   :  { %v922_v12 = vmul.f32 %v903_v26, %v880_v49  ;;  %v923_v7 = vmul.f32 %v907_v57, %v876_v23 }
 0x162   :  { %v6683_v20 = vpop.permute.xlu0 %1396  ;;  %v6685_v46 = vpop.permute.xlu1 %1380  ;;  %2069 = vmatprep.subr.mxu1 %v923_v7  ;;  %v6715_v7 = vld [vmem:[#allocation6 + $0x14] sm:$0xf] }
 0x163   :  { %v1415_v27 = vsel %vm1408_vm8, %v1389_v40, %v6683_v20  ;;  %v1419_v28 = vsel %vm1408_vm8, %v6685_v46, %v1389_v40  ;;  %2070 = vmatpush1.msra.mxu1 %v922_v12 }
 0x164   :  { %v1456_v63 = vmul.f32 %v1431_v10, %v1419_v28  ;;  %v1457_v53 = vmul.f32 %v1435_v13, %v1415_v27 }
 0x166   :  { %v858_v32 = vpop.permute.xlu0 %857  ;;  %v1387_v35 = vpop.permute.xlu1 %1386  ;;  %1907 = vmatprep.subr.mxu0 %v1457_v53 }
 0x167   :  { %v875_v38 = vsel %vm873_vm6, %v858_v32, %v6494_v44  ;;  %v879_v29 = vsel %vm873_vm6, %v6479_v41, %v858_v32  ;;  %1908 = vmatpush2.msra.mxu0 %v1456_v63 }
 0x168   :  { %v918_v8 = vmul.f32 %v903_v26, %v879_v29  ;;  %v919_v48 = vmul.f32 %v907_v57, %v875_v38  ;;  %v1543_v38 = vrot.slane %v6557_v3, %v6259_v22  ;;  %v1327_v29 = vrot.slane %v6715_v7, %v6026_v61 }
 0x16a   :  { %v6699_v51 = vpop.permute.xlu0 %1394  ;;  %v6701_v54 = vpop.permute.xlu1 %1378  ;;  %2071 = vmatprep.subr.mxu1 %v919_v48 }
 0x16b   :  { %v1414_v33 = vsel %vm1408_vm8, %v1387_v35, %v6699_v51  ;;  %v1418_v44 = vsel %vm1408_vm8, %v6701_v54, %v1387_v35  ;;  %2072 = vmatpush1.msra.mxu1 %v918_v8 }
 0x16c   :  { %v1452_v31 = vmul.f32 %v1431_v10, %v1418_v44  ;;  %v1453_v21 = vmul.f32 %v1435_v13, %v1414_v33 }
 0x16e   :  { %v856_v41 = vpop.permute.xlu0 %855  ;;  %v1385_v36 = vpop.permute.xlu1 %1384  ;;  %1909 = vmatprep.subr.mxu0 %v1453_v21 }
 0x16f   :  { %v874_v40 = vsel %vm873_vm6, %v856_v41, %v6529_v62  ;;  %v878_v23 = vsel %vm873_vm6, %v6519_v5, %v856_v41  ;;  %1910 = vmatpush2.msra.mxu0 %v1452_v31 }
 0x170   :  { %v914_v49 = vmul.f32 %v903_v26, %v878_v23  ;;  %v915_v12 = vmul.f32 %v907_v57, %v874_v40  ;;  %v1331_v57 = vrot.slane %v6715_v7, %v6023_v60 }
 0x172   :  { %v6717_v27 = vpop.permute.xlu0 %1392  ;;  %v6719_v28 = vpop.permute.xlu1 %1376  ;;  %2073 = vmatprep.subr.mxu1 %v915_v12 }
 0x173   :  { %v1413_v63 = vsel %vm1408_vm8, %v1385_v36, %v6717_v27  ;;  %v1417_v62 = vsel %vm1408_vm8, %v6719_v28, %v1385_v36  ;;  %2074 = vmatpush1.msra.mxu1 %v914_v49 }
 0x174   :  { %v1448_v5 = vmul.f32 %v1431_v10, %v1417_v62  ;;  %v1449_v26 = vmul.f32 %v1435_v13, %v1413_v63  ;;  %v1547_v13 = vrot.slane %v6557_v3, %v6272_v30 }
 0x176   :  { %v1287_v53 = vpop.permute.xlu0 %1286  ;;  %v6730_v32 = vpop.permute.xlu1 %1294  ;;  %1911 = vmatprep.subr.mxu0 %v1449_v26 }
 0x177   :  { %v1312_v35 = vsel %vm1304_vm9, %v1287_v53, %v6730_v32  ;;  %1912 = vmatpush2.msra.mxu0 %v1448_v5 }
 0x178   :  { %v1357_v10 = vmul.f32 %v1331_v57, %v1312_v35 }
 0x17a   :  { %v1511_v8 = vpop.permute.xlu0 %1510  ;;  %v6741_v48 = vpop.permute.xlu1 %1278  ;;  %1913 = vmatprep.subr.mxu0 %v1357_v10 }
 0x17b   :  { %v1516_v33 = vsel %vm1512_vm7, %v6582_v15, %v1511_v8  ;;  %v1528_v44 = vsel %vm1512_vm7, %v1511_v8, %v6584_v2  ;;  %v1316_v31 = vsel %vm1304_vm9, %v6741_v48, %v1287_v53 }
 0x17c   :  { %v1566_v21 = vmul.f32 %v1543_v38, %v1516_v33  ;;  %v1356_v41 = vmul.f32 %v1327_v29, %v1316_v31  ;;  %v1567_v36 = vmul.f32 %v1547_v13, %v1528_v44 }
 0x17e   :  { %v1285_v3 = vpop.permute.xlu0 %1284  ;;  %v6752_v40 = vpop.permute.xlu1 %1292  ;;  %1914 = vmatpush2.msra.mxu0 %v1356_v41  ;;  %2075 = vmatprep.subr.mxu1 %v1567_v36 }
 0x17f   :  { %v1311_v15 = vsel %vm1304_vm9, %v1285_v3, %v6752_v40  ;;  %2076 = vmatpush2.msra.mxu1 %v1566_v21 }
 0x180   :  { %v1353_v23 = vmul.f32 %v1331_v57, %v1311_v15 }
 0x182   :  { %v1509_v49 = vpop.permute.xlu0 %1508  ;;  %v6757_v2 = vpop.permute.xlu1 %1276  ;;  %1915 = vmatprep.subr.mxu0 %v1353_v23 }
 0x183   :  { %v1515_v12 = vsel %vm1512_vm7, %v6601_v11, %v1509_v49  ;;  %v1527_v63 = vsel %vm1512_vm7, %v1509_v49, %v6603_v16  ;;  %v1315_v62 = vsel %vm1304_vm9, %v6757_v2, %v1285_v3 }
 0x184   :  { %v1562_v5 = vmul.f32 %v1543_v38, %v1515_v12  ;;  %v1352_v26 = vmul.f32 %v1327_v29, %v1315_v62  ;;  %v1563_v53 = vmul.f32 %v1547_v13, %v1527_v63 }
 0x186   :  { %v1283_v35 = vpop.permute.xlu0 %1282  ;;  %v6768_v10 = vpop.permute.xlu1 %1290  ;;  %1916 = vmatpush2.msra.mxu0 %v1352_v26  ;;  %2077 = vmatprep.subr.mxu1 %v1563_v53  ;;  %v1439_v26 = vrot.slane %v6654_v14, %v6259_v22 }
 0x187   :  { %v1310_v11 = vsel %vm1304_vm9, %v1283_v35, %v6768_v10  ;;  %2078 = vmatpush2.msra.mxu1 %v1562_v5 }
 0x188   :  { %v1349_v8 = vmul.f32 %v1331_v57, %v1310_v11  ;;  %v1443_v11 = vrot.slane %v6654_v14, %v6272_v30 }
 0x18a   :  { %v1507_v33 = vpop.permute.xlu0 %1506  ;;  %v6773_v16 = vpop.permute.xlu1 %1274  ;;  %1917 = vmatprep.subr.mxu0 %v1349_v8 }
 0x18b   :  { %v1514_v44 = vsel %vm1512_vm7, %v6620_v37, %v1507_v33  ;;  %v1526_v31 = vsel %vm1512_vm7, %v1507_v33, %v6622_v9  ;;  %v1314_v21 = vsel %vm1304_vm9, %v6773_v16, %v1283_v35 }
 0x18c   :  { %v1558_v41 = vmul.f32 %v1543_v38, %v1514_v44  ;;  %v1348_v36 = vmul.f32 %v1327_v29, %v1314_v21  ;;  %v1559_v3 = vmul.f32 %v1547_v13, %v1526_v31  ;;  %v5380_v44 = vld [vmem:[#allocation9 + $0x60] sm:$0xff] }
 0x18e   :  { %v1281_v15 = vpop.permute.xlu0 %1280  ;;  %v6784_v23 = vpop.permute.xlu1 %1288  ;;  %1918 = vmatpush2.msra.mxu0 %v1348_v36  ;;  %2079 = vmatprep.subr.mxu1 %v1559_v3  ;;  %v5382_v36 = vld [vmem:[#allocation9 + $0x40] sm:$0xff]  ;;  %v6822_v3 = vrot.slane %v6715_v7, %v6272_v30 }
 0x18f   :  { %v1309_v37 = vsel %vm1304_vm9, %v1281_v15, %v6784_v23  ;;  %2080 = vmatpush2.msra.mxu1 %v1558_v41 }
 0x190   :  { %v1345_v49 = vmul.f32 %v1331_v57, %v1309_v37 }
 0x192   :  { %v1505_v12 = vpop.permute.xlu0 %1504  ;;  %v6789_v9 = vpop.permute.xlu1 %1272  ;;  %1919 = vmatprep.subr.mxu0 %v1345_v49  ;;  %v5383_v49 = vld [vmem:[#allocation9 + $0x28] sm:$0xff] }
 0x193   :  { %v1513_v63 = vsel %vm1512_vm7, %v6639_v50, %v1505_v12  ;;  %v1525_v62 = vsel %vm1512_vm7, %v1505_v12, %v6641_v4  ;;  %v1313_v5 = vsel %vm1304_vm9, %v6789_v9, %v1281_v15 }
 0x194   :  { %v1554_v57 = vmul.f32 %v1543_v38, %v1513_v63  ;;  %v1344_v53 = vmul.f32 %v1327_v29, %v1313_v5  ;;  %v1555_v35 = vmul.f32 %v1547_v13, %v1525_v62  ;;  %v5379_v29 = vld [vmem:[#allocation9 + $0x68] sm:$0xff]  ;;  %v5384_v62 = vld [vmem:[#allocation9 + $0x20] sm:$0xff] }
 0x195   :  { %v5385_v5 = vld [vmem:[#allocation9 + $0x8] sm:$0xff] }
 0x196   :  { %v1407_v8 = vpop.permute.xlu0 %1406  ;;  %v1405_v33 = vpop.permute.xlu1 %1404  ;;  %1920 = vmatpush2.msra.mxu0 %v1344_v53  ;;  %2081 = vmatprep.subr.mxu1 %v1555_v35  ;;  %v5386_v35 = vld [vmem:[#allocation9] sm:$0xff] }
 0x197   :  { %v1412_v50 = vsel %vm1408_vm8, %v6667_v58, %v1407_v8  ;;  %v1424_v4 = vsel %vm1408_vm8, %v1407_v8, %v6669_v17  ;;  %v1411_v38 = vsel %vm1408_vm8, %v6683_v20, %v1405_v33  ;;  %1921 = vmatprep.subr.mxu0 %v5379_v29  ;;  %v1423_v14 = vsel %vm1408_vm8, %v1405_v33, %v6685_v46  ;;  %v5381_v58 = vld [vmem:[#allocation9 + $0x48] sm:$0xff]  ;;  %v6838_v8 = vld [vmem:[#allocation11 + $0x20] sm:$0xff] }
 0x198   :  { %v1462_v13 = vmul.f32 %v1439_v26, %v1412_v50  ;;  %2082 = vmatpush2.msra.mxu1 %v1554_v57  ;;  %1922 = vmatpush2.msra.mxu0 %v5380_v44  ;;  %v1463_v31 = vmul.f32 %v1443_v11, %v1424_v4  ;;  %v1458_v21 = vmul.f32 %v1439_v26, %v1411_v38 }
 0x199   :  { %1923 = vmatprep.subr.mxu0 %v5381_v58  ;;  %v6818_v20 = vrot.slane %v6715_v7, %v6259_v22  ;;  %v1459_v12 = vmul.f32 %v1443_v11, %v1423_v14  ;;  %v6859_v14 = vld [vmem:[#allocation11 + $0x38] sm:$0xff] }
 0x19a   :  { %v1403_v41 = vpop.permute.xlu0 %1402  ;;  %v1401_v17 = vpop.permute.xlu1 %1400  ;;  %1924 = vmatpush2.msra.mxu0 %v5382_v36  ;;  %2083 = vmatprep.subr.mxu1 %v1463_v31 }
 0x19b   :  { %v1410_v46 = vsel %vm1408_vm8, %v6699_v51, %v1403_v41  ;;  %v1422_v15 = vsel %vm1408_vm8, %v1403_v41, %v6701_v54  ;;  %v1409_v37 = vsel %vm1408_vm8, %v6717_v27, %v1401_v17  ;;  %1925 = vmatprep.subr.mxu0 %v5383_v49  ;;  %v1421_v7 = vsel %vm1408_vm8, %v1401_v17, %v6719_v28  ;;  %v6836_v54 = vld [vmem:[#allocation11] sm:$0xff] }
 0x19c   :  { %v1454_v63 = vmul.f32 %v1439_v26, %v1410_v46  ;;  %2084 = vmatpush2.msra.mxu1 %v1462_v13  ;;  %1926 = vmatpush2.msra.mxu0 %v5384_v62  ;;  %v1455_v51 = vmul.f32 %v1443_v11, %v1422_v15  ;;  %v1450_v57 = vmul.f32 %v1439_v26, %v1409_v37  ;;  %v1698_v37 = vld [vmem:[#allocation11 + $0x50] sm:$0xff] }
 0x19d   :  { %2085 = vmatprep.subr.mxu1 %v1459_v12  ;;  %1927 = vmatprep.subr.mxu0 %v5385_v5  ;;  %v1451_v26 = vmul.f32 %v1443_v11, %v1421_v7  ;;  %v5387_v11 = vld [vmem:[#allocation6 + $0x20] sm:$0xf] }
 0x19e   :  { %2086 = vmatpush2.msra.mxu1 %v1458_v21  ;;  %v1303_v27 = vpop.permute.xlu0 %1302  ;;  %v1301_v53 = vpop.permute.xlu1 %1300  ;;  %1928 = vmatpush2.msra.mxu0 %v5386_v35  ;;  %v1647_v13 = vrot.slane %v5387_v11, %v6259_v22 }
 0x19f   :  { %v1308_v28 = vsel %vm1304_vm9, %v6730_v32, %v1303_v27  ;;  %v1320_v33 = vsel %vm1304_vm9, %v1303_v27, %v6741_v48  ;;  %v1307_v50 = vsel %vm1304_vm9, %v6752_v40, %v1301_v53  ;;  %2087 = vmatprep.subr.mxu1 %v1455_v51  ;;  %v1319_v38 = vsel %vm1304_vm9, %v1301_v53, %v6757_v2  ;;  %v6856_v48 = vld [vmem:[#allocation11 + $0x18] sm:$0xff] }
 0x1a0   :  { %v1358_v4 = vmul.f32 %v6818_v20, %v1308_v28  ;;  %1930 = vmatmul.mubr.f32.vlgmr.msra.gmra.mxu0 %v6836_v54  ;;  %2088 = vmatpush2.msra.mxu1 %v1454_v63  ;;  %v1359_v32 = vmul.f32 %v6822_v3, %v1320_v33  ;;  %v1651_v2 = vrot.slane %v5387_v11, %v6272_v30 }
 0x1a1   :  { %2089 = vmatprep.subr.mxu1 %v1451_v26  ;;  %1935 = vmatprep.mubr.f32.mxu0 %v6838_v8  ;;  %v1354_v44 = vmul.f32 %v6818_v20, %v1307_v50  ;;  %v1355_v21 = vmul.f32 %v6822_v3, %v1319_v38 }
 0x1a2   :  { %2090 = vmatpush2.msra.mxu1 %v1450_v57  ;;  %v1299_v40 = vpop.permute.xlu0 %1298  ;;  %v1297_v29 = vpop.permute.xlu1 %1296 }
 0x1a3   :  { %v1306_v31 = vsel %vm1304_vm9, %v6768_v10, %v1299_v40  ;;  %v1318_v58 = vsel %vm1304_vm9, %v1299_v40, %v6773_v16  ;;  %2091 = vmatprep.subr.mxu1 %v1359_v32  ;;  %v1317_v17 = vsel %vm1304_vm9, %v1297_v29, %v6789_v9  ;;  %v1305_v10 = vsel %vm1304_vm9, %v6784_v23, %v1297_v29  ;;  %v1694_v16 = vld [vmem:[#allocation11 + $0x30] sm:$0xff] }
 0x1a4   :  { %v1350_v41 = vmul.f32 %v6818_v20, %v1306_v31  ;;  %2092 = vmatpush2.msra.mxu1 %v1358_v4  ;;  %1936 = vmatmul.mubr.f32.gmra.mxu0 %v6856_v48  ;;  %v1351_v36 = vmul.f32 %v6822_v3, %v1318_v58  ;;  %v1347_v12 = vmul.f32 %v6822_v3, %v1317_v17  ;;  %v1697_v3 = vld [vmem:[#allocation11 + $0x48] sm:$0xff] }
 0x1a5   :  { %2093 = vmatprep.subr.mxu1 %v1355_v21  ;;  %1941 = vmatprep.mubr.f32.mxu0 %v6859_v14  ;;  %v1346_v23 = vmul.f32 %v6818_v20, %v1305_v10 }
 0x1a6   :  { %2094 = vmatpush2.msra.mxu1 %v1354_v44  ;;  %v1615_v46 = vpop.permute.xlu0 %1614  ;;  %v1613_v15 = vpop.permute.xlu1 %1612 }
 0x1a7   :  { %v1620_v9 = vsel %vm1616_vm3, %v6120_v55, %v1615_v46  ;;  %v1632_v49 = vsel %vm1616_vm3, %v1615_v46, %v6139_v19  ;;  %2095 = vmatprep.subr.mxu1 %v1351_v36  ;;  %v1631_v62 = vsel %vm1616_vm3, %v1613_v15, %v6175_v39  ;;  %v1619_v55 = vsel %vm1616_vm3, %v6163_v34, %v1613_v15  ;;  %v5388_v39 = vld [vmem:[#allocation9 + $0x70] sm:$0xff] }
 0x1a8   :  { %v1670_v63 = vmul.f32 %v1647_v13, %v1620_v9  ;;  %2096 = vmatpush2.msra.mxu1 %v1350_v41  ;;  %1942 = vmatmul.mubr.f32.gmra.mxu0 %v1694_v16  ;;  %v1671_v7 = vmul.f32 %v1651_v2, %v1632_v49  ;;  %v1667_v57 = vmul.f32 %v1651_v2, %v1631_v62 }
 0x1a9   :  { %2097 = vmatprep.subr.mxu1 %v1347_v12  ;;  %1947 = vmatprep.mubr.f32.mxu0 %v1698_v37  ;;  %v1666_v27 = vmul.f32 %v1647_v13, %v1619_v55 }
 0x1aa   :  { %2098 = vmatpush2.msra.mxu1 %v1346_v23  ;;  %v1611_v19 = vpop.permute.xlu0 %1610  ;;  %v1609_v51 = vpop.permute.xlu1 %1608  ;;  %2156 = vmatprep.subr.mxu0 %v1671_v7 }
 0x1ab   :  { %v1618_v20 = vsel %vm1616_vm3, %v6199_v56, %v1611_v19  ;;  %v1630_v5 = vsel %vm1616_vm3, %v1611_v19, %v6211_v24  ;;  %2099 = vmatprep.subr.mxu1 %v6508_v18  ;;  %2157 = vmatpush1.msra.mxu0 %v1670_v63  ;;  %v1629_v35 = vsel %vm1616_vm3, %v1609_v51, %v6250_v52  ;;  %v5389_v24 = vld [vmem:[#allocation9 + $0x50] sm:$0xff] }
 0x1ac   :  { %2100 = vmatpush2.msra.mxu1 %v5388_v39  ;;  %v1663_v34 = vmul.f32 %v1651_v2, %v1630_v5  ;;  %v1662_v53 = vmul.f32 %v1647_v13, %v1618_v20  ;;  %1948 = vmatmul.mubr.f32.gmra.mxu0 %v1697_v3  ;;  %v1617_v56 = vsel %vm1616_vm3, %v6235_v45, %v1609_v51  ;;  %v5390_v18 = vld [vmem:[#allocation9 + $0x30] sm:$0xff] }
 0x1ad   :  { %2101 = vmatprep.subr.mxu1 %v6552_v47  ;;  %2158 = vmatprep.subr.mxu0 %v1667_v57  ;;  %v1659_v28 = vmul.f32 %v1651_v2, %v1629_v35  ;;  %v1658_v33 = vmul.f32 %v1647_v13, %v1617_v56  ;;  %v5391_v52 = vld [vmem:[#allocation9 + $0x10] sm:$0xff]  ;;  %v5593_v47 = vmov 0  }
 0x1ae   :  { %2102 = vmatpush2.msra.mxu1 %v5389_v24  ;;  %2159 = vmatpush1.msra.mxu0 %v1666_v27  ;;  %v5392_v45 = vld [vmem:[#allocation11 + $0x10] sm:$0xff] }
 0x1af   :  { %2103 = vmatprep.subr.mxu1 %v6571_v42  ;;  %2160 = vmatprep.subr.mxu0 %v1663_v34 }
 0x1b0   :  { %2104 = vmatpush2.msra.mxu1 %v5390_v18  ;;  %2161 = vmatpush1.msra.mxu0 %v1662_v53 }
 0x1b1   :  { %2105 = vmatprep.subr.mxu1 %v6575_v1  ;;  %2162 = vmatprep.subr.mxu0 %v1659_v28 }
 0x1b2   :  { %2106 = vmatpush2.msra.mxu1 %v5391_v52  ;;  %2163 = vmatpush1.msra.mxu0 %v1658_v33 }
 0x1b3   :  { %2196 = vmatprep.mubr.f32.mxu0 %v9564_v0  ;;  %2108 = vmatmul.mubr.f32.vlgmr.msra.gmra.mxu1 %v6836_v54  ;;  %v6932_v54 = vpop.f32.mrf.mxu0 }
 0x1b4   :  { %4939 = vmatmul.mubr.msk.f32.vlgmr.msra.gmra.mxu0 %vm1852_vm5, %v5392_v45  ;;  %2113 = vmatprep.mubr.f32.mxu1 %v6838_v8 }
 0x1b5   :  { %2202 = vmatprep.mubr.f32.mxu0 %v9564_v0  ;;  %4974 = vset.pattern.permute.xlu1 %v5593_v47  ;;  %v6936_v8 = vpop.f32.mrf.mxu0 }
 0x1b6   :  { %4973 = vset.pattern.permute.xlu0 %v5593_v47 }
 0x1b7   :  { %2114 = vmatmul.mubr.f32.gmra.mxu1 %v6856_v48 }
 0x1b8   :  { %4940 = vmatmul.mubr.msk.f32.gmra.mxu0 %vm1852_vm5, %v6475_v6  ;;  %2119 = vmatprep.mubr.f32.mxu1 %v6859_v14  ;;  %v6926_v6 = vpop.f32.mrf.mxu1 }
 0x1b9   :  { %2208 = vmatprep.mubr.f32.mxu0 %v9564_v0 }
 0x1ba   :  { %v6928_v42 = vpop.f32.mrf.mxu1 }
 0x1bb   :  { %2120 = vmatmul.mubr.f32.gmra.mxu1 %v1694_v16 }
 0x1bc   :  { %4941 = vmatmul.mubr.msk.f32.gmra.mxu0 %vm1852_vm5, %v6490_v43  ;;  %2125 = vmatprep.mubr.f32.mxu1 %v1698_v37  ;;  %v6930_v1 = vpop.f32.mrf.mxu1 }
 0x1bd   :  { %2214 = vmatprep.mubr.f32.mxu0 %v9564_v0 }
 0x1be   :  { %v6934_v43 = vpop.f32.mrf.mxu1 }
 0x1bf   :  { %2126 = vmatmul.mubr.f32.gmra.mxu1 %v1697_v3 }
 0x1c0   :  { %4942 = vmatmul.mubr.msk.f32.gmra.mxu0 %vm1852_vm5, %v6515_v25  ;;  %3998 = vmatprep.mubr.f32.mxu1 %v9564_v0  ;;  %v6938_v50 = vpop.f32.mrf.mxu1  ;;  %v6940_v25 = vpop.f32.mrf.mxu0 }
 0x1c2   :  { %v6942_v26 = vpop.f32.mrf.mxu1  ;;  %v6944_v4 = vpop.f32.mrf.mxu0 }
 0x1c4   :  { %v6946_v38 = vpop.f32.mrf.mxu1  ;;  %v6948_v32 = vpop.f32.mrf.mxu0 }
 0x1c6   :  { %v6950_v48 = vpop.f32.mrf.mxu1  ;;  %v6952_v40 = vpop.f32.mrf.mxu0 }
 0x1c8   :  { %v6954_v29 = vpop.f32.mrf.mxu1  ;;  %v6956_v11 = vpop.f32.mrf.mxu0 }
 0x1c9   :  { %9667 = vst [vmem:[#allocation27_spill] sm:$0xff] %v6954_v29 }
 0x1ca   :  { %v6958_v13 = vpop.f32.mrf.mxu1  ;;  %v6960_v14 = vpop.f32.mrf.mxu0 }
 0x1cb   :  { %9668 = vst [vmem:[#allocation28_spill] sm:$0xff] %v6958_v13 }
 0x1cc   :  { %v6962_v2 = vpop.f32.mrf.mxu1  ;;  %v6964_v44 = vpop.f32.mrf.mxu0 }
 0x1cd   :  { %9669 = vst [vmem:[#allocation29_spill] sm:$0xff] %v6962_v2  ;;  %9670 = vst [vmem:[#allocation30_spill] sm:$0xff] %v6964_v44 }
 0x1ce   :  { %v6966_v31 = vpop.f32.mrf.mxu1  ;;  %v6968_v58 = vpop.f32.mrf.mxu0 }
 0x1cf   :  { %9671 = vst [vmem:[#allocation31_spill] sm:$0xff] %v6966_v31  ;;  %9672 = vst [vmem:[#allocation32_spill] sm:$0xff] %v6968_v58 }
 0x1d0   :  { %v6970_v21 = vpop.f32.mrf.mxu1  ;;  %v6972_v41 = vpop.f32.mrf.mxu0 }
 0x1d1   :  { %9673 = vst [vmem:[#allocation33_spill] sm:$0xff] %v6970_v21  ;;  %9674 = vst [vmem:[#allocation34_spill] sm:$0xff] %v6972_v41 }
 0x1d2   :  { %v6974_v17 = vpop.f32.mrf.mxu1  ;;  %v6976_v36 = vpop.f32.mrf.mxu0 }
 0x1d3   :  { %9675 = vst [vmem:[#allocation35_spill] sm:$0xff] %v6974_v17  ;;  %9676 = vst [vmem:[#allocation36_spill] sm:$0xff] %v6976_v36 }
 0x1d4   :  { %v6978_v10 = vpop.f32.mrf.mxu1  ;;  %v6980_v16 = vpop.f32.mrf.mxu0 }
 0x1d5   :  { %9677 = vst [vmem:[#allocation37_spill] sm:$0xff] %v6978_v10  ;;  %9678 = vst [vmem:[#allocation38_spill] sm:$0xff] %v6980_v16 }
 0x1d6   :  { %v6982_v46 = vpop.f32.mrf.mxu1  ;;  %v6984_v15 = vpop.f32.mrf.mxu0 }
 0x1d7   :  { %9679 = vst [vmem:[#allocation39_spill] sm:$0xff] %v6982_v46  ;;  %9680 = vst [vmem:[#allocation40_spill] sm:$0xff] %v6984_v15 }
 0x1d8   :  { %v6986_v37 = vpop.f32.mrf.mxu1  ;;  %v6988_v9 = vpop.f32.mrf.mxu0 }
 0x1d9   :  { %9681 = vst [vmem:[#allocation41_spill] sm:$0xff] %v6988_v9 }
 0x1da   :  { %v2022_v49 = vpop.f32.mrf.mxu1  ;;  %v6990_v12 = vpop.f32.mrf.mxu0 }
 0x1db   :  { %9682 = vst [vmem:[#allocation42_spill] sm:$0xff] %v6990_v12 }
 0x1dc   :  { %v2026_v23 = vpop.f32.mrf.mxu1 }
 0x1de   :  { %v2028_v62 = vpop.f32.mrf.mxu1 }
 0x1e0   :  { %v2032_v51 = vpop.f32.mrf.mxu1 }
 0x1e2   :  { %v2034_v5 = vpop.f32.mrf.mxu1 }
 0x1e5   :  { %v2038_v57 = vpop.f32.mrf.mxu1 }
 0x1e7   :  { %v2040_v27 = vpop.f32.mrf.mxu1 }
 0x260   :  { %v6992_v63 = vpop.f32.mrf.mxu0 }
 0x262   :  { %v1933_v7 = vpop.f32.mrf.mxu0 }
 0x263   :  { %v7044_v21 = vadd.f32 %v2022_v49, %v1933_v7 }
 0x264   :  { %v1937_v55 = vpop.f32.mrf.mxu0 }
 0x265   :  { %v6994_v56 = vadd.f32 %v2026_v23, %v1937_v55 }
 0x266   :  { %v1939_v19 = vpop.f32.mrf.mxu0 }
 0x267   :  { %v6996_v24 = vadd.f32 %v2028_v62, %v1939_v19 }
 0x268   :  { %v1943_v3 = vpop.f32.mrf.mxu0 }
 0x269   :  { %v6998_v18 = vadd.f32 %v2032_v51, %v1943_v3  ;;  %v2226_v0 = vadd.f32 %v6996_v24, %v6994_v56 }
 0x26a   :  { %v1945_v20 = vpop.f32.mrf.mxu0 }
 0x26b   :  { %v7000_v28 = vadd.f32 %v2034_v5, %v1945_v20  ;;  %v2253_v10 = vmul.f32 %v6998_v18, %v6998_v18 }
 0x26c   :  { %v1949_v39 = vpop.f32.mrf.mxu0 }
 0x26d   :  { %v2254_v23 = vmul.f32 %v7000_v28, %v7000_v28  ;;  %v7010_v62 = vadd.f32 %v2038_v57, %v1949_v39  ;;  %v2249_v39 = vmul.f32 %v6994_v56, %v6994_v56  ;;  %v2250_v57 = vmul.f32 %v6996_v24, %v6996_v24 }
 0x26e   :  { %v1951_v34 = vpop.f32.mrf.mxu0 }
 0x26f   :  { %v7012_v51 = vadd.f32 %v2040_v27, %v1951_v34  ;;  %v2271_v34 = vadd.f32 %v2254_v23, %v2253_v10 }
 0x271   :  { %v2236_v31 = vadd.f32 %v7012_v51, %v7010_v62 }
 0x273   :  { %v2109_v53 = vpop.f32.mrf.mxu1 }
 0x274   :  { %v2198_v35 = vpop.f32.mrf.mxu0 }
 0x275   :  { %v2111_v33 = vpop.f32.mrf.mxu1 }
 0x276   :  { %v2200_v52 = vpop.f32.mrf.mxu0 }
 0x277   :  { %v2115_v45 = vpop.f32.mrf.mxu1 }
 0x278   :  { %v2204_v47 = vpop.f32.mrf.mxu0 }
 0x279   :  { %v7004_v46 = vadd.f32 %v2204_v47, %v2115_v45  ;;  %v2117_v55 = vpop.f32.mrf.mxu1  ;;  %v2231_v45 = vadd.f32 %v7000_v28, %v6998_v18 }
 0x27a   :  { %v2206_v19 = vpop.f32.mrf.mxu0 }
 0x27b   :  { %v2227_v3 = vadd.f32 %v2226_v0, %v7004_v46  ;;  %v7015_v20 = vadd.f32 %v2206_v19, %v2117_v55  ;;  %v2121_v5 = vpop.f32.mrf.mxu1  ;;  %v2257_v0 = vmul.f32 %v7010_v62, %v7010_v62  ;;  %v2258_v19 = vmul.f32 %v7012_v51, %v7012_v51 }
 0x27c   :  { %v2210_v12 = vpop.f32.mrf.mxu0  ;;  %v2251_v10 = vmul.f32 %v7004_v46, %v7004_v46 }
 0x27d   :  { %v7019_v47 = vadd.f32 %v2210_v12, %v2121_v5  ;;  %v2228_v9 = vadd.f32 %v2227_v3, %v7015_v20  ;;  %v2123_v27 = vpop.f32.mrf.mxu1  ;;  %v2276_v15 = vadd.f32 %v2258_v19, %v2257_v0  ;;  %v2252_v49 = vmul.f32 %v7015_v20, %v7015_v20 }
 0x27e   :  { %v2212_v55 = vpop.f32.mrf.mxu0 }
 0x27f   :  { %v2232_v12 = vadd.f32 %v2231_v45, %v7019_v47  ;;  %v2255_v3 = vmul.f32 %v7019_v47, %v7019_v47  ;;  %v7033_v5 = vadd.f32 %v2212_v55, %v2123_v27  ;;  %2229 = vadd.xlane.f32.xlu0 %v2228_v9  ;;  %v2127_v23 = vpop.f32.mrf.mxu1  ;;  %v2266_v27 = vadd.f32 %v2250_v57, %v2249_v39 }
 0x280   :  { %v2216_v2 = vpop.f32.mrf.mxu0 }
 0x281   :  { %v2256_v36 = vmul.f32 %v7033_v5, %v7033_v5  ;;  %v7041_v41 = vadd.f32 %v2216_v2, %v2127_v23  ;;  %v2233_v45 = vadd.f32 %v2232_v12, %v7033_v5  ;;  %v2272_v17 = vadd.f32 %v2271_v34, %v2255_v3  ;;  %v2129_v9 = vpop.f32.mrf.mxu1  ;;  %v2391_v23 = vld [vmem:[%s9555_s12 + $0x10] sm:$0xff] }
 0x282   :  { %v2218_v55 = vpop.f32.mrf.mxu0  ;;  %v7053_v2 = vadd.f32 %v6986_v37, %v6992_v63  ;;  %v7055_v12 = vadd.f32 %v2198_v35, %v2109_v53  ;;  %v2267_v7 = vadd.f32 %v2266_v27, %v2251_v10  ;;  %v2246_v37 = vmul.f32 %v7044_v21, %v7044_v21  ;;  %v2392_v27 = vld [vmem:[%s9555_s12 + $0x18] sm:$0xff] }
 0x283   :  { %v2237_v16 = vadd.f32 %v2236_v31, %v7041_v41  ;;  %v2259_v13 = vmul.f32 %v7041_v41, %v7041_v41  ;;  %v7049_v29 = vadd.f32 %v2218_v55, %v2129_v9  ;;  %2234 = vadd.xlane.f32.xlu1 %v2233_v45  ;;  %v2273_v31 = vadd.f32 %v2272_v17, %v2256_v36  ;;  %v2431_v45 = vld [vmem:[%s9556_s13 + $0x10] sm:$0xff]  ;;  %v2430_v9 = vld [vmem:[%s9556_s13 + $0x8] sm:$0xff]  ;;  %v2389_v55 = vld [vmem:[%s9555_s12] sm:$0xff] }
 0x284   :  { %v2221_v0 = vadd.f32 %v7044_v21, %v7053_v2  ;;  %v2245_v63 = vmul.f32 %v7053_v2, %v7053_v2  ;;  %v2247_v35 = vmul.f32 %v7055_v12, %v7055_v12  ;;  %v7071_v17 = vadd.f32 %v2200_v52, %v2111_v33  ;;  %v2432_v33 = vld [vmem:[%s9556_s13 + $0x18] sm:$0xff]  ;;  %v2390_v52 = vld [vmem:[%s9555_s12 + $0x8] sm:$0xff] }
 0x285   :  { %v2260_v39 = vmul.f32 %v7049_v29, %v7049_v29  ;;  %v2238_v57 = vadd.f32 %v2237_v16, %v7049_v29  ;;  %v2277_v34 = vadd.f32 %v2276_v15, %v2259_v13  ;;  %v2268_v36 = vadd.f32 %v2267_v7, %v2252_v49  ;;  %v2429_v49 = vld [vmem:[%s9556_s13] sm:$0xff]  ;;  %v351_v7 = vld [vmem:[%s9554_s11 + $0x18] sm:$0xff] }
 0x286   :  { %v2222_v53 = vadd.f32 %v2221_v0, %v7055_v12  ;;  %v2261_v16 = vadd.f32 %v2246_v37, %v2245_v63  ;;  %v2248_v15 = vmul.f32 %v7071_v17, %v7071_v17 }
 0x287   :  { %2274 = vadd.xlane.f32.xlu1 %v2273_v31  ;;  %2239 = vadd.xlane.f32.xlu0 %v2238_v57  ;;  %v2278_v13 = vadd.f32 %v2277_v34, %v2260_v39  ;;  %v350_v39 = vld [vmem:[%s9554_s11 + $0x10] sm:$0xff]  ;;  %v349_v31 = vld [vmem:[%s9554_s11 + $0x8] sm:$0xff]  ;;  %v348_v57 = vld [vmem:[%s9554_s11] sm:$0xff] }
 0x288   :  { %v2223_v19 = vadd.f32 %v2222_v53, %v7071_v17  ;;  %v2262_v3 = vadd.f32 %v2261_v16, %v2247_v35 }
 0x28a   :  { %v2263_v10 = vadd.f32 %v2262_v3, %v2248_v15 }
 0x28b   :  { %2269 = vadd.xlane.f32.xlu1 %v2268_v36  ;;  %2279 = vadd.xlane.f32.xlu0 %v2278_v13 }
 0x28f   :  { %2224 = vadd.xlane.f32.xlu0 %v2223_v19 }
 0x293   :  { %2264 = vadd.xlane.f32.xlu0 %v2263_v10 }
 0x29c   :  { %2405 = vperm.xlu1 %4974, %v2391_v23  }
 0x2a0   :  { %2450 = vperm.xlu1 %4974, %v2432_v33  }
 0x2a4   :  { %2400 = vperm.xlu1 %4974, %v2390_v52  }
 0x2a8   :  { %2445 = vperm.xlu1 %4974, %v2431_v45  }
 0x2a9   :  { %2410 = vperm.xlu0 %4973, %v2392_v27  }
 0x2ac   :  { %2440 = vperm.xlu1 %4974, %v2430_v9  }
 0x2ad   :  { %2395 = vperm.xlu0 %4973, %v2389_v55  }
 0x2b0   :  { %2435 = vperm.xlu1 %4974, %v2429_v49  }
 0x2b1   :  { %373 = vperm.xlu0 %4973, %v351_v7  }
 0x2b4   :  { %368 = vperm.xlu1 %4974, %v350_v39  }
 0x2b5   :  { %363 = vperm.xlu0 %4973, %v349_v31  }
 0x2b8   :  { %358 = vperm.xlu1 %4974, %v348_v57  }
 0x308   :  { %v2230_v34 = vpop.xlane.xlu0 %2229 }
 0x309   :  { %v2242_v35 = vmul.f32 0.001953125, %v2230_v34 }
 0x30b   :  { %v2286_v3 = vmul.f32 %v2242_v35, %v2242_v35 }
 0x30c   :  { %v2235_v0 = vpop.xlane.xlu1 %2234 }
 0x30d   :  { %v2243_v37 = vmul.f32 0.001953125, %v2235_v0 }
 0x30f   :  { %v2287_v36 = vmul.f32 %v2243_v37, %v2243_v37 }
 0x310   :  { %v2275_v63 = vpop.xlane.xlu1 %2274  ;;  %v2240_v53 = vpop.xlane.xlu0 %2239 }
 0x311   :  { %v2283_v13 = vmul.f32 0.001953125, %v2275_v63  ;;  %v2244_v7 = vmul.f32 0.001953125, %v2240_v53  ;;  %v1846_v53 = vld [vmem:[%s9549_s6 + $0x10] sm:$0xff] }
 0x313   :  { %v2291_v16 = vsub.f32 %v2283_v13, %v2287_v36  ;;  %v2288_v0 = vmul.f32 %v2244_v7, %v2244_v7 }
 0x314   :  { %v2270_v15 = vpop.xlane.xlu1 %2269  ;;  %v2280_v19 = vpop.xlane.xlu0 %2279 }
 0x315   :  { %v2282_v10 = vmul.f32 0.001953125, %v2270_v15  ;;  %v2295_v23 = vmax.f32 %v2291_v16, 0.0  ;;  %v2284_v57 = vmul.f32 0.001953125, %v2280_v19  ;;  %v1845_v16 = vld [vmem:[%s9549_s6 + $0x8] sm:$0xff] }
 0x317   :  { %v2290_v33 = vsub.f32 %v2282_v10, %v2286_v3  ;;  %v2299_v9 = vadd.f32 0.001, %v2295_v23  ;;  %v2292_v63 = vsub.f32 %v2284_v57, %v2288_v0  ;;  %v1847_v57 = vld [vmem:[%s9549_s6 + $0x18] sm:$0xff] }
 0x318   :  { %v2225_v52 = vpop.xlane.xlu0 %2224 }
 0x319   :  { %v2294_v45 = vmax.f32 %v2290_v33, 0.0  ;;  %v2241_v27 = vmul.f32 0.001953125, %v2225_v52  ;;  %v2296_v13 = vmax.f32 %v2292_v63, 0.0 }
 0x31b   :  { %v2298_v55 = vadd.f32 0.001, %v2294_v45  ;;  %v2285_v31 = vmul.f32 %v2241_v27, %v2241_v27  ;;  %v2300_v10 = vadd.f32 0.001, %v2296_v13  ;;  %v1849_v45 = vld [vmem:[%s9550_s7 + $0x8] sm:$0xff]  ;;  %v1850_v13 = vld [vmem:[%s9550_s7 + $0x10] sm:$0xff] }
 0x31c   :  { %v2265_v49 = vpop.xlane.xlu0 %2264 }
 0x31d   :  { %4975 = vrsqrt.f32 %v2298_v55  ;;  %v2281_v39 = vmul.f32 0.001953125, %v2265_v49  ;;  %v1844_v55 = vld [vmem:[%s9549_s6] sm:$0xff] }
 0x31e   :  { %4977 = vrsqrt.f32 %v2299_v9 }
 0x31f   :  { %v2289_v34 = vsub.f32 %v2281_v39, %v2285_v31 }
 0x321   :  { %v2293_v36 = vmax.f32 %v2289_v34, 0.0 }
 0x323   :  { %v2297_v15 = vadd.f32 0.001, %v2293_v36 }
 0x325   :  { %4979 = vrsqrt.f32 %v2297_v15 }
 0x326   :  { %4981 = vrsqrt.f32 %v2300_v10 }
 0x32a   :  { %v4976_v3 = vpop.eup %4975 }
 0x32b   :  { %v2306_v23 = vmul.f32 %v4976_v3, %v1845_v16  ;;  %v4978_v33 = vpop.eup %4977  ;;  %v1851_v3 = vld [vmem:[%s9550_s7 + $0x18] sm:$0xff] }
 0x32c   :  { %v2307_v19 = vmul.f32 %v4978_v33, %v1846_v53  ;;  %v7144_v53 = vpop.permute.xlu0 %2410 }
 0x32d   :  { %2324 = vperm.xlu1 %4974, %v2306_v23   ;;  %v2310_v52 = vmul.f32 %v2306_v23, %v2242_v35  ;;  %v1848_v35 = vld [vmem:[%s9550_s7] sm:$0xff]  ;;  %v7136_v23 = vpop.permute.xlu1 %2405 }
 0x32e   :  { %v2311_v63 = vmul.f32 %v2307_v19, %v2243_v37 }
 0x32f   :  { %v2314_v49 = vsub.f32 %v1849_v45, %v2310_v52 }
 0x330   :  { %v2315_v15 = vsub.f32 %v1850_v13, %v2311_v63 }
 0x331   :  { %2329 = vperm.xlu1 %4974, %v2307_v19  }
 0x332   :  { %v4980_v9 = vpop.eup %4979 }
 0x333   :  { %v4982_v39 = vpop.eup %4981  ;;  %v2305_v31 = vmul.f32 %v4980_v9, %v1844_v55 }
 0x334   :  { %v2308_v0 = vmul.f32 %v4982_v39, %v1847_v57 }
 0x335   :  { %2360 = vperm.xlu1 %4974, %v2314_v49   ;;  %2319 = vperm.xlu0 %4973, %v2305_v31   ;;  %v2309_v34 = vmul.f32 %v2305_v31, %v2241_v27  ;;  %v7138_v27 = vpop.permute.xlu1 %2450 }
 0x336   :  { %v2312_v16 = vmul.f32 %v2308_v0, %v2244_v7  ;;  %v7148_v7 = vpop.permute.xlu0 %2395 }
 0x337   :  { %v2313_v36 = vsub.f32 %v1848_v35, %v2309_v34 }
 0x338   :  { %v2316_v10 = vsub.f32 %v1851_v3, %v2312_v16 }
 0x339   :  { %2334 = vperm.xlu1 %4974, %v2308_v0   ;;  %2355 = vperm.xlu0 %4973, %v2313_v36   ;;  %v7140_v37 = vpop.permute.xlu1 %2400 }
 0x33a   :  { %v374_v45 = vpop.permute.xlu0 %373 }
 0x33b   :  { %v506_v3 = vadd.f32 %v6956_v11, %v374_v45 }
 0x33d   :  { %2365 = vperm.xlu1 %4974, %v2315_v15   ;;  %v7142_v33 = vpop.permute.xlu1 %2445 }
 0x33e   :  { %v364_v39 = vpop.permute.xlu0 %363 }
 0x33f   :  { %v494_v34 = vadd.f32 %v6940_v25, %v364_v39  ;;  %v496_v0 = vadd.f32 %v6944_v4, %v364_v39  ;;  %v607_v36 = vadd.f32 %v6930_v1, %v364_v39  ;;  %v621_v25 = vadd.f32 %v6950_v48, %v374_v45 }
 0x340   :  { %v609_v11 = vadd.f32 %v6934_v43, %v364_v39 }
 0x341   :  { %2370 = vperm.xlu1 %4974, %v2316_v10   ;;  %v7146_v19 = vpop.permute.xlu1 %2440  ;;  %v651_v16 = vsub.f32 0.0, %v494_v34  ;;  %v653_v58 = vsub.f32 0.0, %v607_v36 }
 0x343   :  { %v687_v4 = vmul.f32 1.442695, %v651_v16 }
 0x345   :  { %v7150_v52 = vpop.permute.xlu1 %2435 }
 0x349   :  { %v369_v9 = vpop.permute.xlu1 %368 }
 0x34a   :  { %v500_v55 = vadd.f32 %v6948_v32, %v369_v9  ;;  %v502_v49 = vadd.f32 %v6952_v40, %v369_v9  ;;  %v613_v31 = vadd.f32 %v6938_v50, %v369_v9  ;;  %v652_v32 = vsub.f32 0.0, %v496_v0 }
 0x34b   :  { %v508_v40 = vadd.f32 %v6960_v14, %v374_v45  ;;  %v619_v50 = vadd.f32 %v6946_v38, %v374_v45  ;;  %v615_v1 = vadd.f32 %v6942_v26, %v369_v9  ;;  %v662_v0 = vsub.f32 0.0, %v621_v25 }
 0x34c   :  { %v655_v57 = vsub.f32 0.0, %v500_v55  ;;  %v656_v35 = vsub.f32 0.0, %v502_v49  ;;  %v657_v63 = vsub.f32 0.0, %v613_v31  ;;  %v659_v49 = vsub.f32 0.0, %v506_v3 }
 0x34d   :  { %v359_v55 = vpop.permute.xlu1 %358  ;;  %v689_v31 = vmul.f32 1.442695, %v652_v32  ;;  %v661_v14 = vsub.f32 0.0, %v619_v50  ;;  %v658_v45 = vsub.f32 0.0, %v615_v1  ;;  %v654_v26 = vsub.f32 0.0, %v609_v11  ;;  %v7192_v11 = vld [vmem:[%s9545_s2 + $0x38] sm:$0xff] }
 0x34e   :  { %v695_v13 = vmul.f32 1.442695, %v655_v57  ;;  %v697_v15 = vmul.f32 1.442695, %v656_v35  ;;  %v699_v10 = vmul.f32 1.442695, %v657_v63  ;;  %v488_v34 = vadd.f32 %v6932_v54, %v359_v55 }
 0x34f   :  { %v660_v57 = vsub.f32 0.0, %v508_v40  ;;  %v691_v35 = vmul.f32 1.442695, %v653_v58  ;;  %v490_v38 = vadd.f32 %v6936_v8, %v359_v55  ;;  %v703_v48 = vmul.f32 1.442695, %v659_v49 }
 0x350   :  { %4983 = vpow2.f32 %v695_v13  ;;  %v601_v63 = vadd.f32 %v6926_v6, %v359_v55  ;;  %v603_v9 = vadd.f32 %v6928_v42, %v359_v55  ;;  %v707_v13 = vmul.f32 1.442695, %v661_v14  ;;  %v7171_v42 = vld [vmem:[%s9545_s2 + $0x20] sm:$0xff] }
 0x351   :  { %4985 = vpow2.f32 %v697_v15  ;;  %v705_v36 = vmul.f32 1.442695, %v660_v57  ;;  %v647_v43 = vsub.f32 0.0, %v488_v34  ;;  %v709_v58 = vmul.f32 1.442695, %v662_v0  ;;  %v7199_v34 = vld [vmem:[%s9545_s2 + $0x40] sm:$0xff] }
 0x352   :  { %4987 = vpow2.f32 %v699_v10  ;;  %v648_v39 = vsub.f32 0.0, %v490_v38  ;;  %v701_v54 = vmul.f32 1.442695, %v658_v45  ;;  %v649_v15 = vsub.f32 0.0, %v601_v63  ;;  %9683 = vst [vmem:[#allocation43_spill] sm:$0xff] %v7199_v34  ;;  %v7208_v63 = vld [vmem:[%s9545_s2 + $0x48] sm:$0xff] }
 0x353   :  { %4989 = vpow2.f32 %v687_v4  ;;  %v693_v16 = vmul.f32 1.442695, %v654_v26  ;;  %v650_v8 = vsub.f32 0.0, %v603_v9  ;;  %v679_v32 = vmul.f32 1.442695, %v647_v43  ;;  %v7178_v4 = vld [vmem:[%s9545_s2 + $0x28] sm:$0xff] }
 0x354   :  { %4991 = vpow2.f32 %v689_v31  ;;  %v681_v6 = vmul.f32 1.442695, %v648_v39  ;;  %v683_v50 = vmul.f32 1.442695, %v649_v15  ;;  %v2417_v25 = vmul.f32 %v7171_v42, %v7140_v37  ;;  %v7185_v31 = vld [vmem:[%s9545_s2 + $0x30] sm:$0xff]  ;;  %9684 = vst [vmem:[#allocation44_spill] sm:$0xff] %v7208_v63 }
 0x355   :  { %4993 = vpow2.f32 %v691_v35  ;;  %v2418_v55 = vmul.f32 %v7178_v4, %v7140_v37  ;;  %v685_v49 = vmul.f32 1.442695, %v650_v8  ;;  %v2419_v57 = vmul.f32 %v7185_v31, %v7140_v37  ;;  %v5400_v9 = vld [vmem:[%s9545_s2 + $0x58] sm:$0xff] }
 0x356   :  { %4995 = vpow2.f32 %v703_v48  ;;  %v2420_v35 = vmul.f32 %v7192_v11, %v7140_v37  ;;  %v2421_v0 = vmul.f32 %v7199_v34, %v7136_v23  ;;  %v2422_v37 = vmul.f32 %v7208_v63, %v7136_v23 }
 0x357   :  { %4997 = vpow2.f32 %v705_v36  ;;  %v5399_v36 = vld [vmem:[%s9545_s2 + $0x50] sm:$0xff]  ;;  %v2458_v39 = vadd.f32 %v7146_v19, %v2418_v55 }
 0x358   :  { %4999 = vpow2.f32 %v707_v13  ;;  %v7216_v26 = vmul.f32 %v5399_v36, %v7136_v23  ;;  %v7222_v13 = vmul.f32 %v5400_v9, %v7136_v23  ;;  %v2460_v8 = vadd.f32 %v7146_v19, %v2420_v35  ;;  %v7258_v35 = vld [vmem:[%s9545_s2 + $0x18] sm:$0xff] }
 0x359   :  { %5001 = vpow2.f32 %v709_v58  ;;  %v2457_v58 = vadd.f32 %v7146_v19, %v2417_v25  ;;  %v7267_v30 = vadd.f32 %v7142_v33, %v2421_v0  ;;  %v7270_v60 = vadd.f32 %v7142_v33, %v2422_v37 }
 0x35a   :  { %5003 = vpow2.f32 %v701_v54 }
 0x35b   :  { %5005 = vpow2.f32 %v693_v16  ;;  %v2459_v16 = vadd.f32 %v7146_v19, %v2419_v57  ;;  %v7245_v19 = vld [vmem:[%s9545_s2 + $0x10] sm:$0xff] }
 0x35c   :  { %5007 = vpow2.f32 %v679_v32  ;;  %v7231_v32 = vld [vmem:[%s9545_s2] sm:$0xff] }
 0x35d   :  { %v4984_v40 = vpop.eup %4983  ;;  %5009 = vpow2.f32 %v681_v6  ;;  %v2413_v23 = vmul.f32 %v7231_v32, %v7148_v7 }
 0x35e   :  { %v4986_v10 = vpop.eup %4985  ;;  %v751_v14 = vadd.f32 1.0, %v4984_v40  ;;  %5011 = vpow2.f32 %v683_v50  ;;  %v7238_v40 = vld [vmem:[%s9545_s2 + $0x8] sm:$0xff] }
 0x35f   :  { %v4988_v1 = vpop.eup %4987  ;;  %v752_v38 = vadd.f32 1.0, %v4986_v10  ;;  %5013 = vpow2.f32 %v685_v49  ;;  %v2414_v6 = vmul.f32 %v7238_v40, %v7148_v7  ;;  %v2415_v10 = vmul.f32 %v7245_v19, %v7148_v7 }
 0x360   :  { %v4990_v45 = vpop.eup %4989  ;;  %v753_v54 = vadd.f32 1.0, %v4988_v1  ;;  %5015 = vrcp.f32 %v751_v14  ;;  %v2416_v14 = vmul.f32 %v7258_v35, %v7148_v7  ;;  %v2453_v7 = vadd.f32 %v7150_v52, %v2413_v23 }
 0x361   :  { %v4992_v43 = vpop.eup %4991  ;;  %5017 = vrcp.f32 %v752_v38  ;;  %v747_v50 = vadd.f32 1.0, %v4990_v45  ;;  %v2454_v0 = vadd.f32 %v7150_v52, %v2414_v6  ;;  %v2455_v37 = vadd.f32 %v7150_v52, %v2415_v10 }
 0x362   :  { %v4994_v15 = vpop.eup %4993  ;;  %5019 = vrcp.f32 %v753_v54  ;;  %v748_v38 = vadd.f32 1.0, %v4992_v43 }
 0x363   :  { %v7253_v57 = vpop.eup %4995  ;;  %v749_v45 = vadd.f32 1.0, %v4994_v15  ;;  %5021 = vrcp.f32 %v747_v50 }
 0x364   :  { %v7262_v36 = vpop.eup %4997  ;;  %5023 = vrcp.f32 %v748_v38 }
 0x365   :  { %v7264_v44 = vpop.eup %4999  ;;  %5025 = vrcp.f32 %v749_v45 }
 0x366   :  { %9685 = vst [vmem:[#allocation45_spill] sm:$0xff] %v7264_v44  ;;  %v7273_v43 = vpop.eup %5001 }
 0x367   :  { %9686 = vst [vmem:[#allocation46_spill] sm:$0xff] %v7273_v43 }
 0x3a8   :  { %v2325_v3 = vpop.permute.xlu1 %2324 }
 0x3a9   :  { %v2341_v25 = vmul.f32 %v2325_v3, %v6994_v56  ;;  %v2342_v55 = vmul.f32 %v2325_v3, %v6996_v24  ;;  %v2343_v49 = vmul.f32 %v2325_v3, %v7004_v46  ;;  %v2344_v1 = vmul.f32 %v2325_v3, %v7015_v20 }
 0x3ac   :  { %v7203_v48 = vpop.permute.xlu1 %2329 }
 0x3b0   :  { %v2361_v56 = vpop.permute.xlu1 %2360  ;;  %v2320_v3 = vpop.permute.xlu0 %2319 }
 0x3b1   :  { %v2377_v24 = vadd.f32 %v2361_v56, %v2341_v25  ;;  %v2378_v46 = vadd.f32 %v2361_v56, %v2342_v55  ;;  %v2379_v9 = vadd.f32 %v2361_v56, %v2343_v49  ;;  %v2380_v20 = vadd.f32 %v2361_v56, %v2344_v1  ;;  %v7283_v49 = vpop.eup %5003 }
 0x3b2   :  { %v2456_v1 = vadd.f32 %v7150_v52, %v2416_v14  ;;  %v5006_v50 = vpop.eup %5005  ;;  %v2338_v45 = vmul.f32 %v2320_v3, %v7044_v21 }
 0x3b3   :  { %v7275_v54 = vmul.f32 %v2457_v58, %v2377_v24  ;;  %v7277_v15 = vmul.f32 %v2458_v39, %v2378_v46  ;;  %v7279_v25 = vmul.f32 %v2459_v16, %v2379_v9  ;;  %v7281_v55 = vmul.f32 %v2460_v8, %v2380_v20  ;;  %v5008_v56 = vpop.eup %5007 }
 0x3b4   :  { %v7288_v23 = vpop.permute.xlu1 %2334  ;;  %v2345_v58 = vmul.f32 %v7203_v48, %v6998_v18  ;;  %v2346_v39 = vmul.f32 %v7203_v48, %v7000_v28  ;;  %v2337_v16 = vmul.f32 %v2320_v3, %v7053_v2  ;;  %v2356_v8 = vpop.permute.xlu0 %2355  ;;  %v2347_v18 = vmul.f32 %v7203_v48, %v7019_v47 }
 0x3b5   :  { %v2505_v6 = vmin.f32 %v7275_v54, 20.0  ;;  %v2506_v10 = vmin.f32 %v7277_v15, 20.0  ;;  %v2507_v52 = vmin.f32 %v7279_v25, 20.0  ;;  %v2508_v14 = vmin.f32 %v7281_v55, 20.0  ;;  %v7299_v38 = vpop.eup %5009 }
 0x3b6   :  { %v2339_v28 = vmul.f32 %v2320_v3, %v7055_v12  ;;  %v2340_v2 = vmul.f32 %v2320_v3, %v7071_v17  ;;  %v7306_v24 = vpop.eup %5011  ;;  %v2373_v22 = vadd.f32 %v2356_v8, %v2337_v16  ;;  %v2374_v44 = vadd.f32 %v2356_v8, %v2338_v45 }
 0x3b7   :  { %v2525_v46 = vmul.f32 1.442695, %v2505_v6  ;;  %v2527_v9 = vmul.f32 1.442695, %v2506_v10  ;;  %v2529_v20 = vmul.f32 1.442695, %v2507_v52  ;;  %v7308_v59 = vpop.eup %5013  ;;  %v2463_v52 = vadd.f32 %v7142_v33, %v7216_v26 }
 0x3b8   :  { %v2366_v61 = vpop.permute.xlu1 %2365  ;;  %v2531_v43 = vmul.f32 1.442695, %v2508_v14  ;;  %v2375_v63 = vadd.f32 %v2356_v8, %v2339_v28  ;;  %v2376_v34 = vadd.f32 %v2356_v8, %v2340_v2  ;;  %v7310_v47 = vpop.eup %5015  ;;  %v7312_v21 = vmul.f32 %v2453_v7, %v2373_v22 }
 0x3b9   :  { %5027 = vpow2.f32 %v2525_v46  ;;  %v2381_v12 = vadd.f32 %v2366_v61, %v2345_v58  ;;  %v2382_v17 = vadd.f32 %v2366_v61, %v2346_v39  ;;  %v7314_v3 = vpop.eup %5017  ;;  %v7316_v6 = vmul.f32 %v2454_v0, %v2374_v44  ;;  %v7358_v46 = vld [vmem:[%s9545_s2 + $0x60] sm:$0xff] }
 0x3ba   :  { %5029 = vpow2.f32 %v2527_v9  ;;  %v7318_v16 = vmul.f32 %v2455_v37, %v2375_v63  ;;  %v7320_v10 = vmul.f32 %v2456_v1, %v2376_v34  ;;  %v2501_v8 = vmin.f32 %v7312_v21, 20.0  ;;  %v7325_v22 = vpop.eup %5019 }
 0x3bb   :  { %5031 = vpow2.f32 %v2529_v20  ;;  %v2383_v14 = vadd.f32 %v2366_v61, %v2347_v18  ;;  %v2464_v7 = vadd.f32 %v7142_v33, %v7222_v13  ;;  %v750_v58 = vadd.f32 1.0, %v5006_v50  ;;  %v7334_v37 = vpop.eup %5021 }
 0x3bc   :  { %v2348_v44 = vmul.f32 %v7203_v48, %v7033_v5  ;;  %5033 = vpow2.f32 %v2531_v43  ;;  %v2502_v34 = vmin.f32 %v7316_v6, 20.0  ;;  %v2503_v63 = vmin.f32 %v7318_v16, 20.0  ;;  %v7344_v50 = vpop.eup %5023  ;;  %v7353_v2 = vpop.permute.xlu1 %2370 }
 0x3bd   :  { %v2504_v26 = vmin.f32 %v7320_v10, 20.0  ;;  %v2517_v0 = vmul.f32 1.442695, %v2501_v8  ;;  %v7337_v39 = vmul.f32 %v7267_v30, %v2381_v12  ;;  %v7340_v33 = vmul.f32 %v7270_v60, %v2382_v17  ;;  %v7348_v28 = vpop.eup %5025 }
 0x3be   :  { %v2384_v1 = vadd.f32 %v2366_v61, %v2348_v44  ;;  %v7342_v13 = vmul.f32 %v2463_v52, %v2383_v14  ;;  %v2519_v5 = vmul.f32 1.442695, %v2502_v34  ;;  %v2521_v48 = vmul.f32 1.442695, %v2503_v63 }
 0x3bf   :  { %5035 = vpow2.f32 %v2517_v0  ;;  %v2523_v43 = vmul.f32 1.442695, %v2504_v26  ;;  %v743_v18 = vadd.f32 1.0, %v5008_v56  ;;  %v2509_v61 = vmin.f32 %v7337_v39, 20.0 }
 0x3c0   :  { %5037 = vrcp.f32 %v750_v58  ;;  %v7346_v45 = vmul.f32 %v2464_v7, %v2384_v1  ;;  %v2510_v60 = vmin.f32 %v7340_v33, 20.0  ;;  %v2511_v30 = vmin.f32 %v7342_v13, 20.0 }
 0x3c1   :  { %5039 = vpow2.f32 %v2519_v5  ;;  %v2425_v56 = vmul.f32 %v7358_v46, %v7144_v53  ;;  %v2349_v9 = vmul.f32 %v7288_v23, %v7010_v62  ;;  %v2533_v12 = vmul.f32 1.442695, %v2509_v61  ;;  %v7370_v62 = vld [vmem:[%s9545_s2 + $0x68] sm:$0xff] }
 0x3c2   :  { %5041 = vpow2.f32 %v2521_v48  ;;  %v2512_v20 = vmin.f32 %v7346_v45, 20.0  ;;  %v2535_v17 = vmul.f32 1.442695, %v2510_v60  ;;  %v2537_v52 = vmul.f32 1.442695, %v2511_v30 }
 0x3c3   :  { %5043 = vpow2.f32 %v2523_v43  ;;  %v2385_v14 = vadd.f32 %v7353_v2, %v2349_v9  ;;  %v2465_v58 = vadd.f32 %v7138_v27, %v2425_v56  ;;  %v2426_v34 = vmul.f32 %v7370_v62, %v7144_v53 }
 0x3c4   :  { %5045 = vrcp.f32 %v743_v18  ;;  %v2539_v8 = vmul.f32 1.442695, %v2512_v20  ;;  %v2350_v1 = vmul.f32 %v7288_v23, %v7012_v51  ;;  %v744_v43 = vadd.f32 1.0, %v7299_v38  ;;  %v7389_v38 = vld [vmem:[%s9545_s2 + $0x70] sm:$0xff] }
 0x3c5   :  { %5047 = vpow2.f32 %v2533_v12  ;;  %v7376_v5 = vmul.f32 %v2465_v58, %v2385_v14  ;;  %v745_v61 = vadd.f32 1.0, %v7306_v24  ;;  %v2466_v9 = vadd.f32 %v7138_v27, %v2426_v34  ;;  %9687 = vst [vmem:[#allocation47_spill] sm:$0xff] %v7389_v38 }
 0x3c6   :  { %v5028_v7 = vpop.eup %5027  ;;  %5049 = vpow2.f32 %v2535_v17  ;;  %v2386_v30 = vadd.f32 %v7353_v2, %v2350_v1  ;;  %v746_v51 = vadd.f32 1.0, %v7308_v59  ;;  %v2427_v24 = vmul.f32 %v7389_v38, %v7144_v53  ;;  %v7398_v59 = vld [vmem:[%s9545_s2 + $0x78] sm:$0xff] }
 0x3c7   :  { %v5030_v44 = vpop.eup %5029  ;;  %v2553_v63 = vadd.f32 1.0, %v5028_v7  ;;  %5051 = vpow2.f32 %v2537_v52  ;;  %v2513_v20 = vmin.f32 %v7376_v5, 20.0  ;;  %v2351_v17 = vmul.f32 %v7288_v23, %v7041_v41  ;;  %9688 = vst [vmem:[#allocation48_spill] sm:$0xff] %v7398_v59 }
 0x3c8   :  { %v5032_v26 = vpop.eup %5031  ;;  %v2554_v0 = vadd.f32 1.0, %v5030_v44  ;;  %5053 = vpow2.f32 %v2539_v8  ;;  %v2428_v14 = vmul.f32 %v7398_v59, %v7144_v53  ;;  %v7402_v7 = vmul.f32 %v2466_v9, %v2386_v30 }
 0x3c9   :  { %v5034_v48 = vpop.eup %5033  ;;  %v2555_v18 = vadd.f32 1.0, %v5032_v26  ;;  %5055 = vlog2.f32 %v2553_v63  ;;  %v2352_v44 = vmul.f32 %v7288_v23, %v7049_v29  ;;  %v2387_v41 = vadd.f32 %v7353_v2, %v2351_v17 }
 0x3ca   :  { %v2556_v60 = vadd.f32 1.0, %v5034_v48  ;;  %5057 = vlog2.f32 %v2554_v0  ;;  %v2541_v0 = vmul.f32 1.442695, %v2513_v20  ;;  %v2467_v48 = vadd.f32 %v7138_v27, %v2427_v24 }
 0x3cb   :  { %5059 = vlog2.f32 %v2555_v18  ;;  %v2514_v29 = vmin.f32 %v7402_v7, 20.0  ;;  %v7416_v20 = vadd.f32 1.0, %v7283_v49  ;;  %vm2489_vm10 = vcmp.gt.f32.partialorder %v7275_v54, 20.0 }
 0x3cc   :  { %v5036_v56 = vpop.eup %5035  ;;  %5061 = vlog2.f32 %v2556_v60  ;;  %v7413_v30 = vmul.f32 %v2467_v48, %v2387_v41  ;;  %vm2490_vm11 = vcmp.gt.f32.partialorder %v7277_v15, 20.0  ;;  %vm2491_vm12 = vcmp.gt.f32.partialorder %v7279_v25, 20.0 }
 0x3cd   :  { %v7384_v12 = vpop.eup %5037  ;;  %5063 = vrcp.f32 %v744_v43  ;;  %v2549_v52 = vadd.f32 1.0, %v5036_v56  ;;  %v2388_v43 = vadd.f32 %v7353_v2, %v2352_v44  ;;  %vm2492_vm13 = vcmp.gt.f32.partialorder %v7281_v55, 20.0 }
 0x3ce   :  { %v5040_v8 = vpop.eup %5039  ;;  %5065 = vrcp.f32 %v745_v61  ;;  %v2468_v61 = vadd.f32 %v7138_v27, %v2428_v14  ;;  %v2543_v27 = vmul.f32 1.442695, %v2514_v29  ;;  %v216_v14 = vld [vmem:[%s9661_s1 + $0x20] sm:$0xff]  ;;  %v2515_v49 = vmin.f32 %v7413_v30, 20.0 }
 0x3cf   :  { %v5042_v58 = vpop.eup %5041  ;;  %v2550_v34 = vadd.f32 1.0, %v5040_v8  ;;  %5067 = vlog2.f32 %v2549_v52  ;;  %vm2485_vm14 = vcmp.gt.f32.partialorder %v7312_v21, 20.0  ;;  %vm2486_vm15 = vcmp.gt.f32.partialorder %v7316_v6, 20.0 }
 0x3d0   :  { %v5044_v63 = vpop.eup %5043  ;;  %5069 = vrcp.f32 %v746_v51  ;;  %v2551_v26 = vadd.f32 1.0, %v5042_v58  ;;  %v7418_v2 = vmul.f32 %v2468_v61, %v2388_v43  ;;  %vm2487_vm0 = vcmp.gt.f32.partialorder %v7318_v16, 20.0 }
 0x3d1   :  { %v7407_v1 = vpop.eup %5045  ;;  %v2552_v53 = vadd.f32 1.0, %v5044_v63  ;;  %5071 = vlog2.f32 %v2550_v34  ;;  %v217_v34 = vld [vmem:[%s9661_s1 + $0x28] sm:$0xff] }
 0x3d2   :  { %v5048_v18 = vpop.eup %5047  ;;  %5073 = vlog2.f32 %v2551_v26  ;;  %v218_v26 = vld [vmem:[%s9661_s1 + $0x30] sm:$0xff] }
 0x3d3   :  { %v5050_v23 = vpop.eup %5049  ;;  %5075 = vlog2.f32 %v2552_v53  ;;  %v2557_v60 = vadd.f32 1.0, %v5048_v18  ;;  %v2516_v53 = vmin.f32 %v7418_v2, 20.0  ;;  %v219_v18 = vld [vmem:[%s9661_s1 + $0x38] sm:$0xff] }
 0x3d4   :  { %v5052_v56 = vpop.eup %5051  ;;  %v2558_v9 = vadd.f32 1.0, %v5050_v23  ;;  %5077 = vpow2.f32 %v2541_v0 }
 0x3d5   :  { %v5054_v51 = vpop.eup %5053  ;;  %v2559_v24 = vadd.f32 1.0, %v5052_v56  ;;  %5079 = vlog2.f32 %v2557_v60 }
 0x3d6   :  { %v5056_v17 = vpop.eup %5055  ;;  %v2560_v52 = vadd.f32 1.0, %v5054_v51  ;;  %5081 = vlog2.f32 %v2558_v9  ;;  %v2545_v9 = vmul.f32 1.442695, %v2515_v49 }
 0x3d7   :  { %v5058_v8 = vpop.eup %5057  ;;  %v2574_v58 = vmul.f32 0.6931472, %v5056_v17  ;;  %5083 = vlog2.f32 %v2559_v24 }
 0x3d8   :  { %v5060_v44 = vpop.eup %5059  ;;  %v2576_v41 = vmul.f32 0.6931472, %v5058_v8  ;;  %5085 = vlog2.f32 %v2560_v52  ;;  %v212_v8 = vld [vmem:[%s9661_s1] sm:$0xff] }
 0x3d9   :  { %v5062_v63 = vpop.eup %5061  ;;  %v2578_v0 = vmul.f32 0.6931472, %v5060_v44  ;;  %v2601_v48 = vsel %vm2489_vm10, %v7275_v54, %v2574_v58  ;;  %5087 = vpow2.f32 %v2543_v27  ;;  %vm2488_vm10 = vcmp.gt.f32.partialorder %v7320_v10, 20.0 }
 0x3da   :  { %v7439_v43 = vpop.eup %5063  ;;  %v2580_v29 = vmul.f32 0.6931472, %v5062_v63  ;;  %v2602_v23 = vsel %vm2490_vm11, %v7277_v15, %v2576_v41  ;;  %v7447_v61 = vsub.f32 %v216_v14, %v2601_v48  ;;  %vm2493_vm11 = vcmp.gt.f32.partialorder %v7337_v39, 20.0 }
 0x3db   :  { %v7449_v60 = vpop.eup %5065  ;;  %v2603_v54 = vsel %vm2491_vm12, %v7279_v25, %v2578_v0  ;;  %v7454_v56 = vsub.f32 %v217_v34, %v2602_v23  ;;  %v2547_v44 = vmul.f32 1.442695, %v2516_v53  ;;  %vm2494_vm12 = vcmp.gt.f32.partialorder %v7340_v33, 20.0 }
 0x3dc   :  { %v5068_v51 = vpop.eup %5067  ;;  %v2604_v24 = vsel %vm2492_vm13, %v7281_v55, %v2580_v29  ;;  %v7460_v15 = vsub.f32 %v218_v26, %v2603_v54  ;;  %v2649_v17 = vmin.f32 %v7447_v61, 20.0  ;;  %v213_v26 = vld [vmem:[%s9661_s1 + $0x8] sm:$0xff]  ;;  %5089 = vpow2.f32 %v2545_v9  ;;  %v214_v29 = vld [vmem:[%s9661_s1 + $0x10] sm:$0xff] }
 0x3dd   :  { %v7464_v52 = vpop.eup %5069  ;;  %v7466_v27 = vsub.f32 %v219_v18, %v2604_v24  ;;  %v2650_v25 = vmin.f32 %v7454_v56, 20.0  ;;  %v2566_v14 = vmul.f32 0.6931472, %v5068_v51  ;;  %v215_v24 = vld [vmem:[%s9661_s1 + $0x18] sm:$0xff]  ;;  %vm2495_vm13 = vcmp.gt.f32.partialorder %v7342_v13, 20.0 }
 0x3de   :  { %v5072_v55 = vpop.eup %5071  ;;  %v2651_v58 = vmin.f32 %v7460_v15, 20.0  ;;  %v2669_v49 = vmul.f32 1.442695, %v2649_v17 }
 0x3df   :  { %v5074_v34 = vpop.eup %5073  ;;  %v2652_v41 = vmin.f32 %v7466_v27, 20.0  ;;  %v2671_v63 = vmul.f32 1.442695, %v2650_v25  ;;  %v2568_v0 = vmul.f32 0.6931472, %v5072_v55  ;;  %v2597_v23 = vsel %vm2485_vm14, %v7312_v21, %v2566_v14 }
 0x3e0   :  { %v5076_v48 = vpop.eup %5075  ;;  %5091 = vpow2.f32 %v2669_v49  ;;  %v2673_v18 = vmul.f32 1.442695, %v2651_v58  ;;  %v2570_v53 = vmul.f32 0.6931472, %v5074_v34  ;;  %v7495_v58 = vsub.f32 %v212_v8, %v2597_v23  ;;  %v221_v8 = vld [vmem:[%s9661_s1 + $0x48] sm:$0xff] }
 0x3e1   :  { %v5078_v54 = vpop.eup %5077  ;;  %5093 = vpow2.f32 %v2671_v63  ;;  %v2675_v51 = vmul.f32 1.442695, %v2652_v41  ;;  %v2572_v9 = vmul.f32 0.6931472, %v5076_v48  ;;  %v2598_v17 = vsel %vm2486_vm15, %v7316_v6, %v2568_v0 }
 0x3e2   :  { %v5080_v25 = vpop.eup %5079  ;;  %5095 = vpow2.f32 %v2673_v18  ;;  %v2599_v55 = vsel %vm2487_vm0, %v7318_v16, %v2570_v53  ;;  %v7497_v21 = vsub.f32 %v213_v26, %v2598_v17  ;;  %v2645_v0 = vmin.f32 %v7495_v58, 20.0  ;;  %v220_v16 = vld [vmem:[%s9661_s1 + $0x40] sm:$0xff]  ;;  %v222_v18 = vld [vmem:[%s9661_s1 + $0x50] sm:$0xff] }
 0x3e3   :  { %v5082_v14 = vpop.eup %5081  ;;  %5097 = vpow2.f32 %v2675_v51  ;;  %v2600_v49 = vsel %vm2488_vm10, %v7320_v10, %v2572_v9  ;;  %v7502_v34 = vsub.f32 %v214_v29, %v2599_v55  ;;  %v2582_v41 = vmul.f32 0.6931472, %v5080_v25  ;;  %v223_v29 = vld [vmem:[%s9661_s1 + $0x58] sm:$0xff] }
 0x3e4   :  { %v5084_v6 = vpop.eup %5083  ;;  %v7504_v63 = vsub.f32 %v215_v24, %v2600_v49  ;;  %vm2496_vm14 = vcmp.gt.f32.partialorder %v7346_v45, 20.0  ;;  %v2646_v26 = vmin.f32 %v7497_v21, 20.0  ;;  %v2584_v53 = vmul.f32 0.6931472, %v5082_v14 }
 0x3e5   :  { %v5086_v10 = vpop.eup %5085  ;;  %v2647_v48 = vmin.f32 %v7502_v34, 20.0  ;;  %5099 = vpow2.f32 %v2547_v44  ;;  %v2661_v51 = vmul.f32 1.442695, %v2645_v0  ;;  %v2586_v24 = vmul.f32 0.6931472, %v5084_v6 }
 0x3e6   :  { %v2648_v23 = vmin.f32 %v7504_v63, 20.0  ;;  %v2561_v9 = vadd.f32 1.0, %v5078_v54  ;;  %v5088_v17 = vpop.eup %5087  ;;  %v2663_v25 = vmul.f32 1.442695, %v2646_v26  ;;  %v2588_v49 = vmul.f32 0.6931472, %v5086_v10 }
 0x3e7   :  { %v2665_v55 = vmul.f32 1.442695, %v2647_v48  ;;  %v2605_v59 = vsel %vm2493_vm11, %v7337_v39, %v2582_v41  ;;  %5101 = vpow2.f32 %v2661_v51  ;;  %v2606_v14 = vsel %vm2494_vm12, %v7340_v33, %v2584_v53 }
 0x3e8   :  { %v2667_v38 = vmul.f32 1.442695, %v2648_v23  ;;  %v2607_v44 = vsel %vm2495_vm13, %v7342_v13, %v2586_v24  ;;  %5103 = vpow2.f32 %v2663_v25  ;;  %v2608_v54 = vsel %vm2496_vm14, %v7346_v45, %v2588_v49 }
 0x3e9   :  { %v7536_v6 = vsub.f32 %v220_v16, %v2605_v59  ;;  %v7538_v0 = vsub.f32 %v221_v8, %v2606_v14  ;;  %5105 = vpow2.f32 %v2665_v55  ;;  %v7540_v39 = vsub.f32 %v222_v18, %v2607_v44  ;;  %v5090_v26 = vpop.eup %5089 }
 0x3ea   :  { %v7542_v41 = vsub.f32 %v223_v29, %v2608_v54  ;;  %v2562_v10 = vadd.f32 1.0, %v5088_v17  ;;  %5107 = vpow2.f32 %v2667_v38  ;;  %v7550_v55 = vadd.f32 1.0, %v7253_v57 }
 0x3eb   :  { %v2653_v33 = vmin.f32 %v7536_v6, 20.0  ;;  %5109 = vrcp.f32 %v7416_v20  ;;  %v2654_v13 = vmin.f32 %v7538_v0, 20.0  ;;  %v2655_v45 = vmin.f32 %v7540_v39, 20.0 }
 0x3ec   :  { %5111 = vlog2.f32 %v2561_v9  ;;  %v2656_v18 = vmin.f32 %v7542_v41, 20.0  ;;  %v2563_v9 = vadd.f32 1.0, %v5090_v26  ;;  %v2761_v14 = vsub.f32 1.0, %v7334_v37 }
 0x3ed   :  { %v5092_v48 = vpop.eup %5091  ;;  %v2677_v59 = vmul.f32 1.442695, %v2653_v33  ;;  %5113 = vlog2.f32 %v2562_v10  ;;  %v2679_v51 = vmul.f32 1.442695, %v2654_v13  ;;  %v2681_v24 = vmul.f32 1.442695, %v2655_v45 }
 0x3ee   :  { %v5094_v16 = vpop.eup %5093  ;;  %v2697_v8 = vadd.f32 1.0, %v5092_v48  ;;  %v2683_v25 = vmul.f32 1.442695, %v2656_v18  ;;  %v2762_v44 = vsub.f32 1.0, %v7344_v50  ;;  %v2763_v54 = vsub.f32 1.0, %v7348_v28 }
 0x3ef   :  { %v5096_v29 = vpop.eup %5095  ;;  %v2698_v53 = vadd.f32 1.0, %v5094_v16  ;;  %5115 = vpow2.f32 %v2677_v59  ;;  %v2764_v33 = vsub.f32 1.0, %v7384_v12  ;;  %v2757_v13 = vsub.f32 1.0, %v7407_v1 }
 0x3f0   :  { %v5098_v38 = vpop.eup %5097  ;;  %v2699_v23 = vadd.f32 1.0, %v5096_v29  ;;  %5117 = vlog2.f32 %v2697_v8  ;;  %v2758_v57 = vsub.f32 1.0, %v7439_v43  ;;  %v2765_v59 = vsub.f32 1.0, %v7310_v47 }
 0x3f1   :  { %v2700_v20 = vadd.f32 1.0, %v5098_v38  ;;  %5119 = vlog2.f32 %v2698_v53  ;;  %v2759_v8 = vsub.f32 1.0, %v7449_v60  ;;  %v2777_v38 = vmul.f32 %v7171_v42, %v2761_v14  ;;  %v224_v42 = vld [vmem:[%s9661_s1 + $0x60] sm:$0xff] }
 0x3f2   :  { %v5100_v17 = vpop.eup %5099  ;;  %5121 = vlog2.f32 %v2699_v23  ;;  %v2778_v23 = vmul.f32 %v7178_v4, %v2762_v44  ;;  %vm2497_vm15 = vcmp.gt.f32.partialorder %v7376_v5, 20.0  ;;  %vm2633_vm0 = vcmp.gt.f32.partialorder %v7447_v61, 20.0 }
 0x3f3   :  { %5123 = vlog2.f32 %v2700_v20  ;;  %v2564_v29 = vadd.f32 1.0, %v5100_v17  ;;  %v2760_v17 = vsub.f32 1.0, %v7464_v52  ;;  %vm2498_vm10 = vcmp.gt.f32.partialorder %v7402_v7, 20.0 }
 0x3f4   :  { %5125 = vpow2.f32 %v2679_v51  ;;  %v5102_v49 = vpop.eup %5101  ;;  %vm2634_vm11 = vcmp.gt.f32.partialorder %v7454_v56, 20.0  ;;  %vm2499_vm12 = vcmp.gt.f32.partialorder %v7413_v30, 20.0  ;;  %vm2635_vm13 = vcmp.gt.f32.partialorder %v7460_v15, 20.0 }
 0x3f5   :  { %5127 = vpow2.f32 %v2681_v24  ;;  %v5104_v10 = vpop.eup %5103  ;;  %v2693_v48 = vadd.f32 1.0, %v5102_v49  ;;  %v2779_v24 = vmul.f32 %v7185_v31, %v2763_v54  ;;  %vm2636_vm14 = vcmp.gt.f32.partialorder %v7466_v27, 20.0 }
 0x3f6   :  { %5129 = vpow2.f32 %v2683_v25  ;;  %v5106_v26 = vpop.eup %5105  ;;  %v2694_v45 = vadd.f32 1.0, %v5104_v10  ;;  %v7566_v25 = vmul.f32 %v7192_v11, %v2764_v33  ;;  %v7573_v10 = vmul.f32 %v7238_v40, %v2758_v57 }
 0x3f7   :  { %5131 = vlog2.f32 %v2563_v9  ;;  %v5108_v16 = vpop.eup %5107  ;;  %v2695_v18 = vadd.f32 1.0, %v5106_v26  ;;  %v7569_v9 = vmul.f32 %v7231_v32, %v2757_v13  ;;  %v7579_v11 = vmul.f32 %v7245_v19, %v2759_v8  ;;  %v225_v32 = vld [vmem:[%s9661_s1 + $0x68] sm:$0xff] }
 0x3f8   :  { %5133 = vlog2.f32 %v2693_v48  ;;  %v7560_v53 = vpop.eup %5109  ;;  %v2696_v51 = vadd.f32 1.0, %v5108_v16 }
 0x3f9   :  { %5135 = vlog2.f32 %v2694_v45  ;;  %v5112_v20 = vpop.eup %5111 }
 0x3fa   :  { %5137 = vlog2.f32 %v2695_v18  ;;  %v5114_v49 = vpop.eup %5113  ;;  %v2590_v4 = vmul.f32 0.6931472, %v5112_v20 }
 0x3fb   :  { %5139 = vlog2.f32 %v2696_v51  ;;  %v2592_v14 = vmul.f32 0.6931472, %v5114_v49 }
 0x3fc   :  { %v5116_v31 = vpop.eup %5115  ;;  %5141 = vlog2.f32 %v2564_v29  ;;  %v2609_v54 = vsel %vm2497_vm15, %v7376_v5, %v2590_v4  ;;  %vm2629_vm15 = vcmp.gt.f32.partialorder %v7495_v58, 20.0 }
 0x3fd   :  { %v5118_v40 = vpop.eup %5117  ;;  %v2701_v44 = vadd.f32 1.0, %v5116_v31  ;;  %v2610_v13 = vsel %vm2498_vm10, %v7402_v7, %v2592_v14  ;;  %v7591_v48 = vsub.f32 %v224_v42, %v2609_v54  ;;  %vm2630_vm10 = vcmp.gt.f32.partialorder %v7497_v21, 20.0 }
 0x3fe   :  { %v5120_v33 = vpop.eup %5119  ;;  %v2718_v19 = vmul.f32 0.6931472, %v5118_v40  ;;  %v7594_v45 = vsub.f32 %v225_v32, %v2610_v13 }
 0x3ff   :  { %v5122_v26 = vpop.eup %5121  ;;  %v2720_v57 = vmul.f32 0.6931472, %v5120_v33  ;;  %5143 = vlog2.f32 %v2701_v44  ;;  %v2657_v20 = vmin.f32 %v7591_v48, 20.0 }
 0x400   :  { %v5124_v16 = vpop.eup %5123  ;;  %v2722_v5 = vmul.f32 0.6931472, %v5122_v26  ;;  %v2745_v8 = vsel %vm2633_vm0, %v7447_v61, %v2718_v19  ;;  %v2658_v61 = vmin.f32 %v7594_v45, 20.0  ;;  %vm2500_vm0 = vcmp.gt.f32.partialorder %v7418_v2, 20.0 }
 0x401   :  { %v5126_v7 = vpop.eup %5125  ;;  %v2724_v18 = vmul.f32 0.6931472, %v5124_v16  ;;  %v2746_v29 = vsel %vm2634_vm11, %v7454_v56, %v2720_v57  ;;  %v2793_v51 = vmul.f32 %v7334_v37, %v2745_v8  ;;  %vm2631_vm11 = vcmp.gt.f32.partialorder %v7502_v34, 20.0 }
 0x402   :  { %v5128_v49 = vpop.eup %5127  ;;  %v2747_v42 = vsel %vm2635_vm13, %v7460_v15, %v2722_v5  ;;  %v2794_v4 = vmul.f32 %v7344_v50, %v2746_v29  ;;  %v2702_v31 = vadd.f32 1.0, %v5126_v7  ;;  %vm2637_vm13 = vcmp.gt.f32.partialorder %v7536_v6, 20.0 }
 0x403   :  { %v5130_v32 = vpop.eup %5129  ;;  %v2748_v14 = vsel %vm2636_vm14, %v7466_v27, %v2724_v18  ;;  %v2795_v40 = vmul.f32 %v7348_v28, %v2747_v42  ;;  %v7611_v44 = vadd.f32 %v2793_v51, %v2777_v38  ;;  %v2703_v56 = vadd.f32 1.0, %v5128_v49  ;;  %v226_v28 = vld [vmem:[%s9661_s1 + $0x70] sm:$0xff] }
 0x404   :  { %v5132_v37 = vpop.eup %5131  ;;  %v2796_v54 = vmul.f32 %v7384_v12, %v2748_v14  ;;  %v7615_v33 = vadd.f32 %v2794_v4, %v2778_v23  ;;  %v2704_v15 = vadd.f32 1.0, %v5130_v32  ;;  %5145 = vlog2.f32 %v2702_v31 }
 0x405   :  { %v5134_v50 = vpop.eup %5133  ;;  %v7617_v19 = vadd.f32 %v2795_v40, %v2779_v24  ;;  %4840 = vst [vmem:[#allocation14 + $0x20] sm:$0xff] %v7611_v44  ;;  %5147 = vlog2.f32 %v2703_v56  ;;  %v2594_v27 = vmul.f32 0.6931472, %v5132_v37  ;;  %v2685_v38 = vmul.f32 1.442695, %v2657_v20 }
 0x406   :  { %v5136_v13 = vpop.eup %5135  ;;  %v7624_v26 = vadd.f32 %v2796_v54, %v7566_v25  ;;  %4841 = vst [vmem:[#allocation14 + $0x28] sm:$0xff] %v7615_v33  ;;  %v2710_v12 = vmul.f32 0.6931472, %v5134_v50  ;;  %5149 = vlog2.f32 %v2704_v15  ;;  %v2687_v23 = vmul.f32 1.442695, %v2658_v61 }
 0x407   :  { %v5138_v24 = vpop.eup %5137  ;;  %4842 = vst [vmem:[#allocation14 + $0x30] sm:$0xff] %v7617_v19  ;;  %v2712_v57 = vmul.f32 0.6931472, %v5136_v13  ;;  %v2611_v16 = vsel %vm2499_vm12, %v7413_v30, %v2594_v27  ;;  %5151 = vpow2.f32 %v2685_v38  ;;  %vm2632_vm12 = vcmp.gt.f32.partialorder %v7504_v63, 20.0  ;;  %v9690_v38 = vld [vmem:[#allocation44_spill] sm:$0xff] }
 0x408   :  { %v5140_v5 = vpop.eup %5139  ;;  %4843 = vst [vmem:[#allocation14 + $0x38] sm:$0xff] %v7624_v26  ;;  %v2714_v25 = vmul.f32 0.6931472, %v5138_v24  ;;  %v2741_v8 = vsel %vm2629_vm15, %v7495_v58, %v2710_v12  ;;  %v7636_v7 = vsub.f32 %v226_v28, %v2611_v16  ;;  %5153 = vpow2.f32 %v2687_v23  ;;  %v227_v58 = vld [vmem:[%s9661_s1 + $0x78] sm:$0xff] }
 0x409   :  { %v5142_v18 = vpop.eup %5141  ;;  %v2716_v29 = vmul.f32 0.6931472, %v5140_v5  ;;  %v2742_v51 = vsel %vm2630_vm10, %v7497_v21, %v2712_v57  ;;  %v2789_v30 = vmul.f32 %v7407_v1, %v2741_v8  ;;  %v2767_v15 = vsub.f32 1.0, %v7325_v22 }
 0x40a   :  { %v2743_v20 = vsel %vm2631_vm11, %v7502_v34, %v2714_v25  ;;  %v2790_v49 = vmul.f32 %v7439_v43, %v2742_v51  ;;  %v2596_v42 = vmul.f32 0.6931472, %v5142_v18  ;;  %v2659_v1 = vmin.f32 %v7636_v7, 20.0  ;;  %v5409_v25 = vld [vmem:[%s9545_s2 + $0x50] sm:$0xff] }
 0x40b   :  { %v2744_v4 = vsel %vm2632_vm12, %v7504_v63, %v2716_v29  ;;  %v2791_v31 = vmul.f32 %v7449_v60, %v2743_v20  ;;  %v7650_v61 = vadd.f32 %v2789_v30, %v7569_v9  ;;  %v2776_v34 = vmul.f32 %v7258_v35, %v2760_v17  ;;  %v9691_v20 = vld [vmem:[#allocation45_spill] sm:$0xff] }
 0x40c   :  { %v5144_v21 = vpop.eup %5143  ;;  %v2792_v43 = vmul.f32 %v7464_v52, %v2744_v4  ;;  %v7658_v32 = vadd.f32 %v2790_v49, %v7573_v10  ;;  %v2612_v63 = vsel %vm2500_vm0, %v7418_v2, %v2596_v42  ;;  %v2689_v40 = vmul.f32 1.442695, %v2659_v1  ;;  %v9689_v10 = vld [vmem:[#allocation43_spill] sm:$0xff] }
 0x40d   :  { %v7664_v60 = vadd.f32 %v2791_v31, %v7579_v11  ;;  %4836 = vst [vmem:[#allocation14] sm:$0xff] %v7650_v61  ;;  %v2726_v9 = vmul.f32 0.6931472, %v5144_v21  ;;  %v7667_v14 = vsub.f32 %v227_v58, %v2612_v63  ;;  %3143 = vrot.lane.b32.xlu1 %v7650_v61, %s5585_s4  ;;  %v756_v35 = vadd.f32 1.0, %v7262_v36 }
 0x40e   :  { %v7672_v52 = vadd.f32 %v2792_v43, %v2776_v34  ;;  %4837 = vst [vmem:[#allocation14 + $0x8] sm:$0xff] %v7658_v32  ;;  %3151 = vrot.lane.b32.xlu0 %v7658_v32, %s5585_s4  ;;  %5155 = vpow2.f32 %v2689_v40  ;;  %v2766_v36 = vsub.f32 1.0, %v7314_v3  ;;  %v2781_v11 = vmul.f32 %v9689_v10, %v2765_v59 }
 0x40f   :  { %4838 = vst [vmem:[#allocation14 + $0x10] sm:$0xff] %v7664_v60  ;;  %v2749_v2 = vsel %vm2637_vm13, %v7536_v6, %v2726_v9  ;;  %v2660_v17 = vmin.f32 %v7667_v14, 20.0  ;;  %5157 = vrcp.f32 %v7550_v55  ;;  %vm2638_vm14 = vcmp.gt.f32.partialorder %v7538_v0, 20.0 }
 0x410   :  { %4839 = vst [vmem:[#allocation14 + $0x18] sm:$0xff] %v7672_v52  ;;  %v2797_v56 = vmul.f32 %v7310_v47, %v2749_v2  ;;  %5159 = vrcp.f32 %v756_v35  ;;  %v2768_v47 = vsub.f32 1.0, %v7560_v53  ;;  %v2782_v13 = vmul.f32 %v9690_v38, %v2766_v36 }
 0x411   :  { %v5146_v37 = vpop.eup %5145  ;;  %v2691_v54 = vmul.f32 1.442695, %v2660_v17  ;;  %3167 = vrot.lane.b32.xlu1 %v7672_v52, %s5585_s4  ;;  %vm2639_vm15 = vcmp.gt.f32.partialorder %v7540_v39, 20.0  ;;  %vm2640_vm0 = vcmp.gt.f32.partialorder %v7542_v41, 20.0  ;;  %v2783_v8 = vmul.f32 %v5409_v25, %v2767_v15 }
 0x412   :  { %v5148_v6 = vpop.eup %5147  ;;  %v2728_v50 = vmul.f32 0.6931472, %v5146_v37  ;;  %v7691_v28 = vadd.f32 %v2797_v56, %v2781_v11  ;;  %3041 = vrot.lane.b32.xlu0 %v7650_v61, %s5586_s18  ;;  %v757_v49 = vadd.f32 1.0, %v9691_v20  ;;  %vm2641_vm10 = vcmp.gt.f32.partialorder %v7591_v48, 20.0 }
 0x413   :  { %v5150_v59 = vpop.eup %5149  ;;  %v2730_v55 = vmul.f32 0.6931472, %v5148_v6  ;;  %5161 = vpow2.f32 %v2691_v54  ;;  %vm2642_vm11 = vcmp.gt.f32.partialorder %v7594_v45, 20.0  ;;  %vm2643_vm12 = vcmp.gt.f32.partialorder %v7636_v7, 20.0 }
 0x414   :  { %v5152_v27 = vpop.eup %5151  ;;  %v2732_v12 = vmul.f32 0.6931472, %v5150_v59  ;;  %v2750_v23 = vsel %vm2638_vm14, %v7538_v0, %v2728_v50  ;;  %4844 = vst [vmem:[#allocation14 + $0x40] sm:$0xff] %v7691_v28  ;;  %vm2644_vm13 = vcmp.gt.f32.partialorder %v7667_v14, 20.0 }
 0x415   :  { %v5154_v24 = vpop.eup %5153  ;;  %v2751_v57 = vsel %vm2639_vm15, %v7540_v39, %v2730_v55  ;;  %v2798_v16 = vmul.f32 %v7314_v3, %v2750_v23  ;;  %v2705_v5 = vadd.f32 1.0, %v5152_v27  ;;  %3049 = vrot.lane.b32.xlu1 %v7658_v32, %s5586_s18  ;;  %v5410_v3 = vld [vmem:[%s9545_s2 + $0x58] sm:$0xff]  ;;  %v9693_v55 = vld [vmem:[#allocation47_spill] sm:$0xff] }
 0x416   :  { %v2752_v0 = vsel %vm2640_vm0, %v7542_v41, %v2732_v12  ;;  %v2799_v18 = vmul.f32 %v7325_v22, %v2751_v57  ;;  %v2706_v29 = vadd.f32 1.0, %v5154_v24  ;;  %3575 = vrot.lane.b32.xlu0 %v7658_v32, %s5587_s30  ;;  %v2784_v39 = vmul.f32 %v5410_v3, %v2768_v47  ;;  %v9694_v24 = vld [vmem:[#allocation48_spill] sm:$0xff] }
 0x417   :  { %v2800_v51 = vmul.f32 %v7560_v53, %v2752_v0  ;;  %v7717_v30 = vadd.f32 %v2798_v16, %v2782_v13  ;;  %5163 = vlog2.f32 %v2705_v5  ;;  %v9692_v53 = vld [vmem:[#allocation46_spill] sm:$0xff] }
 0x418   :  { %v7720_v58 = vadd.f32 %v2799_v18, %v2783_v8  ;;  %5165 = vlog2.f32 %v2706_v29  ;;  %v758_v42 = vadd.f32 1.0, %v9692_v53 }
 0x419   :  { %v7722_v22 = vadd.f32 %v2800_v51, %v2784_v39  ;;  %4845 = vst [vmem:[#allocation14 + $0x48] sm:$0xff] %v7717_v30  ;;  %3583 = vrot.lane.b32.xlu1 %v7664_v60, %s5587_s30  ;;  %5167 = vrcp.f32 %v757_v49 }
 0x41a   :  { %4846 = vst [vmem:[#allocation14 + $0x50] sm:$0xff] %v7720_v58  ;;  %3065 = vrot.lane.b32.xlu0 %v7672_v52, %s5586_s18 }
 0x41b   :  { %4847 = vst [vmem:[#allocation14 + $0x58] sm:$0xff] %v7722_v22  ;;  %v5156_v41 = vpop.eup %5155 }
 0x41c   :  { %v2707_v4 = vadd.f32 1.0, %v5156_v41  ;;  %v5158_v31 = vpop.eup %5157 }
 0x41d   :  { %3567 = vrot.lane.b32.xlu1 %v7650_v61, %s5587_s30  ;;  %v5160_v1 = vpop.eup %5159  ;;  %v2769_v63 = vsub.f32 1.0, %v5158_v31 }
 0x41e   :  { %2939 = vrot.lane.b32.xlu0 %v7650_v61, %s5588_s29  ;;  %5169 = vlog2.f32 %v2707_v4  ;;  %v2770_v35 = vsub.f32 1.0, %v5160_v1 }
 0x41f   :  { %5171 = vrcp.f32 %v758_v42  ;;  %v2785_v10 = vmul.f32 %v7358_v46, %v2769_v63 }
 0x420   :  { %v5162_v21 = vpop.eup %5161  ;;  %v2786_v37 = vmul.f32 %v7370_v62, %v2770_v35 }
 0x421   :  { %v2708_v34 = vadd.f32 1.0, %v5162_v21  ;;  %2947 = vrot.lane.b32.xlu1 %v7658_v32, %s5588_s29 }
 0x422   :  { %3159 = vrot.lane.b32.xlu0 %v7664_v60, %s5585_s4 }
 0x423   :  { %5173 = vlog2.f32 %v2708_v34 }
 0x424   :  { %v5164_v43 = vpop.eup %5163 }
 0x425   :  { %v5166_v9 = vpop.eup %5165  ;;  %v2734_v40 = vmul.f32 0.6931472, %v5164_v43  ;;  %2963 = vrot.lane.b32.xlu1 %v7672_v52, %s5588_s29 }
 0x426   :  { %v2736_v2 = vmul.f32 0.6931472, %v5166_v9  ;;  %2837 = vrot.lane.b32.xlu0 %v7650_v61, %s5589_s10  ;;  %v5168_v56 = vpop.eup %5167 }
 0x427   :  { %v2753_v17 = vsel %vm2641_vm10, %v7591_v48, %v2734_v40  ;;  %v2771_v50 = vsub.f32 1.0, %v5168_v56 }
 0x428   :  { %v2754_v36 = vsel %vm2642_vm11, %v7594_v45, %v2736_v2  ;;  %v2801_v11 = vmul.f32 %v5158_v31, %v2753_v17 }
 0x429   :  { %v2802_v54 = vmul.f32 %v5160_v1, %v2754_v36  ;;  %2845 = vrot.lane.b32.xlu1 %v7658_v32, %s5589_s10  ;;  %v2787_v27 = vmul.f32 %v9693_v55, %v2771_v50 }
 0x42a   :  { %v7752_v6 = vadd.f32 %v2801_v11, %v2785_v10  ;;  %3057 = vrot.lane.b32.xlu0 %v7664_v60, %s5586_s18 }
 0x42b   :  { %v7756_v15 = vadd.f32 %v2802_v54, %v2786_v37  ;;  %v5170_v48 = vpop.eup %5169 }
 0x42c   :  { %4848 = vst [vmem:[#allocation14 + $0x60] sm:$0xff] %v7752_v6  ;;  %v5172_v46 = vpop.eup %5171  ;;  %v2738_v45 = vmul.f32 0.6931472, %v5170_v48 }
 0x42d   :  { %4849 = vst [vmem:[#allocation14 + $0x68] sm:$0xff] %v7756_v15  ;;  %2861 = vrot.lane.b32.xlu1 %v7672_v52, %s5589_s10  ;;  %v2772_v47 = vsub.f32 1.0, %v5172_v46 }
 0x42e   :  { %2955 = vrot.lane.b32.xlu0 %v7664_v60, %s5588_s29  ;;  %v2755_v62 = vsel %vm2643_vm12, %v7636_v7, %v2738_v45 }
 0x42f   :  { %v2803_v38 = vmul.f32 %v5168_v56, %v2755_v62  ;;  %v2788_v7 = vmul.f32 %v9694_v24, %v2772_v47 }
 0x430   :  { %v5174_v59 = vpop.eup %5173 }
 0x431   :  { %v2740_v13 = vmul.f32 0.6931472, %v5174_v59  ;;  %3473 = vrot.lane.b32.xlu1 %v7658_v32, %s5590_s0  ;;  %v7770_v12 = vadd.f32 %v2803_v38, %v2787_v27 }
 0x432   :  { %3481 = vrot.lane.b32.xlu0 %v7664_v60, %s5590_s0 }
 0x433   :  { %v2756_v23 = vsel %vm2644_vm13, %v7667_v14, %v2740_v13  ;;  %4850 = vst [vmem:[#allocation14 + $0x70] sm:$0xff] %v7770_v12 }
 0x434   :  { %v2804_v57 = vmul.f32 %v5172_v46, %v2756_v23 }
 0x435   :  { %3465 = vrot.lane.b32.xlu1 %v7650_v61, %s5590_s0 }
 0x436   :  { %v7779_v16 = vadd.f32 %v2804_v57, %v2788_v7  ;;  %2853 = vrot.lane.b32.xlu0 %v7664_v60, %s5589_s10 }
 0x438   :  { %4851 = vst [vmem:[#allocation14 + $0x78] sm:$0xff] %v7779_v16 }
 0x439   :  { %3371 = vrot.lane.b32.xlu1 %v7658_v32, %s5591_s19 }
 0x43a   :  { %3379 = vrot.lane.b32.xlu0 %v7664_v60, %s5591_s19 }
 0x43d   :  { %3363 = vrot.lane.b32.xlu1 %v7650_v61, %s5591_s19 }
 0x43e   :  { %3269 = vrot.lane.b32.xlu0 %v7658_v32, %s5592_s20 }
 0x441   :  { %3153 = vrot.lane.b32.xlu1 %v7615_v33, %s5585_s4 }
 0x442   :  { %3145 = vrot.lane.b32.xlu0 %v7611_v44, %s5585_s4 }
 0x445   :  { %3051 = vrot.lane.b32.xlu1 %v7615_v33, %s5586_s18 }
 0x446   :  { %3169 = vrot.lane.b32.xlu0 %v7624_v26, %s5585_s4 }
 0x449   :  { %3585 = vrot.lane.b32.xlu1 %v7617_v19, %s5587_s30 }
 0x44a   :  { %3043 = vrot.lane.b32.xlu0 %v7611_v44, %s5586_s18 }
 0x44d   :  { %3569 = vrot.lane.b32.xlu1 %v7611_v44, %s5587_s30 }
 0x44e   :  { %3577 = vrot.lane.b32.xlu0 %v7615_v33, %s5587_s30 }
 0x451   :  { %2949 = vrot.lane.b32.xlu1 %v7615_v33, %s5588_s29 }
 0x452   :  { %3067 = vrot.lane.b32.xlu0 %v7624_v26, %s5586_s18 }
 0x455   :  { %2965 = vrot.lane.b32.xlu1 %v7624_v26, %s5588_s29 }
 0x456   :  { %2941 = vrot.lane.b32.xlu0 %v7611_v44, %s5588_s29 }
 0x459   :  { %2847 = vrot.lane.b32.xlu1 %v7615_v33, %s5589_s10 }
 0x45a   :  { %3161 = vrot.lane.b32.xlu0 %v7617_v19, %s5585_s4 }
 0x45d   :  { %2863 = vrot.lane.b32.xlu1 %v7624_v26, %s5589_s10 }
 0x45e   :  { %2839 = vrot.lane.b32.xlu0 %v7611_v44, %s5589_s10 }
 0x461   :  { %3475 = vrot.lane.b32.xlu1 %v7615_v33, %s5590_s0 }
 0x462   :  { %3059 = vrot.lane.b32.xlu0 %v7617_v19, %s5586_s18 }
 0x465   :  { %3467 = vrot.lane.b32.xlu1 %v7611_v44, %s5590_s0 }
 0x466   :  { %2957 = vrot.lane.b32.xlu0 %v7617_v19, %s5588_s29 }
 0x469   :  { %3373 = vrot.lane.b32.xlu1 %v7615_v33, %s5591_s19 }
 0x46a   :  { %3483 = vrot.lane.b32.xlu0 %v7617_v19, %s5590_s0 }
 0x46d   :  { %3365 = vrot.lane.b32.xlu1 %v7611_v44, %s5591_s19 }
 0x46e   :  { %2855 = vrot.lane.b32.xlu0 %v7617_v19, %s5589_s10 }
 0x471   :  { %3279 = vrot.lane.b32.xlu1 %v7617_v19, %s5592_s20 }
 0x472   :  { %3381 = vrot.lane.b32.xlu0 %v7617_v19, %s5591_s19 }
 0x475   :  { %3263 = vrot.lane.b32.xlu1 %v7611_v44, %s5592_s20 }
 0x476   :  { %3271 = vrot.lane.b32.xlu0 %v7615_v33, %s5592_s20 }
 0x479   :  { %3147 = vrot.lane.b32.xlu1 %v7691_v28, %s5585_s4 }
 0x47a   :  { %3491 = vrot.lane.b32.xlu0 %v7624_v26, %s5590_s0 }
 0x47d   :  { %3171 = vrot.lane.b32.xlu1 %v7722_v22, %s5585_s4 }
 0x47e   :  { %3155 = vrot.lane.b32.xlu0 %v7717_v30, %s5585_s4 }
 0x47f   :  { %v7856_v32 = vpop.permute.xlu1 %3143 }
 0x480   :  { %v7858_v19 = vpop.permute.xlu0 %3151 }
 0x481   :  { %3053 = vrot.lane.b32.xlu1 %v7717_v30, %s5586_s18 }
 0x482   :  { %3045 = vrot.lane.b32.xlu0 %v7691_v28, %s5586_s18 }
 0x483   :  { %v7864_v44 = vpop.permute.xlu1 %3167 }
 0x484   :  { %v7866_v33 = vpop.permute.xlu0 %3041 }
 0x485   :  { %3587 = vrot.lane.b32.xlu1 %v7720_v58, %s5587_s30 }
 0x486   :  { %3579 = vrot.lane.b32.xlu0 %v7717_v30, %s5587_s30 }
 0x487   :  { %v7872_v14 = vpop.permute.xlu1 %3049 }
 0x488   :  { %v7874_v5 = vpop.permute.xlu0 %3575 }
 0x489   :  { %3571 = vrot.lane.b32.xlu1 %v7691_v28, %s5587_s30 }
 0x48a   :  { %3069 = vrot.lane.b32.xlu0 %v7722_v22, %s5586_s18 }
 0x48b   :  { %v7880_v25 = vpop.permute.xlu1 %3583 }
 0x48c   :  { %9695 = vst [vmem:[#allocation43_spill] sm:$0xff] %v7880_v25  ;;  %v7882_v8 = vpop.permute.xlu0 %3065 }
 0x48d   :  { %2951 = vrot.lane.b32.xlu1 %v7717_v30, %s5588_s29 }
 0x48e   :  { %2943 = vrot.lane.b32.xlu0 %v7691_v28, %s5588_s29 }
 0x48f   :  { %v7888_v0 = vpop.permute.xlu1 %3567 }
 0x490   :  { %9696 = vst [vmem:[#allocation44_spill] sm:$0xff] %v7888_v0  ;;  %v7890_v18 = vpop.permute.xlu0 %2939 }
 0x491   :  { %2967 = vrot.lane.b32.xlu1 %v7722_v22, %s5588_s29 }
 0x492   :  { %3163 = vrot.lane.b32.xlu0 %v7720_v58, %s5585_s4 }
 0x493   :  { %v7896_v29 = vpop.permute.xlu1 %2947 }
 0x494   :  { %v7898_v3 = vpop.permute.xlu0 %3159 }
 0x495   :  { %2849 = vrot.lane.b32.xlu1 %v7717_v30, %s5589_s10 }
 0x496   :  { %2841 = vrot.lane.b32.xlu0 %v7691_v28, %s5589_s10 }
 0x497   :  { %v7904_v39 = vpop.permute.xlu1 %2963 }
 0x498   :  { %v7906_v51 = vpop.permute.xlu0 %2837 }
 0x499   :  { %2865 = vrot.lane.b32.xlu1 %v7722_v22, %s5589_s10 }
 0x49a   :  { %3061 = vrot.lane.b32.xlu0 %v7720_v58, %s5586_s18 }
 0x49b   :  { %v7912_v20 = vpop.permute.xlu1 %2845 }
 0x49c   :  { %v7914_v49 = vpop.permute.xlu0 %3057 }
 0x49d   :  { %3477 = vrot.lane.b32.xlu1 %v7717_v30, %s5590_s0 }
 0x49e   :  { %2959 = vrot.lane.b32.xlu0 %v7720_v58, %s5588_s29 }
 0x49f   :  { %v7920_v41 = vpop.permute.xlu1 %2861 }
 0x4a0   :  { %v7922_v53 = vpop.permute.xlu0 %2955 }
 0x4a1   :  { %3469 = vrot.lane.b32.xlu1 %v7691_v28, %s5590_s0 }
 0x4a2   :  { %3485 = vrot.lane.b32.xlu0 %v7720_v58, %s5590_s0 }
 0x4a3   :  { %v7928_v42 = vpop.permute.xlu1 %3473 }
 0x4a4   :  { %9697 = vst [vmem:[#allocation45_spill] sm:$0xff] %v7928_v42  ;;  %v7930_v4 = vpop.permute.xlu0 %3481  ;;  %v3187_v42 = vsel %vm1184_vm1, %v7864_v44, %v7856_v32 }
 0x4a5   :  { %9698 = vst [vmem:[#allocation46_spill] sm:$0xff] %v7930_v4  ;;  %3375 = vrot.lane.b32.xlu1 %v7717_v30, %s5591_s19  ;;  %v3081_v4 = vsel %vm1080_vm2, %v7866_v33, %v7872_v14 }
 0x4a6   :  { %2857 = vrot.lane.b32.xlu0 %v7720_v58, %s5589_s10 }
 0x4a7   :  { %v7936_v31 = vpop.permute.xlu1 %3465 }
 0x4a8   :  { %9699 = vst [vmem:[#allocation47_spill] sm:$0xff] %v7936_v31  ;;  %v7938_v1 = vpop.permute.xlu0 %2853  ;;  %v3183_v31 = vsel %vm1184_vm1, %v7856_v32, %v7858_v19 }
 0x4a9   :  { %9700 = vst [vmem:[#allocation48_spill] sm:$0xff] %v7938_v1  ;;  %3367 = vrot.lane.b32.xlu1 %v7691_v28, %s5591_s19 }
 0x4aa   :  { %3383 = vrot.lane.b32.xlu0 %v7720_v58, %s5591_s19 }
 0x4ab   :  { %v7944_v21 = vpop.permute.xlu1 %3371 }
 0x4ac   :  { %9701 = vst [vmem:[#allocation49_spill] sm:$0xff] %v7944_v21  ;;  %v7946_v34 = vpop.permute.xlu0 %3379  ;;  %v3513_v21 = vld [vmem:[#allocation6 + $0x1c] sm:$0xf] }
 0x4ad   :  { %9702 = vst [vmem:[#allocation50_spill] sm:$0xff] %v7946_v34  ;;  %3281 = vrot.lane.b32.xlu1 %v7720_v58, %s5592_s20  ;;  %v8220_v34 = vld [vmem:[#allocation6 + $0x18] sm:$0xf] }
 0x4ae   :  { %3273 = vrot.lane.b32.xlu0 %v7717_v30, %s5592_s20  ;;  %9765 = vst [vmem:[#allocation108_spill] sm:$0xff] %v8220_v34 }
 0x4af   :  { %v7952_v43 = vpop.permute.xlu1 %3363 }
 0x4b0   :  { %9703 = vst [vmem:[#allocation51_spill] sm:$0xff] %v7952_v43  ;;  %v7954_v63 = vpop.permute.xlu0 %3269  ;;  %v8188_v43 = vld [vmem:[#allocation6 + $0x20] sm:$0xf] }
 0x4b1   :  { %9704 = vst [vmem:[#allocation52_spill] sm:$0xff] %v7954_v63  ;;  %3265 = vrot.lane.b32.xlu1 %v7691_v28, %s5592_s20  ;;  %9759 = vst [vmem:[#allocation105_spill] sm:$0xff] %v8188_v43 }
 0x4b2   :  { %3493 = vrot.lane.b32.xlu0 %v7722_v22, %s5590_s0 }
 0x4b3   :  { %v7960_v9 = vpop.permute.xlu1 %3153 }
 0x4b4   :  { %9705 = vst [vmem:[#allocation53_spill] sm:$0xff] %v7960_v9  ;;  %v7962_v40 = vpop.permute.xlu0 %3145 }
 0x4b5   :  { %3157 = vrot.lane.b32.xlu1 %v7756_v15, %s5585_s4 }
 0x4b6   :  { %3149 = vrot.lane.b32.xlu0 %v7752_v6, %s5585_s4 }
 0x4b7   :  { %v7968_v30 = vpop.permute.xlu1 %3051 }
 0x4b8   :  { %9706 = vst [vmem:[#allocation54_spill] sm:$0xff] %v7968_v30  ;;  %v7970_v58 = vpop.permute.xlu0 %3169 }
 0x4b9   :  { %3055 = vrot.lane.b32.xlu1 %v7756_v15, %s5586_s18 }
 0x4ba   :  { %3173 = vrot.lane.b32.xlu0 %v7779_v16, %s5585_s4 }
 0x4bb   :  { %v7976_v28 = vpop.permute.xlu1 %3585 }
 0x4bc   :  { %9707 = vst [vmem:[#allocation55_spill] sm:$0xff] %v7976_v28  ;;  %v7978_v35 = vpop.permute.xlu0 %3043 }
 0x4bd   :  { %9708 = vst [vmem:[#allocation56_spill] sm:$0xff] %v7978_v35  ;;  %3589 = vrot.lane.b32.xlu1 %v7770_v12, %s5587_s30  ;;  %v8246_v35 = vld [vmem:[#allocation6 + $0x14] sm:$0xf] }
 0x4be   :  { %3047 = vrot.lane.b32.xlu0 %v7752_v6, %s5586_s18  ;;  %9770 = vst [vmem:[#allocation111_spill] sm:$0xff] %v8246_v35 }
 0x4bf   :  { %v7984_v2 = vpop.permute.xlu1 %3569 }
 0x4c0   :  { %9709 = vst [vmem:[#allocation57_spill] sm:$0xff] %v7984_v2  ;;  %v7986_v17 = vpop.permute.xlu0 %3577 }
 0x4c1   :  { %3573 = vrot.lane.b32.xlu1 %v7752_v6, %s5587_s30 }
 0x4c2   :  { %3581 = vrot.lane.b32.xlu0 %v7756_v15, %s5587_s30 }
 0x4c3   :  { %v7992_v36 = vpop.permute.xlu1 %2949 }
 0x4c4   :  { %9710 = vst [vmem:[#allocation58_spill] sm:$0xff] %v7992_v36  ;;  %v7994_v10 = vpop.permute.xlu0 %3067 }
 0x4c5   :  { %9711 = vst [vmem:[#allocation59_spill] sm:$0xff] %v7994_v10  ;;  %2953 = vrot.lane.b32.xlu1 %v7756_v15, %s5588_s29 }
 0x4c6   :  { %3071 = vrot.lane.b32.xlu0 %v7779_v16, %s5586_s18 }
 0x4c7   :  { %v8000_v11 = vpop.permute.xlu1 %2965 }
 0x4c8   :  { %9712 = vst [vmem:[#allocation60_spill] sm:$0xff] %v8000_v11  ;;  %v8002_v56 = vpop.permute.xlu0 %2941 }
 0x4c9   :  { %9713 = vst [vmem:[#allocation61_spill] sm:$0xff] %v8002_v56  ;;  %2969 = vrot.lane.b32.xlu1 %v7779_v16, %s5588_s29 }
 0x4ca   :  { %2945 = vrot.lane.b32.xlu0 %v7752_v6, %s5588_s29 }
 0x4cb   :  { %v8008_v37 = vpop.permute.xlu1 %2847 }
 0x4cc   :  { %9714 = vst [vmem:[#allocation62_spill] sm:$0xff] %v8008_v37  ;;  %v8010_v54 = vpop.permute.xlu0 %3161 }
 0x4cd   :  { %9715 = vst [vmem:[#allocation63_spill] sm:$0xff] %v8010_v54  ;;  %2851 = vrot.lane.b32.xlu1 %v7756_v15, %s5589_s10 }
 0x4ce   :  { %3165 = vrot.lane.b32.xlu0 %v7770_v12, %s5585_s4 }
 0x4cf   :  { %v8016_v48 = vpop.permute.xlu1 %2863 }
 0x4d0   :  { %9716 = vst [vmem:[#allocation64_spill] sm:$0xff] %v8016_v48  ;;  %v8018_v50 = vpop.permute.xlu0 %2839 }
 0x4d1   :  { %9717 = vst [vmem:[#allocation65_spill] sm:$0xff] %v8018_v50  ;;  %2867 = vrot.lane.b32.xlu1 %v7779_v16, %s5589_s10 }
 0x4d2   :  { %2843 = vrot.lane.b32.xlu0 %v7752_v6, %s5589_s10 }
 0x4d3   :  { %v8024_v46 = vpop.permute.xlu1 %3475 }
 0x4d4   :  { %9718 = vst [vmem:[#allocation66_spill] sm:$0xff] %v8024_v46  ;;  %v8026_v45 = vpop.permute.xlu0 %3059 }
 0x4d5   :  { %9719 = vst [vmem:[#allocation67_spill] sm:$0xff] %v8026_v45  ;;  %3479 = vrot.lane.b32.xlu1 %v7756_v15, %s5590_s0 }
 0x4d6   :  { %3063 = vrot.lane.b32.xlu0 %v7770_v12, %s5586_s18 }
 0x4d7   :  { %v8032_v62 = vpop.permute.xlu1 %3467 }
 0x4d8   :  { %9720 = vst [vmem:[#allocation68_spill] sm:$0xff] %v8032_v62  ;;  %v8034_v59 = vpop.permute.xlu0 %2957 }
 0x4d9   :  { %9721 = vst [vmem:[#allocation69_spill] sm:$0xff] %v8034_v59  ;;  %3471 = vrot.lane.b32.xlu1 %v7752_v6, %s5590_s0 }
 0x4da   :  { %2961 = vrot.lane.b32.xlu0 %v7770_v12, %s5588_s29 }
 0x4db   :  { %v8040_v47 = vpop.permute.xlu1 %3373 }
 0x4dc   :  { %9722 = vst [vmem:[#allocation70_spill] sm:$0xff] %v8040_v47  ;;  %v8042_v55 = vpop.permute.xlu0 %3483 }
 0x4dd   :  { %9723 = vst [vmem:[#allocation71_spill] sm:$0xff] %v8042_v55  ;;  %3377 = vrot.lane.b32.xlu1 %v7756_v15, %s5591_s19 }
 0x4de   :  { %3487 = vrot.lane.b32.xlu0 %v7770_v12, %s5590_s0 }
 0x4df   :  { %v8048_v27 = vpop.permute.xlu1 %3365 }
 0x4e0   :  { %9724 = vst [vmem:[#allocation72_spill] sm:$0xff] %v8048_v27  ;;  %v8050_v38 = vpop.permute.xlu0 %2855 }
 0x4e1   :  { %9725 = vst [vmem:[#allocation73_spill] sm:$0xff] %v8050_v38  ;;  %3369 = vrot.lane.b32.xlu1 %v7752_v6, %s5591_s19 }
 0x4e2   :  { %2859 = vrot.lane.b32.xlu0 %v7770_v12, %s5589_s10 }
 0x4e3   :  { %v8056_v13 = vpop.permute.xlu1 %3279 }
 0x4e4   :  { %9726 = vst [vmem:[#allocation74_spill] sm:$0xff] %v8056_v13  ;;  %v8058_v23 = vpop.permute.xlu0 %3381 }
 0x4e5   :  { %9727 = vst [vmem:[#allocation75_spill] sm:$0xff] %v8058_v23  ;;  %3283 = vrot.lane.b32.xlu1 %v7770_v12, %s5592_s20 }
 0x4e6   :  { %3385 = vrot.lane.b32.xlu0 %v7770_v12, %s5591_s19 }
 0x4e7   :  { %v8064_v24 = vpop.permute.xlu1 %3263 }
 0x4e8   :  { %9728 = vst [vmem:[#allocation76_spill] sm:$0xff] %v8064_v24  ;;  %v8066_v7 = vpop.permute.xlu0 %3271 }
 0x4e9   :  { %9729 = vst [vmem:[#allocation77_spill] sm:$0xff] %v8066_v7  ;;  %3267 = vrot.lane.b32.xlu1 %v7752_v6, %s5592_s20 }
 0x4ea   :  { %3275 = vrot.lane.b32.xlu0 %v7756_v15, %s5592_s20 }
 0x4eb   :  { %v8072_v57 = vpop.permute.xlu1 %3147 }
 0x4ec   :  { %v8074_v63 = vpop.permute.xlu0 %3491 }
 0x4ed   :  { %9730 = vst [vmem:[#allocation78_spill] sm:$0xff] %v8074_v63  ;;  %3277 = vrot.lane.b32.xlu1 %v7664_v60, %s5592_s20  ;;  %v3670_v63 = vld [vmem:[#allocation12 + $0x8] sm:$0xff]  ;;  %v9034_v60 = vld [vmem:[#allocation14 + $0x10] sm:$0xff] }
 0x4ee   :  { %3495 = vrot.lane.b32.xlu0 %v7779_v16, %s5590_s0  ;;  %3909 = vmatprep.mubr.f32.mxu0 %v3670_v63 }
 0x4ef   :  { %v8080_v12 = vpop.permute.xlu1 %3171 }
 0x4f0   :  { %v8082_v24 = vpop.permute.xlu0 %3155 }
 0x4f1   :  { %3261 = vrot.lane.b32.xlu1 %v7650_v61, %s5592_s20 }
 0x4f2   :  { %3489 = vrot.lane.b32.xlu0 %v7672_v52, %s5590_s0 }
 0x4f3   :  { %v8088_v6 = vpop.permute.xlu1 %3053 }
 0x4f4   :  { %9731 = vst [vmem:[#allocation79_spill] sm:$0xff] %v8088_v6  ;;  %v8090_v15 = vpop.permute.xlu0 %3045 }
 0x4f5   :  { %9732 = vst [vmem:[#allocation80_spill] sm:$0xff] %v8090_v15  ;;  %v8096_v7 = vsel %vm1080_vm2, %v8090_v15, %v8088_v6  ;;  %3391 = vrot.lane.b32.xlu1 %v7722_v22, %s5591_s19 }
 0x4f6   :  { %9734 = vst [vmem:[#allocation22_spill] sm:$0xff] %v8096_v7  ;;  %3393 = vrot.lane.b32.xlu0 %v7779_v16, %s5591_s19 }
 0x4f7   :  { %v8102_v61 = vpop.permute.xlu1 %3587 }
 0x4f8   :  { %9735 = vst [vmem:[#allocation81_spill] sm:$0xff] %v8102_v61  ;;  %v8104_v13 = vpop.permute.xlu0 %3579 }
 0x4f9   :  { %3387 = vrot.lane.b32.xlu1 %v7672_v52, %s5591_s19 }
 0x4fa   :  { %3389 = vrot.lane.b32.xlu0 %v7624_v26, %s5591_s19 }
 0x4fb   :  { %v8110_v23 = vpop.permute.xlu1 %3571 }
 0x4fc   :  { %9736 = vst [vmem:[#allocation82_spill] sm:$0xff] %v8110_v23  ;;  %v8112_v38 = vpop.permute.xlu0 %3069 }
 0x4fd   :  { %9737 = vst [vmem:[#allocation83_spill] sm:$0xff] %v8112_v38  ;;  %3289 = vrot.lane.b32.xlu1 %v7722_v22, %s5592_s20 }
 0x4fe   :  { %3291 = vrot.lane.b32.xlu0 %v7779_v16, %s5592_s20 }
 0x4ff   :  { %v2952_v63 = vpop.permute.xlu1 %2951 }
 0x500   :  { %v8118_v27 = vpop.permute.xlu0 %2943 }
 0x501   :  { %9738 = vst [vmem:[#allocation84_spill] sm:$0xff] %v8118_v27  ;;  %v8123_v47 = vsel %vm976_vm4, %v8118_v27, %v2952_v63  ;;  %3285 = vrot.lane.b32.xlu1 %v7672_v52, %s5592_s20 }
 0x502   :  { %9739 = vst [vmem:[#allocation85_spill] sm:$0xff] %v8123_v47  ;;  %3287 = vrot.lane.b32.xlu0 %v7624_v26, %s5592_s20 }
 0x503   :  { %v8129_v55 = vpop.permute.xlu1 %2967 }
 0x504   :  { %9740 = vst [vmem:[#allocation86_spill] sm:$0xff] %v8129_v55  ;;  %v8131_v59 = vpop.permute.xlu0 %3163 }
 0x505   :  { %9741 = vst [vmem:[#allocation87_spill] sm:$0xff] %v8131_v59  ;;  %3595 = vrot.lane.b32.xlu1 %v7722_v22, %s5587_s30 }
 0x506   :  { %3597 = vrot.lane.b32.xlu0 %v7779_v16, %s5587_s30 }
 0x507   :  { %v2850_v62 = vpop.permute.xlu1 %2849 }
 0x508   :  { %v8137_v46 = vpop.permute.xlu0 %2841 }
 0x509   :  { %9742 = vst [vmem:[#allocation88_spill] sm:$0xff] %v8137_v46  ;;  %v8142_v45 = vsel %vm873_vm6, %v8137_v46, %v2850_v62  ;;  %3591 = vrot.lane.b32.xlu1 %v7672_v52, %s5587_s30 }
 0x50a   :  { %9743 = vst [vmem:[#allocation89_spill] sm:$0xff] %v8142_v45  ;;  %3593 = vrot.lane.b32.xlu0 %v7624_v26, %s5587_s30 }
 0x50b   :  { %v8148_v48 = vpop.permute.xlu1 %2865 }
 0x50c   :  { %9744 = vst [vmem:[#allocation90_spill] sm:$0xff] %v8148_v48  ;;  %v8150_v22 = vpop.permute.xlu0 %3061 }
 0x50d   :  { %9745 = vst [vmem:[#allocation91_spill] sm:$0xff] %v8150_v22 }
 0x50f   :  { %v8152_v6 = vpop.permute.xlu1 %3477 }
 0x510   :  { %9746 = vst [vmem:[#allocation92_spill] sm:$0xff] %v8152_v6  ;;  %v2960_v16 = vpop.permute.xlu0 %2959 }
 0x511   :  { %v8157_v50 = vsel %vm976_vm4, %v2960_v16, %v8129_v55  ;;  %v8161_v45 = vsel %vm976_vm4, %v2952_v63, %v2960_v16  ;;  %v9766_v55 = vld [vmem:[#allocation23_spill] sm:$0xff] }
 0x512   :  { %9747 = vst [vmem:[#allocation93_spill] sm:$0xff] %v8157_v50  ;;  %9748 = vst [vmem:[#allocation94_spill] sm:$0xff] %v8161_v45  ;;  %v8279_v32 = vrot.slane %v8220_v34, %v9766_v55 }
 0x513   :  { %v8163_v52 = vpop.permute.xlu1 %3469 }
 0x514   :  { %9749 = vst [vmem:[#allocation95_spill] sm:$0xff] %v8163_v52  ;;  %v8165_v46 = vpop.permute.xlu0 %3485  ;;  %9773 = vst [vmem:[#allocation112_spill] sm:$0xff] %v8279_v32 }
 0x515   :  { %9750 = vst [vmem:[#allocation96_spill] sm:$0xff] %v8165_v46  ;;  %v3089_v46 = vld [vmem:[#allocation6 + $0x8] sm:$0xf] }
 0x516   :  { %v8223_v27 = vrot.slane %v3089_v46, %v9766_v55 }
 0x517   :  { %v8167_v26 = vpop.permute.xlu1 %3375 }
 0x518   :  { %9751 = vst [vmem:[#allocation97_spill] sm:$0xff] %v8167_v26  ;;  %v2858_v37 = vpop.permute.xlu0 %2857  ;;  %v3191_v26 = vld [vmem:[#allocation6 + $0xc] sm:$0xf] }
 0x519   :  { %v8172_v6 = vsel %vm873_vm6, %v2858_v37, %v8148_v48  ;;  %v8176_v22 = vsel %vm873_vm6, %v2850_v62, %v2858_v37  ;;  %v3200_v59 = vrot.slane %v3191_v26, %v9766_v55 }
 0x51a   :  { %9752 = vst [vmem:[#allocation98_spill] sm:$0xff] %v8172_v6  ;;  %9753 = vst [vmem:[#allocation99_spill] sm:$0xff] %v8176_v22  ;;  %v9761_v6 = vld [vmem:[#allocation24_spill] sm:$0xff] }
 0x51b   :  { %v8178_v50 = vpop.permute.xlu1 %3367  ;;  %v8193_v47 = vrot.slane %v3191_v26, %v9761_v6  ;;  %v8196_v37 = vrot.slane %v3089_v46, %v9761_v6  ;;  %v8200_v62 = vrot.slane %v8188_v43, %v9761_v6  ;;  %v8229_v36 = vrot.slane %v3513_v21, %v9761_v6 }
 0x51c   :  { %9754 = vst [vmem:[#allocation100_spill] sm:$0xff] %v8178_v50  ;;  %v8180_v63 = vpop.permute.xlu0 %3383  ;;  %v8233_v1 = vrot.slane %v8220_v34, %v9761_v6 }
 0x51d   :  { %9755 = vst [vmem:[#allocation101_spill] sm:$0xff] %v8180_v63  ;;  %v2885_v63 = vld [vmem:[#allocation6] sm:$0xf]  ;;  %9768 = vst [vmem:[#allocation109_spill] sm:$0xff] %v8229_v36  ;;  %v9771_v36 = vld [vmem:[#allocation26_spill] sm:$0xff]  ;;  %v3213_v34 = vmul.f32 %v8193_v47, %v3187_v42  ;;  %v3603_v42 = vsel %vm1616_vm3, %v7874_v5, %v7880_v25 }
 0x51e   :  { %v8215_v54 = vrot.slane %v2885_v63, %v9761_v6  ;;  %9769 = vst [vmem:[#allocation110_spill] sm:$0xff] %v8233_v1  ;;  %v8249_v30 = vrot.slane %v3191_v26, %v9771_v36  ;;  %v8252_v1 = vrot.slane %v2885_v63, %v9766_v55 }
 0x51f   :  { %v8182_v16 = vpop.permute.xlu1 %3281 }
 0x520   :  { %9756 = vst [vmem:[#allocation102_spill] sm:$0xff] %v8182_v16  ;;  %v8184_v45 = vpop.permute.xlu0 %3273  ;;  %v2987_v16 = vld [vmem:[#allocation6 + $0x4] sm:$0xf] }
 0x521   :  { %9757 = vst [vmem:[#allocation103_spill] sm:$0xff] %v8184_v45  ;;  %v9762_v45 = vld [vmem:[#allocation25_spill] sm:$0xff]  ;;  %v8240_v7 = vrot.slane %v2987_v16, %v9766_v55  ;;  %v8269_v15 = vrot.slane %v2987_v16, %v9771_v36 }
 0x522   :  { %v8203_v22 = vrot.slane %v3191_v26, %v9762_v45  ;;  %v8209_v50 = vrot.slane %v3089_v46, %v9762_v45  ;;  %v8218_v11 = vrot.slane %v2885_v63, %v9762_v45  ;;  %v8266_v26 = vrot.slane %v3089_v46, %v9771_v36 }
 0x523   :  { %v8186_v52 = vpop.permute.xlu1 %3265  ;;  %v8285_v46 = vrot.slane %v8246_v35, %v9761_v6 }
 0x524   :  { %9758 = vst [vmem:[#allocation104_spill] sm:$0xff] %v8186_v52  ;;  %v8190_v48 = vpop.permute.xlu0 %3493  ;;  %v8206_v52 = vrot.slane %v2987_v16, %v9761_v6  ;;  %9764 = vst [vmem:[#allocation107_spill] sm:$0xff] %v8218_v11  ;;  %v8237_v11 = vrot.slane %v8188_v43, %v9766_v55  ;;  %v3189_v6 = vsel %vm1184_vm1, %v8080_v12, %v8072_v57 }
 0x525   :  { %9760 = vst [vmem:[#allocation106_spill] sm:$0xff] %v8190_v48  ;;  %v8212_v48 = vrot.slane %v2987_v16, %v9762_v45  ;;  %9774 = vst [vmem:[#allocation113_spill] sm:$0xff] %v8285_v46  ;;  %v3185_v16 = vsel %vm1184_vm1, %v8072_v57, %v8082_v24  ;;  %v3188_v57 = vsel %vm1184_vm1, %v7970_v58, %v7962_v40 }
 0x527   :  { %9763 = vst [vmem:[#allocation24_spill] sm:$0xff] %v8212_v48  ;;  %v8226_v56 = vpop.permute.xlu1 %3157  ;;  %v8272_v48 = vrot.slane %v3513_v21, %v9766_v55 }
 0x528   :  { %9767 = vst [vmem:[#allocation23_spill] sm:$0xff] %v8226_v56  ;;  %v3150_v10 = vpop.permute.xlu0 %3149 }
 0x529   :  { %v3186_v43 = vsel %vm1184_vm1, %v3150_v10, %v8226_v56  ;;  %v8275_v56 = vrot.slane %v2885_v63, %v9771_v36 }
 0x52a   :  { %v3226_v38 = vmul.f32 %v3200_v59, %v3186_v43  ;;  %v8288_v43 = vrot.slane %v3513_v21, %v9762_v45  ;;  %v3222_v45 = vmul.f32 %v3200_v59, %v3185_v16 }
 0x52b   :  { %9772 = vst [vmem:[#allocation26_spill] sm:$0xff] %v8275_v56  ;;  %v8281_v2 = vpop.permute.xlu1 %3055  ;;  %v3214_v56 = vmul.f32 %v3200_v59, %v3183_v31  ;;  %v3184_v31 = vsel %vm1184_vm1, %v7962_v40, %v7960_v9  ;;  %v3221_v40 = vmul.f32 %v8193_v47, %v3189_v6  ;;  %v8362_v6 = vrot.slane %v3513_v21, %v9771_v36 }
 0x52c   :  { %9775 = vst [vmem:[#allocation114_spill] sm:$0xff] %v8288_v43  ;;  %v8294_v63 = vpop.permute.xlu0 %3173  ;;  %3845 = vmatprep.subr.mxu0 %v3226_v38  ;;  %v8305_v43 = vmul.f32 %v8223_v27, %v3081_v4  ;;  %v3085_v38 = vsel %vm1080_vm2, %v7882_v8, %v7866_v33  ;;  %v3607_v4 = vsel %vm1616_vm3, %v7888_v0, %v7874_v5 }
 0x52d   :  { %v3190_v46 = vsel %vm1184_vm1, %v8294_v63, %v3150_v10  ;;  %v2979_v33 = vsel %vm976_vm4, %v7890_v18, %v7896_v29  ;;  %v3179_v5 = vsel %vm1184_vm1, %v7858_v19, %v7898_v3  ;;  %v2983_v0 = vsel %vm976_vm4, %v7904_v39, %v7890_v18 }
 0x52e   :  { %v3225_v10 = vmul.f32 %v8193_v47, %v3190_v46  ;;  %v3175_v46 = vsel %vm1184_vm1, %v7898_v3, %v7864_v44  ;;  %v8348_v16 = vmul.f32 %v8196_v37, %v3085_v38  ;;  %v8352_v44 = vrot.slane %v8246_v35, %v9766_v55 }
 0x52f   :  { %v8332_v25 = vpop.permute.xlu1 %3589  ;;  %v3218_v9 = vmul.f32 %v3200_v59, %v3184_v31  ;;  %v8355_v19 = vmul.f32 %v8237_v11, %v3603_v42  ;;  %v8358_v3 = vmul.f32 %v8200_v62, %v3607_v4  ;;  %v3217_v18 = vmul.f32 %v8193_v47, %v3188_v57 }
 0x530   :  { %9776 = vst [vmem:[#allocation115_spill] sm:$0xff] %v8332_v25  ;;  %v3048_v32 = vpop.permute.xlu0 %3047  ;;  %3846 = vmatpush1.msra.mxu0 %v3225_v10  ;;  %v8368_v55 = vmul.f32 %v8203_v22, %v3179_v5  ;;  %v8376_v42 = vmul.f32 %v8240_v7, %v2979_v33  ;;  %v8379_v21 = vmul.f32 %v8249_v30, %v3175_v46 }
 0x531   :  { %3847 = vmatprep.subr.mxu0 %v3222_v45  ;;  %v3084_v38 = vsel %vm1080_vm2, %v3048_v32, %v8281_v2  ;;  %v8371_v45 = vmul.f32 %v8206_v52, %v2983_v0  ;;  %v3073_v47 = vsel %vm1080_vm2, %v7914_v49, %v7882_v8  ;;  %v3077_v0 = vsel %vm1080_vm2, %v7872_v14, %v7914_v49 }
 0x532   :  { %3848 = vmatpush1.msra.mxu0 %v3221_v40  ;;  %v2881_v31 = vsel %vm873_vm6, %v7920_v41, %v7906_v51  ;;  %v3605_v8 = vsel %vm1616_vm3, %v8104_v13, %v8102_v61  ;;  %v3124_v4 = vmul.f32 %v8223_v27, %v3084_v38  ;;  %v3609_v33 = vsel %vm1616_vm3, %v8110_v23, %v8104_v13  ;;  %v9778_v38 = vld [vmem:[#allocation57_spill] sm:$0xff]  ;;  %v9787_v23 = vld [vmem:[#allocation59_spill] sm:$0xff] }
 0x533   :  { %3849 = vmatprep.subr.mxu0 %v3218_v9  ;;  %v8373_v59 = vpop.permute.xlu1 %3573  ;;  %v2877_v9 = vsel %vm873_vm6, %v7906_v51, %v7912_v20  ;;  %v2975_v51 = vsel %vm976_vm4, %v7896_v29, %v7922_v53  ;;  %v8419_v5 = vmul.f32 %v8209_v50, %v3077_v0  ;;  %v8431_v13 = vmul.f32 %v8266_v26, %v3073_v47  ;;  %v9779_v47 = vld [vmem:[#allocation24_spill] sm:$0xff] }
 0x534   :  { %9777 = vst [vmem:[#allocation116_spill] sm:$0xff] %v8373_v59  ;;  %v3582_v10 = vpop.permute.xlu0 %3581  ;;  %3850 = vmatpush1.msra.mxu0 %v3217_v18  ;;  %v8428_v40 = vmul.f32 %v8252_v1, %v2877_v9  ;;  %v8438_v18 = vmul.f32 %v8215_v54, %v2881_v31  ;;  %v3608_v0 = vsel %vm1616_vm3, %v9778_v38, %v7986_v17  ;;  %v9784_v38 = vld [vmem:[#allocation54_spill] sm:$0xff] }
 0x535   :  { %v3606_v14 = vsel %vm1616_vm3, %v3582_v10, %v8332_v25  ;;  %v3610_v49 = vsel %vm1616_vm3, %v8373_v59, %v3582_v10  ;;  %3851 = vmatprep.subr.mxu0 %v3214_v56  ;;  %v3604_v56 = vsel %vm1616_vm3, %v7986_v17, %v7976_v28  ;;  %v3646_v10 = vmul.f32 %v8237_v11, %v3605_v8  ;;  %v9782_v17 = vld [vmem:[#allocation46_spill] sm:$0xff]  ;;  %v9783_v8 = vld [vmem:[#allocation45_spill] sm:$0xff] }
 0x536   :  { %v3650_v57 = vmul.f32 %v8237_v11, %v3606_v14  ;;  %v3649_v46 = vmul.f32 %v8200_v62, %v3610_v49  ;;  %3852 = vmatpush1.msra.mxu0 %v3213_v34  ;;  %v2971_v34 = vsel %vm976_vm4, %v7922_v53, %v7904_v39  ;;  %v9780_v14 = vld [vmem:[#allocation80_spill] sm:$0xff]  ;;  %v9781_v49 = vld [vmem:[#allocation83_spill] sm:$0xff]  ;;  %v3645_v53 = vmul.f32 %v8200_v62, %v3609_v33  ;;  %v9788_v25 = vld [vmem:[#allocation22_spill] sm:$0xff] }
 0x537   :  { %3853 = vmatprep.subr.mxu0 %v3124_v4  ;;  %v8425_v29 = vpop.permute.xlu1 %2953  ;;  %v8448_v4 = vmul.f32 %v9779_v47, %v2975_v51  ;;  %v3087_v39 = vsel %vm1080_vm2, %v9781_v49, %v9780_v14  ;;  %v9785_v51 = vld [vmem:[#allocation56_spill] sm:$0xff]  ;;  %v3642_v33 = vmul.f32 %v8237_v11, %v3604_v56  ;;  %v9786_v14 = vld [vmem:[#allocation47_spill] sm:$0xff]  ;;  %v3120_v35 = vmul.f32 %v8223_v27, %v9788_v25 }
 0x538   :  { %v8445_v9 = vpop.permute.xlu0 %3071  ;;  %3958 = vmatprep.subr.mxu1 %v3650_v57  ;;  %v3501_v57 = vsel %vm1512_vm7, %v9783_v8, %v9782_v17  ;;  %v3082_v28 = vsel %vm1080_vm2, %v9785_v51, %v9784_v38  ;;  %v3086_v59 = vsel %vm1080_vm2, %v9787_v23, %v9785_v51  ;;  %v9789_v11 = vld [vmem:[#allocation48_spill] sm:$0xff]  ;;  %v9791_v51 = vld [vmem:[#allocation109_spill] sm:$0xff] }
 0x539   :  { %v3088_v31 = vsel %vm1080_vm2, %v8445_v9, %v3048_v32  ;;  %3959 = vmatpush1.msra.mxu1 %v3649_v46  ;;  %v3505_v32 = vsel %vm1512_vm7, %v9786_v14, %v9783_v8  ;;  %v3641_v46 = vmul.f32 %v8200_v62, %v3608_v0  ;;  %v2869_v56 = vsel %vm873_vm6, %v9789_v11, %v7920_v41 }
 0x53a   :  { %v3123_v61 = vmul.f32 %v8196_v37, %v3088_v31  ;;  %3960 = vmatprep.subr.mxu1 %v3646_v10  ;;  %v2873_v62 = vsel %vm873_vm6, %v7912_v20, %v9789_v11  ;;  %v3119_v0 = vmul.f32 %v8196_v37, %v3087_v39  ;;  %v3116_v25 = vmul.f32 %v8223_v27, %v3082_v28  ;;  %v9792_v28 = vld [vmem:[#allocation107_spill] sm:$0xff]  ;;  %v9795_v39 = vld [vmem:[#allocation58_spill] sm:$0xff] }
 0x53b   :  { %3961 = vmatpush1.msra.mxu1 %v3645_v53  ;;  %v8479_v31 = vpop.permute.xlu1 %2969  ;;  %v8491_v53 = vld [vmem:[#allocation12 + $0x10] sm:$0xff]  ;;  %v8494_v8 = vmul.f32 %v8272_v48, %v3501_v57  ;;  %v8497_v41 = vmul.f32 %v8269_v15, %v2971_v34  ;;  %v8500_v14 = vmul.f32 %v9791_v51, %v3505_v32  ;;  %v3115_v20 = vmul.f32 %v8196_v37, %v3086_v59  ;;  %v9794_v37 = vld [vmem:[#allocation26_spill] sm:$0xff]  ;;  %v9796_v57 = vld [vmem:[#allocation61_spill] sm:$0xff] }
 0x53c   :  { %v2946_v10 = vpop.permute.xlu0 %2945  ;;  %3854 = vmatpush1.msra.mxu0 %v3123_v61  ;;  %3962 = vmatprep.subr.mxu1 %v3642_v33  ;;  %9790 = vst [vmem:[#allocation24_spill] sm:$0xff] %v8491_v53  ;;  %v8508_v27 = vmul.f32 %v9792_v28, %v2873_v62  ;;  %v8517_v59 = vmul.f32 %v9794_v37, %v2869_v56  ;;  %v9797_v33 = vld [vmem:[#allocation87_spill] sm:$0xff]  ;;  %v9799_v11 = vld [vmem:[#allocation86_spill] sm:$0xff] }
 0x53d   :  { %3855 = vmatprep.subr.mxu0 %v3120_v35  ;;  %3963 = vmatpush1.msra.mxu1 %v3641_v46  ;;  %v2982_v35 = vsel %vm976_vm4, %v2946_v10, %v8425_v29  ;;  %v2986_v61 = vsel %vm976_vm4, %v8479_v31, %v2946_v10  ;;  %v3177_v32 = vsel %vm1184_vm1, %v9797_v33, %v8080_v12  ;;  %v9798_v46 = vld [vmem:[#allocation84_spill] sm:$0xff]  ;;  %v9800_v10 = vld [vmem:[#allocation23_spill] sm:$0xff] }
 0x53e   :  { %3856 = vmatpush1.msra.mxu0 %v3119_v0  ;;  %3964 = vmatprep.subr.mxu1 %v8355_v19  ;;  %9793 = vst [vmem:[#allocation80_spill] sm:$0xff] %v8508_v27  ;;  %v2980_v19 = vsel %vm976_vm4, %v9796_v57, %v9795_v39  ;;  %v3022_v56 = vmul.f32 %v8240_v7, %v2982_v35 }
 0x53f   :  { %3857 = vmatprep.subr.mxu0 %v3116_v25  ;;  %3965 = vmatpush1.msra.mxu1 %v8358_v3  ;;  %v8514_v34 = vpop.permute.xlu1 %2851  ;;  %v2985_v3 = vsel %vm976_vm4, %v9799_v11, %v9798_v46  ;;  %v9801_v25 = vmov 0.0   ;;  %v3021_v46 = vmul.f32 %v8206_v52, %v2986_v61  ;;  %v3014_v27 = vmul.f32 %v8240_v7, %v2980_v19  ;;  %v9811_v19 = vld [vmem:[#allocation91_spill] sm:$0xff] }
 0x540   :  { %v3166_v62 = vpop.permute.xlu0 %3165  ;;  %3858 = vmatpush1.msra.mxu0 %v3115_v20  ;;  %4943 = vmatmul.mubr.msk.f32.vlgmr.msra.gmra.mxu1 %vm1852_vm5, %v8491_v53  ;;  %v3181_v20 = vsel %vm1184_vm1, %v8082_v24, %v9797_v33  ;;  %v9803_v53 = vld [vmem:[#allocation49_spill] sm:$0xff]  ;;  %v9805_v24 = vld [vmem:[#allocation63_spill] sm:$0xff] }
 0x541   :  { %v3178_v0 = vsel %vm1184_vm1, %v3166_v62, %v8294_v63  ;;  %v3182_v12 = vsel %vm1184_vm1, %v9800_v10, %v3166_v62  ;;  %3859 = vmatprep.subr.mxu0 %v8305_v43  ;;  %4004 = vmatprep.mubr.f32.mxu1 %v9801_v25  ;;  %v9802_v63 = vld [vmem:[#allocation50_spill] sm:$0xff]  ;;  %v9804_v62 = vld [vmem:[#allocation60_spill] sm:$0xff]  ;;  %v3176_v61 = vsel %vm1184_vm1, %v9805_v24, %v7970_v58  ;;  %v9806_v33 = vld [vmem:[#allocation85_spill] sm:$0xff] }
 0x542   :  { %v3227_v35 = vmul.f32 %v8203_v22, %v3182_v12  ;;  %v3228_v11 = vmul.f32 %v8249_v30, %v3178_v0  ;;  %3860 = vmatpush1.msra.mxu0 %v8348_v16  ;;  %v3399_v43 = vsel %vm1408_vm8, %v9803_v53, %v9802_v63  ;;  %v2984_v10 = vsel %vm976_vm4, %v9804_v62, %v9796_v57  ;;  %v9807_v12 = vld [vmem:[#allocation53_spill] sm:$0xff]  ;;  %v9808_v58 = vld [vmem:[#allocation51_spill] sm:$0xff] }
 0x543   :  { %v3018_v0 = vmul.f32 %v8240_v7, %v9806_v33  ;;  %3861 = vmatprep.subr.mxu0 %v3022_v56  ;;  %v8564_v16 = vpop.permute.xlu1 %2867  ;;  %v3180_v25 = vsel %vm1184_vm1, %v9807_v12, %v9805_v24  ;;  %v3224_v63 = vmul.f32 %v8249_v30, %v3177_v32  ;;  %v3017_v57 = vmul.f32 %v8206_v52, %v2985_v3 }
 0x544   :  { %v2844_v17 = vpop.permute.xlu0 %2843  ;;  %3862 = vmatpush1.msra.mxu0 %v3021_v46  ;;  %4023 = vmatprep.subr.mxu1 %v3228_v11  ;;  %v3403_v33 = vsel %vm1408_vm8, %v9808_v58, %v9803_v53  ;;  %v3223_v56 = vmul.f32 %v8203_v22, %v3181_v20  ;;  %v3013_v24 = vmul.f32 %v8206_v52, %v2984_v10  ;;  %v9809_v11 = vld [vmem:[#allocation62_spill] sm:$0xff]  ;;  %v9810_v53 = vld [vmem:[#allocation65_spill] sm:$0xff] }
 0x545   :  { %3863 = vmatprep.subr.mxu0 %v3018_v0  ;;  %4024 = vmatpush1.msra.mxu1 %v3227_v35  ;;  %v2880_v32 = vsel %vm873_vm6, %v2844_v17, %v8514_v34  ;;  %v3220_v3 = vmul.f32 %v8249_v30, %v3176_v61  ;;  %v3219_v46 = vmul.f32 %v8203_v22, %v3180_v25  ;;  %v9812_v30 = vld [vmem:[#allocation79_spill] sm:$0xff]  ;;  %v9813_v25 = vld [vmem:[#allocation88_spill] sm:$0xff] }
 0x546   :  { %3864 = vmatpush1.msra.mxu0 %v3017_v57  ;;  %4025 = vmatprep.subr.mxu1 %v3224_v63  ;;  %v2878_v20 = vsel %vm873_vm6, %v9810_v53, %v9809_v11  ;;  %v2884_v7 = vsel %vm873_vm6, %v8564_v16, %v2844_v17  ;;  %v3075_v35 = vsel %vm1080_vm2, %v9811_v19, %v9781_v49  ;;  %v9814_v63 = vld [vmem:[#allocation90_spill] sm:$0xff] }
 0x547   :  { %3865 = vmatprep.subr.mxu0 %v3014_v27  ;;  %4026 = vmatpush1.msra.mxu1 %v3223_v56  ;;  %v3480_v52 = vpop.permute.xlu1 %3479  ;;  %v3079_v22 = vsel %vm1080_vm2, %v9812_v30, %v9811_v19  ;;  %v2883_v10 = vsel %vm873_vm6, %v9814_v63, %v9813_v25  ;;  %v2920_v17 = vmul.f32 %v8252_v1, %v2880_v32  ;;  %v9815_v56 = vld [vmem:[#allocation64_spill] sm:$0xff]  ;;  %v9819_v30 = vld [vmem:[#allocation110_spill] sm:$0xff] }
 0x548   :  { %v3064_v61 = vpop.permute.xlu0 %3063  ;;  %3866 = vmatpush1.msra.mxu0 %v3013_v24  ;;  %4027 = vmatprep.subr.mxu1 %v3220_v3  ;;  %v2919_v0 = vmul.f32 %v8215_v54, %v2884_v7  ;;  %v9817_v24 = vld [vmem:[#allocation89_spill] sm:$0xff]  ;;  %v9818_v7 = vld [vmem:[#allocation112_spill] sm:$0xff]  ;;  %v8641_v25 = vmul.f32 %v9819_v30, %v3403_v33 }
 0x549   :  { %v3076_v27 = vsel %vm1080_vm2, %v3064_v61, %v8445_v9  ;;  %v3080_v49 = vsel %vm1080_vm2, %v8281_v2, %v3064_v61  ;;  %3867 = vmatprep.subr.mxu0 %v8376_v42  ;;  %4028 = vmatpush1.msra.mxu1 %v3219_v46  ;;  %v2882_v9 = vsel %vm873_vm6, %v9815_v56, %v9810_v53  ;;  %v9816_v2 = vld [vmem:[#allocation67_spill] sm:$0xff] }
 0x54a   :  { %v3125_v12 = vmul.f32 %v8209_v50, %v3080_v49  ;;  %v3126_v57 = vmul.f32 %v8266_v26, %v3076_v27  ;;  %3868 = vmatpush1.msra.mxu0 %v8371_v45  ;;  %4029 = vmatprep.subr.mxu1 %v8379_v21  ;;  %v3074_v42 = vsel %vm1080_vm2, %v9816_v2, %v9787_v23  ;;  %v9824_v27 = vld [vmem:[#allocation92_spill] sm:$0xff]  ;;  %v9825_v49 = vld [vmem:[#allocation95_spill] sm:$0xff] }
 0x54b   :  { %v2916_v32 = vmul.f32 %v8252_v1, %v9817_v24  ;;  %3869 = vmatprep.subr.mxu0 %v2920_v17  ;;  %4030 = vmatpush1.msra.mxu1 %v8368_v55  ;;  %v8627_v3 = vpop.permute.xlu1 %3471  ;;  %v3078_v45 = vsel %vm1080_vm2, %v9784_v38, %v9816_v2  ;;  %v3122_v21 = vmul.f32 %v8266_v26, %v3075_v35  ;;  %v9823_v17 = vld [vmem:[#allocation96_spill] sm:$0xff]  ;;  %v9827_v24 = vld [vmem:[#allocation70_spill] sm:$0xff] }
 0x54c   :  { %v2915_v46 = vmul.f32 %v8215_v54, %v2883_v10  ;;  %v2962_v53 = vpop.permute.xlu0 %2961  ;;  %3870 = vmatpush1.msra.mxu0 %v2919_v0  ;;  %4031 = vmatprep.subr.mxu1 %v3126_v57  ;;  %v3121_v23 = vmul.f32 %v8209_v50, %v3079_v22  ;;  %v2912_v55 = vmul.f32 %v8252_v1, %v2878_v20  ;;  %v9820_v10 = vld [vmem:[#allocation66_spill] sm:$0xff]  ;;  %v9821_v22 = vld [vmem:[#allocation68_spill] sm:$0xff] }
 0x54d   :  { %3871 = vmatprep.subr.mxu0 %v2916_v32  ;;  %4032 = vmatpush1.msra.mxu1 %v3125_v12  ;;  %v8638_v19 = vmul.f32 %v9818_v7, %v3399_v43  ;;  %v2911_v38 = vmul.f32 %v8215_v54, %v2882_v9  ;;  %v3118_v35 = vmul.f32 %v8266_v26, %v3074_v42  ;;  %v9822_v54 = vld [vmem:[#allocation69_spill] sm:$0xff]  ;;  %v9826_v9 = vld [vmem:[#allocation71_spill] sm:$0xff]  ;;  %v9828_v32 = vld [vmem:[#allocation72_spill] sm:$0xff] }
 0x54e   :  { %3872 = vmatpush1.msra.mxu0 %v2915_v46  ;;  %4033 = vmatprep.subr.mxu1 %v3122_v21  ;;  %v3117_v63 = vmul.f32 %v8209_v50, %v3078_v45  ;;  %v3506_v61 = vsel %vm1512_vm7, %v9821_v22, %v9820_v10  ;;  %v2974_v1 = vsel %vm976_vm4, %v2962_v53, %v8479_v31 }
 0x54f   :  { %3873 = vmatprep.subr.mxu0 %v2912_v55  ;;  %4034 = vmatpush1.msra.mxu1 %v3121_v23  ;;  %v3378_v43 = vpop.permute.xlu1 %3377  ;;  %v2972_v33 = vsel %vm976_vm4, %v9822_v54, %v9804_v62  ;;  %v2978_v50 = vsel %vm976_vm4, %v8425_v29, %v2962_v53  ;;  %v3508_v26 = vsel %vm1512_vm7, %v8627_v3, %v3480_v52  ;;  %v9830_v53 = vld [vmem:[#allocation73_spill] sm:$0xff]  ;;  %v9831_v23 = vld [vmem:[#allocation94_spill] sm:$0xff] }
 0x550   :  { %v8663_v20 = vpop.permute.xlu0 %3487  ;;  %3874 = vmatpush1.msra.mxu0 %v2911_v38  ;;  %4035 = vmatprep.subr.mxu1 %v3118_v35  ;;  %v2976_v31 = vsel %vm976_vm4, %v9795_v39, %v9822_v54  ;;  %v3503_v62 = vsel %vm1512_vm7, %v9824_v27, %v9823_v17  ;;  %v3507_v0 = vsel %vm1512_vm7, %v9825_v49, %v9824_v27  ;;  %v9832_v54 = vld [vmem:[#allocation75_spill] sm:$0xff] }
 0x551   :  { %v3504_v29 = vsel %vm1512_vm7, %v3480_v52, %v8663_v20  ;;  %3875 = vmatprep.subr.mxu0 %v8428_v40  ;;  %4036 = vmatpush1.msra.mxu1 %v3117_v63  ;;  %v3024_v12 = vmul.f32 %v8269_v15, %v2974_v1  ;;  %v3539_v57 = vmul.f32 %v9791_v51, %v3506_v61 }
 0x552   :  { %v3548_v39 = vmul.f32 %v8272_v48, %v3504_v29  ;;  %3876 = vmatpush1.msra.mxu0 %v8438_v18  ;;  %4037 = vmatprep.subr.mxu1 %v8431_v13  ;;  %v3502_v40 = vsel %vm1512_vm7, %v9820_v10, %v9826_v9  ;;  %v3023_v52 = vmul.f32 %v9779_v47, %v2978_v50  ;;  %v9829_v18 = vld [vmem:[#allocation93_spill] sm:$0xff] }
 0x553   :  { %v3547_v2 = vmul.f32 %v9791_v51, %v3508_v26  ;;  %4038 = vmatpush1.msra.mxu1 %v8419_v5  ;;  %v8693_v42 = vpop.permute.xlu1 %3369  ;;  %v3404_v13 = vsel %vm1408_vm8, %v9828_v32, %v9827_v24  ;;  %v3020_v45 = vmul.f32 %v8269_v15, %v9829_v18  ;;  %v3544_v21 = vmul.f32 %v8272_v48, %v3503_v62  ;;  %v9834_v50 = vld [vmem:[#allocation97_spill] sm:$0xff] }
 0x554   :  { %v2860_v46 = vpop.permute.xlu0 %2859  ;;  %3877 = vmatprep.subr.mxu0 %v3548_v39  ;;  %4039 = vmatprep.subr.mxu1 %v3024_v12  ;;  %v2874_v5 = vsel %vm873_vm6, %v9809_v11, %v9830_v53  ;;  %v3019_v55 = vmul.f32 %v9779_v47, %v9831_v23  ;;  %v3543_v38 = vmul.f32 %v9791_v51, %v3507_v0 }
 0x555   :  { %3878 = vmatpush2.msra.mxu0 %v3547_v2  ;;  %4040 = vmatpush1.msra.mxu1 %v3023_v52  ;;  %v3015_v35 = vmul.f32 %v9779_v47, %v2976_v31  ;;  %v3540_v63 = vmul.f32 %v8272_v48, %v3502_v40  ;;  %v3016_v10 = vmul.f32 %v8269_v15, %v2972_v33  ;;  %v9833_v33 = vld [vmem:[#allocation101_spill] sm:$0xff]  ;;  %v9835_v31 = vld [vmem:[#allocation100_spill] sm:$0xff] }
 0x556   :  { %3879 = vmatprep.subr.mxu0 %v3544_v21  ;;  %4041 = vmatprep.subr.mxu1 %v3020_v45  ;;  %v2870_v11 = vsel %vm873_vm6, %v9830_v53, %v9815_v56  ;;  %v3437_v61 = vmul.f32 %v9819_v30, %v3404_v13  ;;  %v2872_v51 = vsel %vm873_vm6, %v2860_v46, %v8564_v16  ;;  %v9837_v40 = vld [vmem:[#allocation77_spill] sm:$0xff]  ;;  %v9840_v45 = vld [vmem:[#allocation76_spill] sm:$0xff] }
 0x557   :  { %3880 = vmatpush2.msra.mxu0 %v3543_v38  ;;  %4042 = vmatpush1.msra.mxu1 %v3019_v55  ;;  %v8720_v47 = vpop.permute.xlu1 %3283  ;;  %v2913_v1 = vmul.f32 %v9792_v28, %v2874_v5  ;;  %v2876_v48 = vsel %vm873_vm6, %v8514_v34, %v2860_v46  ;;  %v3406_v15 = vsel %vm1408_vm8, %v8693_v42, %v3378_v43  ;;  %v9842_v46 = vld [vmem:[#allocation108_spill] sm:$0xff]  ;;  %v9844_v5 = vld [vmem:[#allocation103_spill] sm:$0xff] }
 0x558   :  { %v8729_v56 = vpop.permute.xlu0 %3385  ;;  %3881 = vmatprep.subr.mxu0 %v3540_v63  ;;  %4043 = vmatprep.subr.mxu1 %v3016_v10  ;;  %v3400_v16 = vsel %vm1408_vm8, %v9827_v24, %v9832_v54  ;;  %v3401_v26 = vsel %vm1408_vm8, %v9834_v50, %v9833_v33  ;;  %v3405_v27 = vsel %vm1408_vm8, %v9835_v31, %v9834_v50  ;;  %v9846_v10 = vld [vmem:[#allocation104_spill] sm:$0xff] }
 0x559   :  { %v3402_v34 = vsel %vm1408_vm8, %v3378_v43, %v8729_v56  ;;  %3882 = vmatpush2.msra.mxu0 %v3539_v57  ;;  %4044 = vmatpush1.msra.mxu1 %v3015_v35  ;;  %v2922_v62 = vmul.f32 %v9794_v37, %v2872_v51  ;;  %v2921_v0 = vmul.f32 %v9792_v28, %v2876_v48  ;;  %v9836_v57 = vld [vmem:[#allocation74_spill] sm:$0xff] }
 0x55a   :  { %v3446_v29 = vmul.f32 %v9818_v7, %v3402_v34  ;;  %3883 = vmatprep.subr.mxu0 %v8494_v8  ;;  %4045 = vmatprep.subr.mxu1 %v8497_v41  ;;  %v3445_v12 = vmul.f32 %v9819_v30, %v3406_v15  ;;  %v2914_v39 = vmul.f32 %v9794_v37, %v2870_v11  ;;  %v9838_v8 = vld [vmem:[#allocation98_spill] sm:$0xff] }
 0x55b   :  { %3884 = vmatpush2.msra.mxu0 %v8500_v14  ;;  %4046 = vmatpush1.msra.mxu1 %v8448_v4  ;;  %v8754_v43 = vpop.permute.xlu1 %3267  ;;  %v3298_v52 = vsel %vm1304_vm9, %v9837_v40, %v9836_v57  ;;  %v2918_v41 = vmul.f32 %v9794_v37, %v9838_v8  ;;  %v3442_v2 = vmul.f32 %v9818_v7, %v3401_v26  ;;  %v9839_v14 = vld [vmem:[#allocation99_spill] sm:$0xff]  ;;  %v9841_v37 = vld [vmem:[#allocation25_spill] sm:$0xff]  ;;  %v9845_v35 = vld [vmem:[#allocation106_spill] sm:$0xff] }
 0x55c   :  { %v3276_v24 = vpop.permute.xlu0 %3275  ;;  %3885 = vmatprep.subr.mxu0 %v3446_v29  ;;  %4047 = vmatprep.subr.mxu1 %v2922_v62  ;;  %v2917_v4 = vmul.f32 %v9792_v28, %v9839_v14  ;;  %v3441_v13 = vmul.f32 %v9819_v30, %v3405_v27  ;;  %v3438_v18 = vmul.f32 %v9818_v7, %v3400_v16  ;;  %v9843_v30 = vld [vmem:[#allocation102_spill] sm:$0xff]  ;;  %v9850_v62 = vld [vmem:[#allocation80_spill] sm:$0xff]  ;;  %v9853_v8 = vld [vmem:[#allocation47_spill] sm:$0xff] }
 0x55d   :  { %3886 = vmatpush2.msra.mxu0 %v3445_v12  ;;  %4048 = vmatpush1.msra.mxu1 %v2921_v0  ;;  %v3302_v21 = vsel %vm1304_vm9, %v9840_v45, %v9837_v40  ;;  %v8774_v53 = vrot.slane %v9842_v46, %v9841_v37  ;;  %v8778_v28 = vrot.slane %v9842_v46, %v9771_v36  ;;  %v9847_v26 = vld [vmem:[#allocation114_spill] sm:$0xff] }
 0x55e   :  { %3887 = vmatprep.subr.mxu0 %v3442_v2  ;;  %4049 = vmatprep.subr.mxu1 %v2918_v41  ;;  %v3299_v7 = vsel %vm1304_vm9, %v9844_v5, %v9843_v30  ;;  %v3300_v23 = vsel %vm1304_vm9, %v3276_v24, %v8720_v47  ;;  %v3336_v38 = vmul.f32 %v8352_v44, %v3298_v52  ;;  %v9852_v40 = vld [vmem:[#allocation46_spill] sm:$0xff] }
 0x55f   :  { %3888 = vmatpush2.msra.mxu0 %v3441_v13  ;;  %4050 = vmatpush1.msra.mxu1 %v2917_v4  ;;  %v8787_v55 = vpop.permute.xlu1 %3277  ;;  %v3499_v63 = vsel %vm1512_vm7, %v9823_v17, %v9845_v35  ;;  %v3303_v11 = vsel %vm1304_vm9, %v9846_v10, %v9844_v5  ;;  %v3304_v51 = vsel %vm1304_vm9, %v8754_v43, %v3276_v24 }
 0x560   :  { %v3496_v48 = vpop.permute.xlu0 %3495  ;;  %3889 = vmatprep.subr.mxu0 %v3438_v18  ;;  %4051 = vmatprep.subr.mxu1 %v2914_v39  ;;  %v3511_v15 = vsel %vm1512_vm7, %v9845_v35, %v9825_v49  ;;  %v3344_v50 = vmul.f32 %v8352_v44, %v3300_v23  ;;  %v9848_v49 = vld [vmem:[#allocation78_spill] sm:$0xff]  ;;  %v3545_v12 = vmul.f32 %v9847_v26, %v3499_v63  ;;  %v8868_v63 = vld [vmem:[#allocation14 + $0x68] sm:$0xff] }
 0x561   :  { %v3500_v17 = vsel %vm1512_vm7, %v8663_v20, %v3496_v48  ;;  %v3512_v16 = vsel %vm1512_vm7, %v3496_v48, %v8627_v3  ;;  %3890 = vmatpush2.msra.mxu0 %v3437_v61  ;;  %4052 = vmatpush1.msra.mxu1 %v2913_v1  ;;  %v3498_v20 = vsel %vm1512_vm7, %v9826_v9, %v9848_v49  ;;  %v9849_v61 = vld [vmem:[#allocation113_spill] sm:$0xff] }
 0x562   :  { %v3549_v34 = vmul.f32 %v9847_v26, %v3500_v17  ;;  %v3550_v27 = vmul.f32 %v8362_v6, %v3512_v16  ;;  %3891 = vmatprep.subr.mxu0 %v8638_v19  ;;  %4053 = vmatprep.subr.mxu1 %v8517_v59  ;;  %v3510_v3 = vsel %vm1512_vm7, %v9848_v49, %v9821_v22  ;;  %v9851_v22 = vld [vmem:[#allocation52_spill] sm:$0xff] }
 0x563   :  { %v3343_v1 = vmul.f32 %v9849_v61, %v3304_v51  ;;  %3892 = vmatpush2.msra.mxu0 %v8641_v25  ;;  %4054 = vmatpush1.msra.mxu1 %v9850_v62  ;;  %v8827_v29 = vpop.permute.xlu1 %3261  ;;  %v3340_v59 = vmul.f32 %v8352_v44, %v3299_v7  ;;  %v3546_v19 = vmul.f32 %v8362_v6, %v3511_v15 }
 0x564   :  { %v3339_v0 = vmul.f32 %v9849_v61, %v3303_v11  ;;  %v3490_v9 = vpop.permute.xlu0 %3489  ;;  %3893 = vmatprep.subr.mxu0 %v3344_v50  ;;  %4055 = vmatprep.subr.mxu1 %v3550_v27  ;;  %v3297_v25 = vsel %vm1304_vm9, %v9851_v22, %v8787_v55  ;;  %v3301_v39 = vsel %vm1304_vm9, %v8827_v29, %v9851_v22  ;;  %v9854_v11 = vld [vmem:[#allocation111_spill] sm:$0xff] }
 0x565   :  { %3894 = vmatpush2.msra.mxu0 %v3343_v1  ;;  %4056 = vmatpush2.msra.mxu1 %v3549_v34  ;;  %v3497_v52 = vsel %vm1512_vm7, %v9852_v40, %v3490_v9  ;;  %v3509_v41 = vsel %vm1512_vm7, %v3490_v9, %v9853_v8  ;;  %v3542_v2 = vmul.f32 %v8362_v6, %v3510_v3  ;;  %v8892_v34 = vld [vmem:[#allocation14 + $0x60] sm:$0xff]  ;;  %v8898_v27 = vld [vmem:[#allocation14 + $0x48] sm:$0xff] }
 0x566   :  { %3895 = vmatprep.subr.mxu0 %v3340_v59  ;;  %4057 = vmatprep.subr.mxu1 %v3546_v19  ;;  %v3335_v24 = vmul.f32 %v9849_v61, %v3302_v21  ;;  %v3541_v4 = vmul.f32 %v9847_v26, %v3498_v20  ;;  %v3332_v13 = vmul.f32 %v8352_v44, %v3297_v25  ;;  %v8902_v20 = vld [vmem:[#allocation14 + $0x40] sm:$0xff]  ;;  %v8914_v59 = vld [vmem:[#allocation14 + $0x28] sm:$0xff] }
 0x567   :  { %3896 = vmatpush2.msra.mxu0 %v3339_v0  ;;  %4058 = vmatpush2.msra.mxu1 %v3545_v12  ;;  %v3392_v14 = vpop.permute.xlu1 %3391  ;;  %v3331_v18 = vmul.f32 %v9849_v61, %v3301_v39  ;;  %v3537_v5 = vmul.f32 %v9847_v26, %v3497_v52  ;;  %v3538_v7 = vmul.f32 %v8362_v6, %v3509_v41  ;;  %v8928_v9 = vld [vmem:[#allocation14 + $0x8] sm:$0xff]  ;;  %v8939_v40 = vld [vmem:[#allocation14] sm:$0xff] }
 0x568   :  { %v3394_v46 = vpop.permute.xlu0 %3393  ;;  %3897 = vmatprep.subr.mxu0 %v3336_v38  ;;  %4059 = vmatprep.subr.mxu1 %v3542_v2  ;;  %v3409_v38 = vsel %vm1408_vm8, %v3392_v14, %v9835_v31  ;;  %v3397_v6 = vsel %vm1408_vm8, %v9833_v33, %v3392_v14  ;;  %v8873_v51 = vrot.slane %v9854_v11, %v9841_v37  ;;  %v8946_v41 = vld [vmem:[#allocation12 + $0x28] sm:$0xff] }
 0x569   :  { %v3398_v21 = vsel %vm1408_vm8, %v8729_v56, %v3394_v46  ;;  %v3410_v23 = vsel %vm1408_vm8, %v3394_v46, %v8693_v42  ;;  %3898 = vmatpush2.msra.mxu0 %v3335_v24  ;;  %4060 = vmatpush2.msra.mxu1 %v3541_v4  ;;  %v8877_v31 = vrot.slane %v9854_v11, %v9771_v36  ;;  %v9857_v46 = vmov 0.0   ;;  %v9861_v11 = vld [vmem:[#allocation81_spill] sm:$0xff] }
 0x56a   :  { %v3447_v44 = vmul.f32 %v8774_v53, %v3398_v21  ;;  %v3448_v35 = vmul.f32 %v8778_v28, %v3410_v23  ;;  %3899 = vmatprep.subr.mxu0 %v3332_v13  ;;  %4061 = vmatprep.subr.mxu1 %v3538_v7  ;;  %v3444_v48 = vmul.f32 %v8778_v28, %v3409_v38  ;;  %v8968_v13 = vld [vmem:[#allocation12 + $0x38] sm:$0xff]  ;;  %v9858_v7 = vld [vmem:[#allocation115_spill] sm:$0xff]  ;;  %v9859_v23 = vld [vmem:[#allocation116_spill] sm:$0xff] }
 0x56b   :  { %3900 = vmatpush2.msra.mxu0 %v3331_v18  ;;  %v3388_v56 = vpop.permute.xlu1 %3387  ;;  %4062 = vmatpush2.msra.mxu1 %v3537_v5  ;;  %v3443_v16 = vmul.f32 %v8774_v53, %v3397_v6  ;;  %v8972_v5 = vld [vmem:[#allocation12 + $0x40] sm:$0xff] }
 0x56c   :  { %v3390_v42 = vpop.permute.xlu0 %3389  ;;  %3901 = vmatprep.subr.mxu0 %v8868_v63  ;;  %4063 = vmatprep.subr.mxu1 %v3448_v35  ;;  %v3407_v17 = vsel %vm1408_vm8, %v3388_v56, %v9808_v58  ;;  %v9860_v6 = vld [vmem:[#allocation82_spill] sm:$0xff] }
 0x56d   :  { %v3396_v33 = vsel %vm1408_vm8, %v9832_v54, %v3390_v42  ;;  %v3408_v15 = vsel %vm1408_vm8, %v3390_v42, %v9828_v32  ;;  %3902 = vmatpush2.msra.mxu0 %v8892_v34  ;;  %4064 = vmatpush2.msra.mxu1 %v3447_v44  ;;  %v9855_v54 = vld [vmem:[#allocation50_spill] sm:$0xff]  ;;  %v3436_v49 = vmul.f32 %v8778_v28, %v3407_v17  ;;  %v3675_v42 = vld [vmem:[#allocation12 + $0x30] sm:$0xff]  ;;  %v9863_v17 = vld [vmem:[#allocation57_spill] sm:$0xff] }
 0x56e   :  { %v3439_v50 = vmul.f32 %v8774_v53, %v3396_v33  ;;  %v3440_v26 = vmul.f32 %v8778_v28, %v3408_v15  ;;  %v3395_v32 = vsel %vm1408_vm8, %v9855_v54, %v3388_v56  ;;  %3903 = vmatprep.subr.mxu0 %v8898_v27  ;;  %4065 = vmatprep.subr.mxu1 %v3444_v48  ;;  %v9862_v33 = vld [vmem:[#allocation55_spill] sm:$0xff]  ;;  %v3679_v54 = vld [vmem:[#allocation12 + $0x50] sm:$0xff] }
 0x56f   :  { %v3290_v58 = vpop.permute.xlu1 %3289  ;;  %3904 = vmatpush2.msra.mxu0 %v8902_v20  ;;  %4066 = vmatpush2.msra.mxu1 %v3443_v16  ;;  %v3435_v19 = vmul.f32 %v8774_v53, %v3395_v32  ;;  %v9856_v53 = vld [vmem:[#allocation105_spill] sm:$0xff]  ;;  %v9003_v32 = vld [vmem:[#allocation14 + $0x70] sm:$0xff] }
 0x570   :  { %v3292_v3 = vpop.permute.xlu0 %3291  ;;  %v3295_v61 = vsel %vm1304_vm9, %v9843_v30, %v3290_v58  ;;  %3905 = vmatprep.subr.mxu0 %v8914_v59  ;;  %4067 = vmatprep.subr.mxu1 %v3440_v26  ;;  %v3307_v28 = vsel %vm1304_vm9, %v3290_v58, %v9846_v10  ;;  %v8931_v10 = vld [vmem:[#allocation12 + $0x20] sm:$0xff]  ;;  %v8935_v22 = vrot.slane %v9856_v53, %v9841_v37 }
 0x571   :  { %v3296_v1 = vsel %vm1304_vm9, %v8720_v47, %v3292_v3  ;;  %v3308_v62 = vsel %vm1304_vm9, %v3292_v3, %v8754_v43  ;;  %v8923_v47 = vld [vmem:[#allocation14 + $0x20] sm:$0xff]  ;;  %4068 = vmatpush2.msra.mxu1 %v3439_v50  ;;  %v3341_v25 = vmul.f32 %v8873_v51, %v3295_v61  ;;  %v3342_v39 = vmul.f32 %v8877_v31, %v3307_v28  ;;  %v9000_v50 = vld [vmem:[#allocation14 + $0x78] sm:$0xff]  ;;  %v3678_v61 = vld [vmem:[#allocation12 + $0x48] sm:$0xff] }
 0x572   :  { %v3345_v30 = vmul.f32 %v8873_v51, %v3296_v1  ;;  %v3346_v0 = vmul.f32 %v8877_v31, %v3308_v62  ;;  %3906 = vmatpush2.msra.mxu0 %v8923_v47  ;;  %v8926_v43 = vld [vmem:[#allocation12] sm:$0xff]  ;;  %4069 = vmatprep.subr.mxu1 %v3436_v49  ;;  %v8944_v8 = vrot.slane %v9856_v53, %v9771_v36  ;;  %v9008_v3 = vld [vmem:[#allocation14 + $0x58] sm:$0xff]  ;;  %v9864_v28 = vld [vmem:[#allocation44_spill] sm:$0xff] }
 0x573   :  { %3907 = vmatprep.subr.mxu0 %v8928_v9  ;;  %v3286_v12 = vpop.permute.xlu1 %3285  ;;  %4070 = vmatpush2.msra.mxu1 %v3435_v19  ;;  %v3680_v1 = vld [vmem:[#allocation12 + $0x58] sm:$0xff] }
 0x574   :  { %3908 = vmatpush2.msra.mxu0 %v8939_v40  ;;  %v3288_v52 = vpop.permute.xlu0 %3287  ;;  %4071 = vmatprep.subr.mxu1 %v3346_v0  ;;  %v3293_v24 = vsel %vm1304_vm9, %v8787_v55, %v3286_v12  ;;  %v3305_v4 = vsel %vm1304_vm9, %v3286_v12, %v8827_v29  ;;  %v9865_v0 = vld [vmem:[#allocation43_spill] sm:$0xff] }
 0x575   :  { %v3294_v37 = vsel %vm1304_vm9, %v9836_v57, %v3288_v52  ;;  %v3306_v2 = vsel %vm1304_vm9, %v3288_v52, %v9840_v45  ;;  %3910 = vmatmul.mubr.f32.vlgmr.msra.gmra.mxu0 %v8926_v43  ;;  %4072 = vmatpush2.msra.mxu1 %v3345_v30  ;;  %v8964_v57 = vld [vmem:[#allocation12 + $0x18] sm:$0xff]  ;;  %v3333_v55 = vmul.f32 %v8873_v51, %v3293_v24  ;;  %v9016_v30 = vld [vmem:[#allocation14 + $0x50] sm:$0xff] }
 0x576   :  { %v3337_v36 = vmul.f32 %v8873_v51, %v3294_v37  ;;  %v3338_v14 = vmul.f32 %v8877_v31, %v3306_v2  ;;  %3915 = vmatprep.mubr.f32.mxu0 %v8931_v10  ;;  %4073 = vmatprep.subr.mxu1 %v3342_v39  ;;  %v3334_v29 = vmul.f32 %v8877_v31, %v3305_v4  ;;  %v9027_v39 = vld [vmem:[#allocation14 + $0x30] sm:$0xff]  ;;  %v9031_v37 = vld [vmem:[#allocation14 + $0x18] sm:$0xff] }
 0x577   :  { %4944 = vmatmul.mubr.msk.f32.gmra.mxu1 %vm1852_vm5, %v8946_v41  ;;  %v3596_v45 = vpop.permute.xlu1 %3595  ;;  %v9866_v2 = vld [vmem:[#allocation24_spill] sm:$0xff] }
 0x578   :  { %4074 = vmatpush2.msra.mxu1 %v3341_v25  ;;  %v3598_v18 = vpop.permute.xlu0 %3597  ;;  %4010 = vmatprep.mubr.f32.mxu1 %v9857_v46  ;;  %v3613_v56 = vsel %vm1616_vm3, %v3596_v45, %v9860_v6  ;;  %v3601_v51 = vsel %vm1616_vm3, %v9861_v11, %v3596_v45  ;;  %v9024_v25 = vld [vmem:[#allocation14 + $0x38] sm:$0xff] }
 0x579   :  { %v3602_v21 = vsel %vm1616_vm3, %v9858_v7, %v3598_v18  ;;  %v3614_v44 = vsel %vm1616_vm3, %v3598_v18, %v9859_v23  ;;  %3916 = vmatmul.mubr.f32.gmra.mxu0 %v8964_v57  ;;  %4075 = vmatprep.subr.mxu1 %v3338_v14  ;;  %v3648_v48 = vmul.f32 %v8944_v8, %v3613_v56 }
 0x57a   :  { %v3651_v35 = vmul.f32 %v8935_v22, %v3602_v21  ;;  %v3652_v38 = vmul.f32 %v8944_v8, %v3614_v44  ;;  %4076 = vmatpush2.msra.mxu1 %v3337_v36  ;;  %3921 = vmatprep.mubr.f32.mxu0 %v8968_v13  ;;  %v3647_v58 = vmul.f32 %v8935_v22, %v3601_v51 }
 0x57b   :  { %4077 = vmatprep.subr.mxu1 %v3334_v29  ;;  %4945 = vmatmul.mubr.msk.f32.gmra.mxu1 %vm1852_vm5, %v8972_v5  ;;  %v3592_v26 = vpop.permute.xlu1 %3591 }
 0x57c   :  { %4078 = vmatpush2.msra.mxu1 %v3333_v55  ;;  %v3594_v31 = vpop.permute.xlu0 %3593  ;;  %4136 = vmatprep.subr.mxu0 %v3652_v38  ;;  %v3611_v19 = vsel %vm1616_vm3, %v3592_v26, %v9864_v28  ;;  %v3599_v12 = vsel %vm1616_vm3, %v9865_v0, %v3592_v26 }
 0x57d   :  { %v3600_v15 = vsel %vm1616_vm3, %v9862_v33, %v3594_v31  ;;  %v3612_v16 = vsel %vm1616_vm3, %v3594_v31, %v9863_v17  ;;  %3922 = vmatmul.mubr.f32.gmra.mxu0 %v3675_v42  ;;  %4079 = vmatprep.subr.mxu1 %v9000_v50  ;;  %v3640_v53 = vmul.f32 %v8944_v8, %v3611_v19 }
 0x57e   :  { %4080 = vmatpush2.msra.mxu1 %v9003_v32  ;;  %4137 = vmatpush1.msra.mxu0 %v3651_v35  ;;  %v3644_v49 = vmul.f32 %v8944_v8, %v3612_v16  ;;  %v3643_v62 = vmul.f32 %v8935_v22, %v3600_v15  ;;  %v3639_v52 = vmul.f32 %v8935_v22, %v3599_v12  ;;  %v5427_v8 = vld [vmem:[#allocation12 + $0x8] sm:$0xff] }
 0x57f   :  { %4081 = vmatprep.subr.mxu1 %v9008_v3  ;;  %4138 = vmatprep.subr.mxu0 %v3648_v48 }
 0x580   :  { %3927 = vmatprep.mubr.f32.mxu0 %v3679_v54  ;;  %4016 = vmatprep.mubr.f32.mxu1 %v9857_v46 }
 0x581   :  { %4082 = vmatpush2.msra.mxu1 %v9016_v30  ;;  %4139 = vmatpush1.msra.mxu0 %v3647_v58 }
 0x582   :  { %3928 = vmatmul.mubr.f32.gmra.mxu0 %v3678_v61  ;;  %4946 = vmatmul.mubr.msk.f32.gmra.mxu1 %vm1852_vm5, %v3680_v1 }
 0x583   :  { %4083 = vmatprep.subr.mxu1 %v9024_v25  ;;  %4140 = vmatprep.subr.mxu0 %v3644_v49 }
 0x584   :  { %4084 = vmatpush2.msra.mxu1 %v9027_v39  ;;  %4141 = vmatpush1.msra.mxu0 %v3643_v62 }
 0x585   :  { %4085 = vmatprep.subr.mxu1 %v9031_v37  ;;  %4142 = vmatprep.subr.mxu0 %v3640_v53 }
 0x586   :  { %4086 = vmatpush2.msra.mxu1 %v9034_v60  ;;  %4087 = vmatprep.mubr.f32.mxu1 %v5427_v8 }
 0x587   :  { %4143 = vmatpush1.msra.mxu0 %v3639_v52  ;;  %4176 = vmatprep.mubr.f32.mxu0 %v9857_v46 }
 0x588   :  { %4088 = vmatmul.mubr.f32.vlgmr.msra.gmra.mxu1 %v8926_v43  ;;  %4947 = vmatmul.mubr.msk.f32.vlgmr.msra.gmra.mxu0 %vm1852_vm5, %v9866_v2 }
 0x589   :  { %4093 = vmatprep.mubr.f32.mxu1 %v8931_v10  ;;  %4182 = vmatprep.mubr.f32.mxu0 %v9857_v46 }
 0x58c   :  { %4094 = vmatmul.mubr.f32.gmra.mxu1 %v8964_v57  ;;  %4948 = vmatmul.mubr.msk.f32.gmra.mxu0 %vm1852_vm5, %v8946_v41 }
 0x58d   :  { %4099 = vmatprep.mubr.f32.mxu1 %v8968_v13  ;;  %4188 = vmatprep.mubr.f32.mxu0 %v9857_v46 }
 0x590   :  { %4100 = vmatmul.mubr.f32.gmra.mxu1 %v3675_v42  ;;  %4949 = vmatmul.mubr.msk.f32.gmra.mxu0 %vm1852_vm5, %v8972_v5 }
 0x591   :  { %4105 = vmatprep.mubr.f32.mxu1 %v3679_v54  ;;  %4194 = vmatprep.mubr.f32.mxu0 %v9857_v46 }
 0x594   :  { %4106 = vmatmul.mubr.f32.gmra.mxu1 %v3678_v61  ;;  %4950 = vmatmul.mubr.msk.f32.gmra.mxu0 %vm1852_vm5, %v3680_v1 }
 0x600   :  { %v4000_v43 = vpop.f32.mrf.mxu1 }
 0x602   :  { %v4002_v10 = vpop.f32.mrf.mxu1 }
 0x635   :  { %v3911_v22 = vpop.f32.mrf.mxu0 }
 0x636   :  { %v9054_v7 = vadd.f32 %v4000_v43, %v3911_v22 }
 0x637   :  { %v3913_v24 = vpop.f32.mrf.mxu0  ;;  %v4006_v36 = vpop.f32.mrf.mxu1 }
 0x638   :  { %v9052_v29 = vadd.f32 %v4002_v10, %v3913_v24  ;;  %v4225_v56 = vmul.f32 %v9054_v7, %v9054_v7 }
 0x639   :  { %v3917_v41 = vpop.f32.mrf.mxu0  ;;  %v4008_v14 = vpop.f32.mrf.mxu1 }
 0x63a   :  { %v4226_v44 = vmul.f32 %v9052_v29, %v9052_v29  ;;  %v9060_v35 = vadd.f32 %v4006_v36, %v3917_v41  ;;  %v4201_v42 = vadd.f32 %v9052_v29, %v9054_v7 }
 0x63b   :  { %v3919_v4 = vpop.f32.mrf.mxu0  ;;  %v4012_v57 = vpop.f32.mrf.mxu1 }
 0x63c   :  { %v9056_v21 = vadd.f32 %v4008_v14, %v3919_v4  ;;  %v4241_v15 = vadd.f32 %v4226_v44, %v4225_v56  ;;  %v4229_v54 = vmul.f32 %v9060_v35, %v9060_v35 }
 0x63d   :  { %v3923_v45 = vpop.f32.mrf.mxu0  ;;  %v4014_v13 = vpop.f32.mrf.mxu1 }
 0x63e   :  { %v4230_v51 = vmul.f32 %v9056_v21, %v9056_v21  ;;  %v4206_v58 = vadd.f32 %v9056_v21, %v9060_v35  ;;  %v9081_v49 = vadd.f32 %v4012_v57, %v3923_v45 }
 0x63f   :  { %v3925_v55 = vpop.f32.mrf.mxu0 }
 0x640   :  { %v9070_v31 = vadd.f32 %v4014_v13, %v3925_v55  ;;  %v4246_v12 = vadd.f32 %v4230_v51, %v4229_v54  ;;  %v4233_v24 = vmul.f32 %v9081_v49, %v9081_v49 }
 0x642   :  { %v3929_v18 = vpop.f32.mrf.mxu0  ;;  %v4018_v5 = vpop.f32.mrf.mxu1  ;;  %v4234_v53 = vmul.f32 %v9070_v31, %v9070_v31  ;;  %v4211_v4 = vadd.f32 %v9070_v31, %v9081_v49 }
 0x643   :  { %v9105_v44 = vadd.f32 %v4018_v5, %v3929_v18 }
 0x644   :  { %v3931_v46 = vpop.f32.mrf.mxu0  ;;  %v4020_v23 = vpop.f32.mrf.mxu1  ;;  %v4251_v55 = vadd.f32 %v4234_v53, %v4233_v24  ;;  %v4372_v24 = vld [vmem:[%s9557_s14 + $0x18] sm:$0xff] }
 0x645   :  { %v9097_v36 = vadd.f32 %v4020_v23, %v3931_v46  ;;  %v4237_v54 = vmul.f32 %v9105_v44, %v9105_v44 }
 0x648   :  { %v4089_v38 = vpop.f32.mrf.mxu1  ;;  %v4178_v6 = vpop.f32.mrf.mxu0 }
 0x649   :  { %v9066_v11 = vadd.f32 %v4178_v6, %v4089_v38 }
 0x64a   :  { %v4091_v48 = vpop.f32.mrf.mxu1  ;;  %v4180_v33 = vpop.f32.mrf.mxu0 }
 0x64b   :  { %v4202_v17 = vadd.f32 %v4201_v42, %v9066_v11  ;;  %v4227_v16 = vmul.f32 %v9066_v11, %v9066_v11  ;;  %v9075_v26 = vadd.f32 %v4180_v33, %v4091_v48  ;;  %v4216_v48 = vadd.f32 %v9097_v36, %v9105_v44 }
 0x64c   :  { %v4095_v61 = vpop.f32.mrf.mxu1  ;;  %v4184_v1 = vpop.f32.mrf.mxu0  ;;  %v4238_v33 = vmul.f32 %v9097_v36, %v9097_v36 }
 0x64d   :  { %v4228_v62 = vmul.f32 %v9075_v26, %v9075_v26  ;;  %v9085_v28 = vadd.f32 %v4184_v1, %v4095_v61  ;;  %v4203_v19 = vadd.f32 %v4202_v17, %v9075_v26  ;;  %v4242_v0 = vadd.f32 %v4241_v15, %v4227_v16 }
 0x64e   :  { %v4097_v52 = vpop.f32.mrf.mxu1  ;;  %v4186_v8 = vpop.f32.mrf.mxu0  ;;  %v4256_v53 = vadd.f32 %v4238_v33, %v4237_v54 }
 0x64f   :  { %v4207_v2 = vadd.f32 %v4206_v58, %v9085_v28  ;;  %v4231_v43 = vmul.f32 %v9085_v28, %v9085_v28  ;;  %v9093_v10 = vadd.f32 %v4186_v8, %v4097_v52  ;;  %4204 = vadd.xlane.f32.xlu0 %v4203_v19  ;;  %v4243_v22 = vadd.f32 %v4242_v0, %v4228_v62 }
 0x650   :  { %v4101_v41 = vpop.f32.mrf.mxu1  ;;  %v4190_v14 = vpop.f32.mrf.mxu0 }
 0x651   :  { %v4232_v57 = vmul.f32 %v9093_v10, %v9093_v10  ;;  %v9103_v45 = vadd.f32 %v4190_v14, %v4101_v41  ;;  %4244 = vadd.xlane.f32.xlu1 %v4243_v22  ;;  %v4247_v13 = vadd.f32 %v4246_v12, %v4231_v43  ;;  %v4208_v46 = vadd.f32 %v4207_v2, %v9093_v10  ;;  %v4370_v22 = vld [vmem:[%s9557_s14 + $0x8] sm:$0xff]  ;;  %v4369_v14 = vld [vmem:[%s9557_s14] sm:$0xff] }
 0x652   :  { %v4103_v38 = vpop.f32.mrf.mxu1  ;;  %v4192_v6 = vpop.f32.mrf.mxu0  ;;  %v4410_v41 = vld [vmem:[%s9558_s15 + $0x8] sm:$0xff] }
 0x653   :  { %v4212_v23 = vadd.f32 %v4211_v4, %v9103_v45  ;;  %v4235_v56 = vmul.f32 %v9103_v45, %v9103_v45  ;;  %v9111_v42 = vadd.f32 %v4192_v6, %v4103_v38  ;;  %v4248_v51 = vadd.f32 %v4247_v13, %v4232_v57  ;;  %v4371_v4 = vld [vmem:[%s9557_s14 + $0x10] sm:$0xff]  ;;  %v4409_v57 = vld [vmem:[%s9558_s15] sm:$0xff] }
 0x654   :  { %v4107_v18 = vpop.f32.mrf.mxu1  ;;  %v4196_v5 = vpop.f32.mrf.mxu0 }
 0x655   :  { %v4236_v15 = vmul.f32 %v9111_v42, %v9111_v42  ;;  %v9119_v17 = vadd.f32 %v4196_v5, %v4107_v18  ;;  %4209 = vadd.xlane.f32.xlu1 %v4208_v46  ;;  %4249 = vadd.xlane.f32.xlu0 %v4248_v51  ;;  %v4252_v16 = vadd.f32 %v4251_v55, %v4235_v56 }
 0x656   :  { %v4109_v58 = vpop.f32.mrf.mxu1  ;;  %v4198_v61 = vpop.f32.mrf.mxu0  ;;  %v4213_v1 = vadd.f32 %v4212_v23, %v9111_v42 }
 0x657   :  { %v4217_v62 = vadd.f32 %v4216_v48, %v9119_v17  ;;  %v4239_v19 = vmul.f32 %v9119_v17, %v9119_v17  ;;  %v9127_v0 = vadd.f32 %v4198_v61, %v4109_v58  ;;  %v4253_v12 = vadd.f32 %v4252_v16, %v4236_v15 }
 0x659   :  { %4254 = vadd.xlane.f32.xlu1 %v4253_v12  ;;  %4214 = vadd.xlane.f32.xlu0 %v4213_v1  ;;  %v4240_v52 = vmul.f32 %v9127_v0, %v9127_v0  ;;  %v4218_v8 = vadd.f32 %v4217_v62, %v9127_v0  ;;  %v4257_v2 = vadd.f32 %v4256_v53, %v4239_v19 }
 0x65b   :  { %v4258_v43 = vadd.f32 %v4257_v2, %v4240_v52 }
 0x65d   :  { %4219 = vadd.xlane.f32.xlu0 %v4218_v8 }
 0x661   :  { %4259 = vadd.xlane.f32.xlu0 %v4258_v43 }
 0x66a   :  { %4380 = vperm.xlu1 %4974, %v4370_v22  }
 0x66e   :  { %4390 = vperm.xlu1 %4974, %v4372_v24  }
 0x672   :  { %4420 = vperm.xlu1 %4974, %v4410_v41  }
 0x677   :  { %4375 = vperm.xlu0 %4973, %v4369_v14  }
 0x67b   :  { %4385 = vperm.xlu0 %4973, %v4371_v4   ;;  %v3825_v4 = vld [vmem:[%s9551_s8] sm:$0xff] }
 0x67f   :  { %4415 = vperm.xlu0 %4973, %v4409_v57  }
 0x6d8   :  { %v4205_v13 = vpop.xlane.xlu0 %4204 }
 0x6d9   :  { %v4221_v55 = vmul.f32 0.001953125, %v4205_v13 }
 0x6da   :  { %v4245_v38 = vpop.xlane.xlu1 %4244 }
 0x6db   :  { %v4265_v6 = vmul.f32 %v4221_v55, %v4221_v55  ;;  %v4261_v46 = vmul.f32 0.001953125, %v4245_v38 }
 0x6dd   :  { %v4269_v23 = vsub.f32 %v4261_v46, %v4265_v6  ;;  %v3826_v46 = vld [vmem:[%s9551_s8 + $0x8] sm:$0xff] }
 0x6de   :  { %v4210_v56 = vpop.xlane.xlu1 %4209  ;;  %v4250_v51 = vpop.xlane.xlu0 %4249 }
 0x6df   :  { %v4273_v48 = vmax.f32 %v4269_v23, 0.0  ;;  %v4222_v33 = vmul.f32 0.001953125, %v4210_v56  ;;  %v4262_v15 = vmul.f32 0.001953125, %v4250_v51  ;;  %v3827_v56 = vld [vmem:[%s9551_s8 + $0x10] sm:$0xff] }
 0x6e1   :  { %v4277_v18 = vadd.f32 0.001, %v4273_v48  ;;  %v4266_v5 = vmul.f32 %v4222_v33, %v4222_v33 }
 0x6e2   :  { %v4255_v16 = vpop.xlane.xlu1 %4254  ;;  %v4215_v54 = vpop.xlane.xlu0 %4214 }
 0x6e3   :  { %5175 = vrsqrt.f32 %v4277_v18  ;;  %v4270_v58 = vsub.f32 %v4262_v15, %v4266_v5  ;;  %v4223_v61 = vmul.f32 0.001953125, %v4215_v54  ;;  %v4263_v62 = vmul.f32 0.001953125, %v4255_v16  ;;  %v3829_v18 = vld [vmem:[%s9552_s9] sm:$0xff]  ;;  %v3831_v54 = vld [vmem:[%s9552_s9 + $0x10] sm:$0xff] }
 0x6e5   :  { %v4274_v1 = vmax.f32 %v4270_v58, 0.0  ;;  %v4267_v19 = vmul.f32 %v4223_v61, %v4223_v61 }
 0x6e6   :  { %v4220_v12 = vpop.xlane.xlu0 %4219 }
 0x6e7   :  { %v4278_v53 = vadd.f32 0.001, %v4274_v1  ;;  %v4271_v52 = vsub.f32 %v4263_v62, %v4267_v19  ;;  %v4224_v8 = vmul.f32 0.001953125, %v4220_v12  ;;  %v3830_v1 = vld [vmem:[%s9552_s9 + $0x8] sm:$0xff]  ;;  %v3828_v12 = vld [vmem:[%s9551_s8 + $0x18] sm:$0xff] }
 0x6e9   :  { %5177 = vrsqrt.f32 %v4278_v53  ;;  %v4275_v2 = vmax.f32 %v4271_v52, 0.0  ;;  %v4268_v24 = vmul.f32 %v4224_v8, %v4224_v8  ;;  %v4411_v52 = vld [vmem:[%s9558_s15 + $0x10] sm:$0xff] }
 0x6ea   :  { %v4260_v43 = vpop.xlane.xlu0 %4259 }
 0x6eb   :  { %v4279_v22 = vadd.f32 0.001, %v4275_v2  ;;  %v4264_v41 = vmul.f32 0.001953125, %v4260_v43  ;;  %v352_v43 = vld [vmem:[%s9554_s11 + $0x20] sm:$0xff] }
 0x6ed   :  { %5179 = vrsqrt.f32 %v4279_v22  ;;  %v4272_v14 = vsub.f32 %v4264_v41, %v4268_v24  ;;  %v4412_v24 = vld [vmem:[%s9558_s15 + $0x18] sm:$0xff]  ;;  %v354_v41 = vld [vmem:[%s9554_s11 + $0x30] sm:$0xff] }
 0x6ef   :  { %v4276_v13 = vmax.f32 %v4272_v14, 0.0  ;;  %v355_v14 = vld [vmem:[%s9554_s11 + $0x38] sm:$0xff] }
 0x6f0   :  { %v5176_v57 = vpop.eup %5175 }
 0x6f1   :  { %v4285_v38 = vmul.f32 %v5176_v57, %v3825_v4  ;;  %v4280_v6 = vadd.f32 0.001, %v4276_v13  ;;  %v4381_v4 = vpop.permute.xlu1 %4380 }
 0x6f2   :  { %v4376_v57 = vpop.permute.xlu0 %4375 }
 0x6f3   :  { %4299 = vperm.xlu1 %4974, %v4285_v38   ;;  %5181 = vrsqrt.f32 %v4280_v6  ;;  %v4289_v48 = vmul.f32 %v4285_v38, %v4221_v55 }
 0x6f5   :  { %v4293_v58 = vsub.f32 %v3829_v18, %v4289_v48  ;;  %v9192_v13 = vpop.permute.xlu1 %4390  ;;  %v4398_v48 = vmul.f32 %v8914_v59, %v4381_v4  ;;  %v4399_v18 = vmul.f32 %v9027_v39, %v4381_v4 }
 0x6f6   :  { %v5178_v23 = vpop.eup %5177  ;;  %v9194_v38 = vpop.permute.xlu0 %4385 }
 0x6f7   :  { %v4286_v51 = vmul.f32 %v5178_v23, %v3826_v46 }
 0x6f9   :  { %4304 = vperm.xlu0 %4973, %v4286_v51   ;;  %v4290_v16 = vmul.f32 %v4286_v51, %v4222_v33  ;;  %v4421_v6 = vpop.permute.xlu1 %4420  ;;  %v4397_v51 = vmul.f32 %v8923_v47, %v4381_v4 }
 0x6fa   :  { %v5180_v5 = vpop.eup %5179  ;;  %v4416_v46 = vpop.permute.xlu0 %4415 }
 0x6fb   :  { %v4287_v15 = vmul.f32 %v5180_v5, %v3827_v56  ;;  %v4294_v19 = vsub.f32 %v3830_v1, %v4290_v16  ;;  %v4400_v5 = vmul.f32 %v9024_v25, %v4381_v4  ;;  %v4394_v16 = vmul.f32 %v8928_v9, %v4376_v57 }
 0x6fd   :  { %v4291_v62 = vmul.f32 %v4287_v15, %v4223_v61  ;;  %4309 = vperm.xlu1 %4974, %v4287_v15   ;;  %4335 = vperm.xlu0 %4973, %v4293_v58   ;;  %v3832_v61 = vld [vmem:[%s9552_s9 + $0x18] sm:$0xff]  ;;  %v4393_v15 = vmul.f32 %v8939_v40, %v4376_v57  ;;  %v4396_v58 = vmul.f32 %v9031_v37, %v4376_v57 }
 0x6ff   :  { %v4295_v55 = vsub.f32 %v3831_v54, %v4291_v62  ;;  %v4395_v54 = vmul.f32 %v9034_v60, %v4376_v57 }
 0x700   :  { %v5182_v53 = vpop.eup %5181 }
 0x701   :  { %4340 = vperm.xlu1 %4974, %v4294_v19   ;;  %4345 = vperm.xlu0 %4973, %v4295_v55   ;;  %v4288_v33 = vmul.f32 %v5182_v53, %v3828_v12  ;;  %v4433_v53 = vadd.f32 %v4416_v46, %v4393_v15 }
 0x703   :  { %v4292_v2 = vmul.f32 %v4288_v33, %v4224_v8  ;;  %v353_v8 = vld [vmem:[%s9554_s11 + $0x28] sm:$0xff]  ;;  %s5594_s11 = smov [#allocation14]  }
 0x704   :  { %s4889_s15 = sshll.u32 %s5594_s11, 4  ;;  %s4890_s15 = int_to_ptr.vmem [resolvable:$true] %s4889_s15 }
 0x705   :  { %4314 = vperm.xlu1 %4974, %v4288_v33   ;;  %4425 = vperm.xlu0 %4973, %v4411_v52   ;;  %v4296_v22 = vsub.f32 %v3832_v61, %v4292_v2  ;;  %v4434_v33 = vadd.f32 %v4416_v46, %v4394_v16  ;;  %v4435_v52 = vadd.f32 %v4416_v46, %v4395_v54  ;;  %s5524_s7 = scalar_lea.vmem %s4890_s15, 2048  ;;  %p5529_p7 = scmp.lt.s32.totalorder %s4890_s15, %s4890_s15 }
 0x706   :  { %v4436_v61 = vadd.f32 %v4416_v46, %v4396_v58  ;;  %v4438_v58 = vadd.f32 %v4421_v6, %v4398_v48  ;;  %p5525_p6 = scmp.ne.s32.totalorder %s4890_s15, %s5524_s7  ;;  %p5530_p8 = scmp.lt.s32.totalorder %s5524_s7, %s5524_s7 }
 0x708   :  { %p5531_p9 = por %p5530_p8, %p5529_p7 }
 0x709   :  { %4350 = vperm.xlu1 %4974, %v4296_v22   ;;  %378 = vperm.xlu0 %4973, %v352_v43  }
 0x70a   :  { %p5532_p10 = pnand %p5531_p9, %p5525_p6 }
 0x70d   :  { %4430 = vperm.xlu1 %4974, %v4412_v24   ;;  %388 = vperm.xlu0 %4973, %v354_v41  }
 0x711   :  { %383 = vperm.xlu1 %4974, %v353_v8  }
 0x715   :  { %393 = vperm.xlu1 %4974, %v355_v14  }
 0x76e   :  { %v4300_v23 = vpop.permute.xlu1 %4299 }
 0x76f   :  { %v4317_v1 = vmul.f32 %v4300_v23, %v9054_v7  ;;  %v4318_v62 = vmul.f32 %v4300_v23, %v9052_v29  ;;  %v4319_v55 = vmul.f32 %v4300_v23, %v9066_v11  ;;  %v4320_v19 = vmul.f32 %v4300_v23, %v9075_v26 }
 0x774   :  { %v4305_v56 = vpop.permute.xlu0 %4304 }
 0x775   :  { %v4321_v8 = vmul.f32 %v4305_v56, %v9060_v35  ;;  %v4322_v7 = vmul.f32 %v4305_v56, %v9056_v21  ;;  %v4323_v29 = vmul.f32 %v4305_v56, %v9085_v28  ;;  %v4324_v11 = vmul.f32 %v4305_v56, %v9093_v10 }
 0x776   :  { %v4437_v35 = vadd.f32 %v4421_v6, %v4397_v51  ;;  %v4439_v21 = vadd.f32 %v4421_v6, %v4399_v18 }
 0x778   :  { %v9208_v12 = vpop.permute.xlu1 %4309  ;;  %v4336_v2 = vpop.permute.xlu0 %4335 }
 0x779   :  { %v4353_v43 = vadd.f32 %v4336_v2, %v4317_v1  ;;  %v4354_v22 = vadd.f32 %v4336_v2, %v4318_v62  ;;  %v4355_v24 = vadd.f32 %v4336_v2, %v4319_v55  ;;  %v4356_v41 = vadd.f32 %v4336_v2, %v4320_v19 }
 0x77a   :  { %v4440_v1 = vadd.f32 %v4421_v6, %v4400_v5  ;;  %v4401_v5 = vmul.f32 %v8902_v20, %v9194_v38 }
 0x77b   :  { %v9214_v26 = vmul.f32 %v4433_v53, %v4353_v43  ;;  %v9216_v14 = vmul.f32 %v4434_v33, %v4354_v22  ;;  %v9218_v4 = vmul.f32 %v4435_v52, %v4355_v24  ;;  %v9220_v57 = vmul.f32 %v4436_v61, %v4356_v41 }
 0x77c   :  { %v4341_v46 = vpop.permute.xlu1 %4340  ;;  %v4346_v55 = vpop.permute.xlu0 %4345  ;;  %v4402_v43 = vmul.f32 %v8898_v27, %v9194_v38  ;;  %v4325_v41 = vmul.f32 %v9208_v12, %v9081_v49 }
 0x77d   :  { %v4357_v23 = vadd.f32 %v4341_v46, %v4321_v8  ;;  %v4358_v15 = vadd.f32 %v4341_v46, %v4322_v7  ;;  %v4359_v16 = vadd.f32 %v4341_v46, %v4323_v29  ;;  %v4360_v54 = vadd.f32 %v4341_v46, %v4324_v11 }
 0x77e   :  { %v4481_v28 = vmin.f32 %v9214_v26, 20.0  ;;  %v4482_v10 = vmin.f32 %v9216_v14, 20.0  ;;  %v4483_v56 = vmin.f32 %v9218_v4, 20.0  ;;  %v4484_v62 = vmin.f32 %v9220_v57, 20.0 }
 0x77f   :  { %v9226_v19 = vmul.f32 %v4437_v35, %v4357_v23  ;;  %v9228_v53 = vmul.f32 %v4438_v58, %v4358_v15  ;;  %v9230_v33 = vmul.f32 %v4439_v21, %v4359_v16  ;;  %v9232_v52 = vmul.f32 %v4440_v1, %v4360_v54 }
 0x780   :  { %v4497_v51 = vmul.f32 1.442695, %v4481_v28  ;;  %v4499_v48 = vmul.f32 1.442695, %v4482_v10  ;;  %v4501_v6 = vmul.f32 1.442695, %v4483_v56  ;;  %v4426_v29 = vpop.permute.xlu0 %4425  ;;  %v4326_v11 = vmul.f32 %v9208_v12, %v9070_v31  ;;  %v9250_v31 = vpop.permute.xlu1 %4314 }
 0x781   :  { %v4503_v18 = vmul.f32 1.442695, %v4484_v62  ;;  %v4485_v61 = vmin.f32 %v9226_v19, 20.0  ;;  %v4486_v2 = vmin.f32 %v9228_v53, 20.0  ;;  %v4487_v22 = vmin.f32 %v9230_v33, 20.0 }
 0x782   :  { %5183 = vpow2.f32 %v4497_v51  ;;  %v4488_v24 = vmin.f32 %v9232_v52, 20.0  ;;  %v4403_v15 = vmul.f32 %v9016_v30, %v9194_v38  ;;  %v4327_v16 = vmul.f32 %v9208_v12, %v9103_v45 }
 0x783   :  { %5185 = vpow2.f32 %v4499_v48  ;;  %v4505_v8 = vmul.f32 1.442695, %v4485_v61  ;;  %v4507_v7 = vmul.f32 1.442695, %v4486_v2  ;;  %v4509_v46 = vmul.f32 1.442695, %v4487_v22 }
 0x784   :  { %5187 = vpow2.f32 %v4501_v6  ;;  %v4511_v23 = vmul.f32 1.442695, %v4488_v24  ;;  %v4361_v54 = vadd.f32 %v4346_v55, %v4325_v41  ;;  %v4362_v49 = vadd.f32 %v4346_v55, %v4326_v11  ;;  %v379_v22 = vpop.permute.xlu0 %378  ;;  %v9265_v24 = vpop.permute.xlu1 %4350 }
 0x785   :  { %5189 = vpow2.f32 %v4503_v18  ;;  %v4441_v35 = vadd.f32 %v4426_v29, %v4401_v5  ;;  %v4442_v58 = vadd.f32 %v4426_v29, %v4402_v43  ;;  %v4363_v21 = vadd.f32 %v4346_v55, %v4327_v16 }
 0x786   :  { %5191 = vpow2.f32 %v4505_v8  ;;  %v4443_v1 = vadd.f32 %v4426_v29, %v4403_v15  ;;  %v4404_v56 = vmul.f32 %v9008_v3, %v9194_v38  ;;  %v4328_v48 = vmul.f32 %v9208_v12, %v9111_v42 }
 0x787   :  { %5193 = vpow2.f32 %v4507_v7  ;;  %v9252_v28 = vmul.f32 %v4441_v35, %v4361_v54  ;;  %v9254_v10 = vmul.f32 %v4442_v58, %v4362_v49 }
 0x788   :  { %5195 = vpow2.f32 %v4509_v46  ;;  %v9258_v45 = vmul.f32 %v4443_v1, %v4363_v21  ;;  %v4444_v6 = vadd.f32 %v4426_v29, %v4404_v56  ;;  %v4364_v2 = vadd.f32 %v4346_v55, %v4328_v48 }
 0x789   :  { %5197 = vpow2.f32 %v4511_v23  ;;  %v4489_v62 = vmin.f32 %v9252_v28, 20.0  ;;  %v4490_v51 = vmin.f32 %v9254_v10, 20.0 }
 0x78a   :  { %v4491_v18 = vmin.f32 %v9258_v45, 20.0 }
 0x78b   :  { %v4513_v5 = vmul.f32 1.442695, %v4489_v62  ;;  %v4515_v61 = vmul.f32 1.442695, %v4490_v51 }
 0x78c   :  { %v4517_v43 = vmul.f32 1.442695, %v4491_v18 }
 0x78d   :  { %5199 = vpow2.f32 %v4513_v5 }
 0x78f   :  { %v5184_v38 = vpop.eup %5183 }
 0x790   :  { %5535 = shalt.err (!%p5532_p10)
}
 0x791   :  { %s9867_s24 = smov 32   ;;  %s9868_s26 = smov 512   ;;  %v5186_v42 = vpop.eup %5185  ;;  %v4529_v12 = vadd.f32 1.0, %v5184_v38  ;;  %v9273_v55 = vmul.f32 %v4444_v6, %v4364_v2  ;;  %5201 = vpow2.f32 %v4515_v61  ;;  %v9869_v7 = vld [vmem:[#allocation30_spill] sm:$0xff]  ;;  %v9870_v23 = vld [vmem:[#allocation32_spill] sm:$0xff]  ;;  %v4405_v1 = vmul.f32 %v8892_v34, %v9192_v13  ;;  %v4431_v51 = vpop.permute.xlu1 %4430  ;;  %v9871_v18 = vld [vmem:[#allocation27_spill] sm:$0xff] }
 0x792   :  { %4895 = dma.vmem_to_hbm [thread:$0]  %s4890_s15, 2048, %s9559_s16, [#allocation8], %s9868_s26, %s9868_s26, %s9867_s24   ;;  %v5188_v41 = vpop.eup %5187  ;;  %v4530_v8 = vadd.f32 1.0, %v5186_v42  ;;  %5203 = vpow2.f32 %v4517_v43  ;;  %v512_v29 = vadd.f32 %v9869_v7, %v379_v22  ;;  %v514_v15 = vadd.f32 %v9870_v23, %v379_v22  ;;  %v9872_v38 = vld [vmem:[#allocation28_spill] sm:$0xff] }
 0x793   :  { %v5190_v11 = vpop.eup %5189  ;;  %v4531_v46 = vadd.f32 1.0, %v5188_v41  ;;  %5205 = vlog2.f32 %v4529_v12  ;;  %v4492_v58 = vmin.f32 %v9273_v55, 20.0  ;;  %v625_v5 = vadd.f32 %v9871_v18, %v379_v22  ;;  %s5595_s16 = smov [#allocation15]  }
 0x794   :  { %v5192_v16 = vpop.eup %5191  ;;  %v4532_v54 = vadd.f32 1.0, %v5190_v11  ;;  %5207 = vlog2.f32 %v4530_v8  ;;  %v663_v62 = vsub.f32 0.0, %v512_v29  ;;  %v664_v61 = vsub.f32 0.0, %v514_v15  ;;  %s4901_s25 = sshll.u32 %s5595_s16, 4  ;;  %s4902_s25 = int_to_ptr.vmem [resolvable:$true] %s4901_s25 }
 0x795   :  { %v5194_v49 = vpop.eup %5193  ;;  %5209 = vlog2.f32 %v4531_v46  ;;  %v4533_v35 = vadd.f32 1.0, %v5192_v16  ;;  %v4406_v2 = vmul.f32 %v8868_v63, %v9192_v13  ;;  %v627_v42 = vadd.f32 %v9872_v38, %v379_v22  ;;  %s5544_s5 = scalar_lea.vmem %s4902_s25, 2048  ;;  %p5549_p12 = scmp.lt.s32.totalorder %s4902_s25, %s4902_s25 }
 0x796   :  { %v5196_v21 = vpop.eup %5195  ;;  %5211 = vlog2.f32 %v4532_v54  ;;  %v4534_v56 = vadd.f32 1.0, %v5194_v49  ;;  %v4329_v12 = vmul.f32 %v9250_v31, %v9105_v44  ;;  %v4519_v41 = vmul.f32 1.442695, %v4492_v58  ;;  %p5545_p11 = scmp.ne.s32.totalorder %s4902_s25, %s5544_s5  ;;  %p5550_p13 = scmp.lt.s32.totalorder %s5544_s5, %s5544_s5 }
 0x797   :  { %v5198_v48 = vpop.eup %5197  ;;  %v4535_v6 = vadd.f32 1.0, %v5196_v21  ;;  %5213 = vlog2.f32 %v4533_v35  ;;  %v4445_v8 = vadd.f32 %v4431_v51, %v4405_v1  ;;  %v4407_v7 = vmul.f32 %v9003_v32, %v9192_v13 }
 0x798   :  { %v4536_v43 = vadd.f32 1.0, %v5198_v48  ;;  %5215 = vlog2.f32 %v4534_v56  ;;  %v4408_v29 = vmul.f32 %v9000_v50, %v9192_v13  ;;  %vm4465_vm1 = vcmp.gt.f32.partialorder %v9214_v26, 20.0  ;;  %p5551_p0 = por %p5550_p13, %p5549_p12 }
 0x799   :  { %5217 = vlog2.f32 %v4535_v6  ;;  %v711_v11 = vmul.f32 1.442695, %v663_v62  ;;  %vm4466_vm2 = vcmp.gt.f32.partialorder %v9216_v14, 20.0  ;;  %v4365_v46 = vadd.f32 %v9265_v24, %v4329_v12 }
 0x79a   :  { %v665_v22 = vsub.f32 0.0, %v625_v5  ;;  %v713_v23 = vmul.f32 1.442695, %v664_v61  ;;  %vm4467_vm3 = vcmp.gt.f32.partialorder %v9218_v4, 20.0  ;;  %5219 = vlog2.f32 %v4536_v43  ;;  %v5200_v16 = vpop.eup %5199  ;;  %p5552_p1 = pnand %p5551_p0, %p5545_p11 }
 0x79b   :  { %v4330_v44 = vmul.f32 %v9250_v31, %v9097_v36  ;;  %v666_v15 = vsub.f32 0.0, %v627_v42  ;;  %vm4468_vm4 = vcmp.gt.f32.partialorder %v9220_v57, 20.0  ;;  %v4331_v13 = vmul.f32 %v9250_v31, %v9119_v17 }
 0x79c   :  { %5221 = vpow2.f32 %v4519_v41  ;;  %v9299_v54 = vmul.f32 %v4445_v8, %v4365_v46  ;;  %v4332_v35 = vmul.f32 %v9250_v31, %v9127_v0  ;;  %v4537_v58 = vadd.f32 1.0, %v5200_v16 }
 0x79d   :  { %v4366_v21 = vadd.f32 %v9265_v24, %v4330_v44  ;;  %5223 = vpow2.f32 %v711_v11  ;;  %v715_v56 = vmul.f32 1.442695, %v665_v22  ;;  %v4446_v62 = vadd.f32 %v4431_v51, %v4406_v2 }
 0x79e   :  { %v5202_v49 = vpop.eup %5201  ;;  %5225 = vpow2.f32 %v713_v23  ;;  %v4367_v17 = vadd.f32 %v9265_v24, %v4331_v13  ;;  %v717_v18 = vmul.f32 1.442695, %v666_v15  ;;  %vm4469_vm5 = vcmp.gt.f32.partialorder %v9226_v19, 20.0 }
 0x79f   :  { %v5204_v1 = vpop.eup %5203  ;;  %v4538_v36 = vadd.f32 1.0, %v5202_v49  ;;  %5227 = vlog2.f32 %v4537_v58  ;;  %vm4470_vm6 = vcmp.gt.f32.partialorder %v9228_v53, 20.0  ;;  %v4447_v0 = vadd.f32 %v4431_v51, %v4407_v7 }
 0x7a0   :  { %v5206_v48 = vpop.eup %5205  ;;  %v4539_v6 = vadd.f32 1.0, %v5204_v1  ;;  %v4493_v31 = vmin.f32 %v9299_v54, 20.0  ;;  %vm4471_vm7 = vcmp.gt.f32.partialorder %v9230_v33, 20.0  ;;  %v4368_v2 = vadd.f32 %v9265_v24, %v4332_v35 }
 0x7a1   :  { %v5208_v5 = vpop.eup %5207  ;;  %v4546_v61 = vmul.f32 0.6931472, %v5206_v48  ;;  %5229 = vlog2.f32 %v4538_v36  ;;  %v4448_v42 = vadd.f32 %v4431_v51, %v4408_v29  ;;  %v9313_v11 = vmul.f32 %v4446_v62, %v4366_v21 }
 0x7a2   :  { %v5210_v43 = vpop.eup %5209  ;;  %v4548_v38 = vmul.f32 0.6931472, %v5208_v5  ;;  %5231 = vlog2.f32 %v4539_v6  ;;  %v9327_v29 = vmul.f32 %v4447_v0, %v4367_v17  ;;  %v4521_v44 = vmul.f32 1.442695, %v4493_v31  ;;  %v389_v31 = vpop.permute.xlu0 %388 }
 0x7a3   :  { %v5212_v12 = vpop.eup %5211  ;;  %v4550_v41 = vmul.f32 0.6931472, %v5210_v43  ;;  %v4577_v8 = vsel %vm4465_vm1, %v9214_v26, %v4546_v61  ;;  %5233 = vpow2.f32 %v715_v56  ;;  %v4494_v35 = vmin.f32 %v9313_v11, 20.0 }
 0x7a4   :  { %v5214_v7 = vpop.eup %5213  ;;  %v4552_v46 = vmul.f32 0.6931472, %v5212_v12  ;;  %v4578_v22 = vsel %vm4466_vm2, %v9216_v14, %v4548_v38  ;;  %v9319_v23 = vadd.f32 %v8939_v40, %v4577_v8  ;;  %5235 = vpow2.f32 %v717_v18 }
 0x7a5   :  { %v5216_v24 = vpop.eup %5215  ;;  %v4579_v51 = vsel %vm4467_vm3, %v9218_v4, %v4550_v41  ;;  %v9325_v26 = vadd.f32 %v8928_v9, %v4578_v22  ;;  %v4554_v13 = vmul.f32 0.6931472, %v5214_v7  ;;  %vm4472_vm8 = vcmp.gt.f32.partialorder %v9232_v52, 20.0 }
 0x7a6   :  { %v5218_v15 = vpop.eup %5217  ;;  %v4580_v14 = vsel %vm4468_vm4, %v9220_v57, %v4552_v46  ;;  %v9333_v40 = vadd.f32 %v9034_v60, %v4579_v51  ;;  %v4625_v16 = vmin.f32 %v9319_v23, 20.0  ;;  %v4556_v4 = vmul.f32 0.6931472, %v5216_v24 }
 0x7a7   :  { %v9337_v49 = vadd.f32 %v9031_v37, %v4580_v14  ;;  %v4626_v9 = vmin.f32 %v9325_v26, 20.0  ;;  %v4558_v57 = vmul.f32 0.6931472, %v5218_v15  ;;  %v9343_v1 = vmul.f32 %v4448_v42, %v4368_v2  ;;  %v5220_v60 = vpop.eup %5219 }
 0x7a8   :  { %v4627_v58 = vmin.f32 %v9333_v40, 20.0  ;;  %v4641_v21 = vmul.f32 1.442695, %v4625_v16  ;;  %vm4473_vm9 = vcmp.gt.f32.partialorder %v9252_v28, 20.0  ;;  %vm4474_vm14 = vcmp.gt.f32.partialorder %v9254_v10, 20.0 }
 0x7a9   :  { %v4628_v36 = vmin.f32 %v9337_v49, 20.0  ;;  %v4643_v56 = vmul.f32 1.442695, %v4626_v9  ;;  %v4495_v37 = vmin.f32 %v9327_v29, 20.0  ;;  %5237 = vpow2.f32 %v4521_v44  ;;  %v5222_v62 = vpop.eup %5221 }
 0x7aa   :  { %5239 = vpow2.f32 %v4641_v21  ;;  %v4645_v48 = vmul.f32 1.442695, %v4627_v58  ;;  %v4581_v6 = vsel %vm4469_vm5, %v9226_v19, %v4554_v13  ;;  %v4582_v17 = vsel %vm4470_vm6, %v9228_v53, %v4556_v4  ;;  %v5224_v18 = vpop.eup %5223 }
 0x7ab   :  { %5241 = vpow2.f32 %v4643_v56  ;;  %v4647_v5 = vmul.f32 1.442695, %v4628_v36  ;;  %v4583_v61 = vsel %vm4471_vm7, %v9230_v33, %v4558_v57  ;;  %v4523_v0 = vmul.f32 1.442695, %v4494_v35  ;;  %v5226_v43 = vpop.eup %5225 }
 0x7ac   :  { %5243 = vpow2.f32 %v4645_v48  ;;  %v9359_v38 = vadd.f32 %v8923_v47, %v4581_v6  ;;  %v9362_v19 = vadd.f32 %v8914_v59, %v4582_v17  ;;  %v9365_v2 = vadd.f32 %v9027_v39, %v4583_v61  ;;  %v5228_v53 = vpop.eup %5227  ;;  %v9873_v47 = vld [vmem:[#allocation38_spill] sm:$0xff] }
 0x7ad   :  { %5245 = vpow2.f32 %v4647_v5  ;;  %v4560_v42 = vmul.f32 0.6931472, %v5220_v60  ;;  %v4540_v12 = vadd.f32 1.0, %v5222_v62  ;;  %v4525_v41 = vmul.f32 1.442695, %v4495_v37  ;;  %v9874_v62 = vld [vmem:[#allocation40_spill] sm:$0xff] }
 0x7ae   :  { %v5230_v8 = vpop.eup %5229  ;;  %v4629_v33 = vmin.f32 %v9359_v38, 20.0  ;;  %vm4475_vm15 = vcmp.gt.f32.partialorder %v9258_v45, 20.0  ;;  %v4496_v7 = vmin.f32 %v9343_v1, 20.0  ;;  %v9371_v46 = vadd.f32 %v9873_v47, %v389_v31 }
 0x7af   :  { %v5232_v59 = vpop.eup %5231  ;;  %v4630_v22 = vmin.f32 %v9362_v19, 20.0  ;;  %v4631_v39 = vmin.f32 %v9365_v2, 20.0  ;;  %v759_v24 = vadd.f32 1.0, %v5224_v18  ;;  %5247 = vpow2.f32 %v4523_v0 }
 0x7b0   :  { %v5234_v51 = vpop.eup %5233  ;;  %v4649_v44 = vmul.f32 1.442695, %v4629_v33  ;;  %v4562_v15 = vmul.f32 0.6931472, %v5228_v53  ;;  %v4564_v14 = vmul.f32 0.6931472, %v5230_v8  ;;  %5249 = vlog2.f32 %v4540_v12 }
 0x7b1   :  { %v5236_v16 = vpop.eup %5235  ;;  %v4584_v13 = vsel %vm4472_vm8, %v9232_v52, %v4560_v42  ;;  %v4651_v9 = vmul.f32 1.442695, %v4630_v22  ;;  %v4653_v4 = vmul.f32 1.442695, %v4631_v39  ;;  %5251 = vpow2.f32 %v4525_v41 }
 0x7b2   :  { %5253 = vpow2.f32 %v4649_v44  ;;  %v4566_v35 = vmul.f32 0.6931472, %v5232_v59  ;;  %v4585_v58 = vsel %vm4473_vm9, %v9252_v28, %v4562_v15  ;;  %v4586_v21 = vsel %vm4474_vm14, %v9254_v10, %v4564_v14  ;;  %v384_v59 = vpop.permute.xlu1 %383  ;;  %v9877_v14 = vld [vmem:[#allocation34_spill] sm:$0xff] }
 0x7b3   :  { %5255 = vpow2.f32 %v4651_v9  ;;  %v9385_v57 = vadd.f32 %v8902_v20, %v4585_v58  ;;  %v9388_v60 = vadd.f32 %v8898_v27, %v4586_v21  ;;  %v760_v52 = vadd.f32 1.0, %v5226_v43  ;;  %v9875_v27 = vld [vmem:[#allocation33_spill] sm:$0xff]  ;;  %v9876_v43 = vld [vmem:[#allocation35_spill] sm:$0xff] }
 0x7b4   :  { %v4587_v36 = vsel %vm4475_vm15, %v9258_v45, %v4566_v35  ;;  %v761_v56 = vadd.f32 1.0, %v5234_v51  ;;  %v762_v37 = vadd.f32 1.0, %v5236_v16  ;;  %5257 = vrcp.f32 %v759_v24 }
 0x7b5   :  { %5259 = vpow2.f32 %v4653_v4  ;;  %v9394_v28 = vadd.f32 %v9016_v30, %v4587_v36  ;;  %v4527_v10 = vmul.f32 1.442695, %v4496_v7  ;;  %v526_v48 = vadd.f32 %v9874_v62, %v389_v31  ;;  %v9878_v36 = vld [vmem:[#allocation36_spill] sm:$0xff] }
 0x7b6   :  { %v5238_v20 = vpop.eup %5237  ;;  %v4633_v6 = vmin.f32 %v9385_v57, 20.0  ;;  %5261 = vrcp.f32 %v760_v52  ;;  %v637_v17 = vadd.f32 %v9875_v27, %v389_v31  ;;  %v9400_v5 = vadd.f32 %v9024_v25, %v4584_v13 }
 0x7b7   :  { %v5240_v18 = vpop.eup %5239  ;;  %v4634_v45 = vmin.f32 %v9388_v60, 20.0  ;;  %5263 = vrcp.f32 %v761_v56  ;;  %v4635_v30 = vmin.f32 %v9394_v28, 20.0  ;;  %v639_v53 = vadd.f32 %v9876_v43, %v389_v31 }
 0x7b8   :  { %v5242_v61 = vpop.eup %5241  ;;  %v4673_v0 = vadd.f32 1.0, %v5240_v18  ;;  %5265 = vrcp.f32 %v762_v37  ;;  %v671_v41 = vsub.f32 0.0, %v9371_v46  ;;  %v672_v8 = vsub.f32 0.0, %v526_v48 }
 0x7b9   :  { %v5244_v42 = vpop.eup %5243  ;;  %v4674_v12 = vadd.f32 1.0, %v5242_v61  ;;  %5267 = vpow2.f32 %v4527_v10  ;;  %v4657_v25 = vmul.f32 1.442695, %v4633_v6  ;;  %v673_v47 = vsub.f32 0.0, %v637_v17  ;;  %v9879_v17 = vld [vmem:[#allocation29_spill] sm:$0xff] }
 0x7ba   :  { %v5246_v33 = vpop.eup %5245  ;;  %v4675_v7 = vadd.f32 1.0, %v5244_v42  ;;  %5269 = vlog2.f32 %v4673_v0  ;;  %v4632_v39 = vmin.f32 %v9400_v5, 20.0  ;;  %v4659_v24 = vmul.f32 1.442695, %v4634_v45  ;;  %v9880_v0 = vld [vmem:[#allocation31_spill] sm:$0xff] }
 0x7bb   :  { %v4676_v22 = vadd.f32 1.0, %v5246_v33  ;;  %5271 = vlog2.f32 %v4674_v12  ;;  %v4661_v31 = vmul.f32 1.442695, %v4635_v30  ;;  %v674_v44 = vsub.f32 0.0, %v639_v53 }
 0x7bc   :  { %v5248_v51 = vpop.eup %5247  ;;  %5273 = vlog2.f32 %v4675_v7  ;;  %vm4476_vm0 = vcmp.gt.f32.partialorder %v9273_v55, 20.0  ;;  %v4541_v46 = vadd.f32 1.0, %v5238_v20  ;;  %v518_v16 = vadd.f32 %v9877_v14, %v384_v59  ;;  %v5428_v14 = vld [vmem:[#allocation9] sm:$0xff] }
 0x7bd   :  { %v5250_v15 = vpop.eup %5249  ;;  %5275 = vlog2.f32 %v4676_v22  ;;  %v9409_v4 = vmul.f32 1.442695, %v671_v41  ;;  %v9411_v35 = vmul.f32 1.442695, %v672_v8  ;;  %v4655_v21 = vmul.f32 1.442695, %v4632_v39 }
 0x7be   :  { %v5252_v13 = vpop.eup %5251  ;;  %v4568_v9 = vmul.f32 0.6931472, %v5250_v15  ;;  %5277 = vpow2.f32 %v4657_v25  ;;  %v9413_v52 = vmul.f32 1.442695, %v673_v47  ;;  %v520_v56 = vadd.f32 %v9878_v36, %v384_v59 }
 0x7bf   :  { %v5254_v58 = vpop.eup %5253  ;;  %5279 = vpow2.f32 %v4659_v24  ;;  %v9417_v48 = vmul.f32 1.442695, %v674_v44  ;;  %v9423_v18 = vadd.f32 %v9879_v17, %v384_v59  ;;  %vm4609_vm10 = vcmp.gt.f32.partialorder %v9319_v23, 20.0 }
 0x7c0   :  { %v5256_v37 = vpop.eup %5255  ;;  %v4677_v10 = vadd.f32 1.0, %v5254_v58  ;;  %v4588_v62 = vsel %vm4476_vm0, %v9273_v55, %v4568_v9  ;;  %5281 = vpow2.f32 %v4661_v31  ;;  %v4542_v61 = vadd.f32 1.0, %v5248_v51 }
 0x7c1   :  { %v5258_v20 = vpop.eup %5257  ;;  %v4678_v6 = vadd.f32 1.0, %v5256_v37  ;;  %v9420_v27 = vadd.f32 %v9008_v3, %v4588_v62  ;;  %5283 = vlog2.f32 %v4541_v46  ;;  %v9427_v30 = vadd.f32 %v9880_v0, %v384_v59  ;;  %v5430_v62 = vld [vmem:[#allocation9 + $0x10] sm:$0xff] }
 0x7c2   :  { %v5260_v45 = vpop.eup %5259  ;;  %v667_v55 = vsub.f32 0.0, %v518_v16  ;;  %vm4610_vm11 = vcmp.gt.f32.partialorder %v9325_v26, 20.0  ;;  %5285 = vpow2.f32 %v4655_v21  ;;  %v668_v3 = vsub.f32 0.0, %v520_v56  ;;  %v5429_v21 = vld [vmem:[#allocation9 + $0x8] sm:$0xff] }
 0x7c3   :  { %v5262_v43 = vpop.eup %5261  ;;  %v4636_v53 = vmin.f32 %v9420_v27, 20.0  ;;  %vm4611_vm12 = vcmp.gt.f32.partialorder %v9333_v40, 20.0  ;;  %5287 = vlog2.f32 %v4677_v10  ;;  %v4737_v12 = vsub.f32 1.0, %v5258_v20 }
 0x7c4   :  { %v5264_v42 = vpop.eup %5263  ;;  %v4543_v41 = vadd.f32 1.0, %v5252_v13  ;;  %vm4612_vm13 = vcmp.gt.f32.partialorder %v9337_v49, 20.0  ;;  %5289 = vlog2.f32 %v4678_v6  ;;  %v4738_v7 = vsub.f32 1.0, %v5262_v43 }
 0x7c5   :  { %v5266_v8 = vpop.eup %5265  ;;  %v4663_v33 = vmul.f32 1.442695, %v4636_v53  ;;  %v4739_v47 = vsub.f32 1.0, %v5264_v42  ;;  %5291 = vlog2.f32 %v4542_v61  ;;  %v669_v59 = vsub.f32 0.0, %v9423_v18 }
 0x7c6   :  { %v5268_v25 = vpop.eup %5267  ;;  %v670_v22 = vsub.f32 0.0, %v9427_v30  ;;  %v719_v51 = vmul.f32 1.442695, %v667_v55  ;;  %v9435_v31 = vmul.f32 1.442695, %v668_v3  ;;  %v4679_v46 = vadd.f32 1.0, %v5260_v45  ;;  %v9449_v3 = vpop.permute.xlu1 %393 }
 0x7c7   :  { %v5270_v39 = vpop.eup %5269  ;;  %5293 = vpow2.f32 %v4663_v33  ;;  %v4544_v24 = vadd.f32 1.0, %v5268_v25  ;;  %v4753_v16 = vmul.f32 %v5428_v14, %v4737_v12  ;;  %v4740_v58 = vsub.f32 1.0, %v5266_v8  ;;  %v5431_v33 = vld [vmem:[#allocation9 + $0x18] sm:$0xff] }
 0x7c8   :  { %v5272_v44 = vpop.eup %5271  ;;  %v4690_v15 = vmul.f32 0.6931472, %v5270_v39  ;;  %5295 = vlog2.f32 %v4543_v41  ;;  %v4754_v36 = vmul.f32 %v5429_v21, %v4738_v7  ;;  %v4755_v6 = vmul.f32 %v5430_v62, %v4739_v47  ;;  %v9881_v47 = vld [vmem:[#allocation41_spill] sm:$0xff] }
 0x7c9   :  { %v5274_v13 = vpop.eup %5273  ;;  %v4692_v9 = vmul.f32 0.6931472, %v5272_v44  ;;  %5297 = vlog2.f32 %v4544_v24  ;;  %v4756_v7 = vmul.f32 %v5431_v33, %v4740_v58  ;;  %v530_v39 = vadd.f32 %v9881_v47, %v9449_v3  ;;  %v9884_v33 = vld [vmem:[#allocation39_spill] sm:$0xff] }
 0x7ca   :  { %v5276_v56 = vpop.eup %5275  ;;  %v4694_v37 = vmul.f32 0.6931472, %v5274_v13  ;;  %v4721_v10 = vsel %vm4609_vm10, %v9319_v23, %v4690_v15  ;;  %5299 = vpow2.f32 %v9409_v4  ;;  %vm4477_vm1 = vcmp.gt.f32.partialorder %v9299_v54, 20.0 }
 0x7cb   :  { %v5278_v17 = vpop.eup %5277  ;;  %v4696_v18 = vmul.f32 0.6931472, %v5276_v56  ;;  %v4722_v45 = vsel %vm4610_vm11, %v9325_v26, %v4692_v9  ;;  %v4769_v61 = vmul.f32 %v5258_v20, %v4721_v10  ;;  %5301 = vpow2.f32 %v9411_v35 }
 0x7cc   :  { %v5280_v0 = vpop.eup %5279  ;;  %v4723_v55 = vsel %vm4611_vm12, %v9333_v40, %v4694_v37  ;;  %v4681_v53 = vadd.f32 1.0, %v5278_v17  ;;  %v4770_v23 = vmul.f32 %v5262_v43, %v4722_v45  ;;  %5303 = vpow2.f32 %v9413_v52 }
 0x7cd   :  { %v5282_v4 = vpop.eup %5281  ;;  %v4724_v12 = vsel %vm4612_vm13, %v9337_v49, %v4696_v18  ;;  %v4682_v26 = vadd.f32 1.0, %v5280_v0  ;;  %v4771_v20 = vmul.f32 %v5264_v42, %v4723_v55  ;;  %v4785_v41 = vadd.f32 %v4769_v61, %v4753_v16  ;;  %v9882_v18 = vld [vmem:[#allocation42_spill] sm:$0xff] }
 0x7ce   :  { %v5284_v35 = vpop.eup %5283  ;;  %5305 = vlog2.f32 %v4679_v46  ;;  %v4772_v25 = vmul.f32 %v5266_v8, %v4724_v12  ;;  %v4786_v40 = vadd.f32 %v4770_v23, %v4754_v36  ;;  %v4683_v44 = vadd.f32 1.0, %v5282_v4 }
 0x7cf   :  { %5307 = vlog2.f32 %v4681_v53  ;;  %v4787_v43 = vadd.f32 %v4771_v20, %v4755_v6  ;;  %4868 = vst [vmem:[#allocation15] sm:$0xff] %v4785_v41  ;;  %v4570_v52 = vmul.f32 0.6931472, %v5284_v35  ;;  %v5286_v24 = vpop.eup %5285  ;;  %v723_v15 = vmul.f32 1.442695, %v669_v59 }
 0x7d0   :  { %5309 = vlog2.f32 %v4682_v26  ;;  %v4788_v49 = vadd.f32 %v4772_v25, %v4756_v7  ;;  %4869 = vst [vmem:[#allocation15 + $0x8] sm:$0xff] %v4786_v40  ;;  %v9457_v42 = vpop.eup %5287  ;;  %v725_v16 = vmul.f32 1.442695, %v670_v22  ;;  %vm4478_vm2 = vcmp.gt.f32.partialorder %v9313_v11, 20.0  ;;  %v9883_v26 = vld [vmem:[#allocation37_spill] sm:$0xff] }
 0x7d1   :  { %4870 = vst [vmem:[#allocation15 + $0x10] sm:$0xff] %v4787_v43  ;;  %v4589_v8 = vsel %vm4477_vm1, %v9299_v54, %v4570_v52  ;;  %5311 = vpow2.f32 %v9417_v48  ;;  %v9461_v46 = vpop.eup %5289  ;;  %v675_v9 = vsub.f32 0.0, %v530_v39  ;;  %vm4479_vm3 = vcmp.gt.f32.partialorder %v9327_v29, 20.0 }
 0x7d2   :  { %4871 = vst [vmem:[#allocation15 + $0x18] sm:$0xff] %v4788_v49  ;;  %v9464_v14 = vadd.f32 %v8892_v34, %v4589_v8  ;;  %5313 = vpow2.f32 %v719_v51  ;;  %v5292_v13 = vpop.eup %5291  ;;  %v4680_v34 = vadd.f32 1.0, %v5286_v24  ;;  %vm4480_vm4 = vcmp.gt.f32.partialorder %v9343_v1, 20.0 }
 0x7d3   :  { %5315 = vpow2.f32 %v9435_v31  ;;  %v4572_v48 = vmul.f32 0.6931472, %v5292_v13  ;;  %v735_v10 = vmul.f32 1.442695, %v675_v9  ;;  %v532_v45 = vadd.f32 %v9882_v18, %v9449_v3 }
 0x7d4   :  { %v5294_v54 = vpop.eup %5293  ;;  %5317 = vlog2.f32 %v4683_v44  ;;  %v4637_v59 = vmin.f32 %v9464_v14, 20.0  ;;  %v643_v20 = vadd.f32 %v9883_v26, %v9449_v3  ;;  %v645_v7 = vadd.f32 %v9884_v33, %v9449_v3 }
 0x7d5   :  { %v5296_v58 = vpop.eup %5295  ;;  %v4684_v21 = vadd.f32 1.0, %v5294_v54  ;;  %5319 = vpow2.f32 %v723_v15  ;;  %v4590_v51 = vsel %vm4478_vm2, %v9313_v11, %v4572_v48  ;;  %v676_v41 = vsub.f32 0.0, %v532_v45 }
 0x7d6   :  { %v5298_v30 = vpop.eup %5297  ;;  %v4574_v22 = vmul.f32 0.6931472, %v5296_v58  ;;  %v4665_v36 = vmul.f32 1.442695, %v4637_v59  ;;  %5321 = vpow2.f32 %v725_v16  ;;  %v9475_v37 = vadd.f32 %v8868_v63, %v4590_v51 }
 0x7d7   :  { %v5300_v31 = vpop.eup %5299  ;;  %5323 = vlog2.f32 %v4684_v21  ;;  %v4576_v56 = vmul.f32 0.6931472, %v5298_v30  ;;  %v677_v47 = vsub.f32 0.0, %v643_v20  ;;  %v737_v44 = vmul.f32 1.442695, %v676_v41 }
 0x7d8   :  { %v5302_v62 = vpop.eup %5301  ;;  %v4591_v6 = vsel %vm4479_vm3, %v9327_v29, %v4574_v22  ;;  %5325 = vpow2.f32 %v4665_v36  ;;  %v767_v17 = vadd.f32 1.0, %v5300_v31  ;;  %v4638_v0 = vmin.f32 %v9475_v37, 20.0 }
 0x7d9   :  { %v5304_v11 = vpop.eup %5303  ;;  %5327 = vlog2.f32 %v4680_v34  ;;  %v4592_v61 = vsel %vm4480_vm4, %v9343_v1, %v4576_v56  ;;  %v9486_v63 = vadd.f32 %v9003_v32, %v4591_v6  ;;  %v768_v29 = vadd.f32 1.0, %v5302_v62 }
 0x7da   :  { %v9490_v55 = vadd.f32 %v9000_v50, %v4592_v61  ;;  %v769_v53 = vadd.f32 1.0, %v5304_v11  ;;  %5329 = vrcp.f32 %v767_v17  ;;  %v4667_v12 = vmul.f32 1.442695, %v4638_v0 }
 0x7db   :  { %v9492_v23 = vpop.eup %5305  ;;  %v4639_v4 = vmin.f32 %v9486_v63, 20.0  ;;  %5331 = vpow2.f32 %v735_v10  ;;  %v678_v16 = vsub.f32 0.0, %v645_v7  ;;  %v739_v48 = vmul.f32 1.442695, %v677_v47 }
 0x7dc   :  { %v5308_v1 = vpop.eup %5307  ;;  %v4640_v32 = vmin.f32 %v9490_v55, 20.0  ;;  %5333 = vrcp.f32 %v768_v29  ;;  %vm4613_vm5 = vcmp.gt.f32.partialorder %v9359_v38, 20.0  ;;  %vm4617_vm6 = vcmp.gt.f32.partialorder %v9385_v57, 20.0  ;;  %v5432_v29 = vld [vmem:[#allocation9 + $0x40] sm:$0xff] }
 0x7dd   :  { %v5310_v35 = vpop.eup %5309  ;;  %5335 = vpow2.f32 %v4667_v12  ;;  %v4669_v50 = vmul.f32 1.442695, %v4639_v4  ;;  %v4706_v8 = vmul.f32 0.6931472, %v5308_v1  ;;  %vm4614_vm7 = vcmp.gt.f32.partialorder %v9362_v19, 20.0 }
 0x7de   :  { %v5312_v25 = vpop.eup %5311  ;;  %v4671_v40 = vmul.f32 1.442695, %v4640_v32  ;;  %5337 = vrcp.f32 %v769_v53  ;;  %v4708_v3 = vmul.f32 0.6931472, %v5310_v35  ;;  %v741_v22 = vmul.f32 1.442695, %v678_v16 }
 0x7df   :  { %v5314_v43 = vpop.eup %5313  ;;  %5339 = vpow2.f32 %v4669_v50  ;;  %v770_v52 = vadd.f32 1.0, %v5312_v25  ;;  %v4729_v30 = vsel %vm4617_vm6, %v9385_v57, %v4706_v8  ;;  %vm4615_vm8 = vcmp.gt.f32.partialorder %v9365_v2, 20.0  ;;  %v5433_v32 = vld [vmem:[#allocation9 + $0x48] sm:$0xff] }
 0x7e0   :  { %v5316_v39 = vpop.eup %5315  ;;  %5341 = vpow2.f32 %v4671_v40  ;;  %v763_v24 = vadd.f32 1.0, %v5314_v43  ;;  %vm4618_vm9 = vcmp.gt.f32.partialorder %v9388_v60, 20.0  ;;  %vm4619_vm14 = vcmp.gt.f32.partialorder %v9394_v28, 20.0  ;;  %v5434_v43 = vld [vmem:[#allocation9 + $0x50] sm:$0xff] }
 0x7e1   :  { %v5318_v49 = vpop.eup %5317  ;;  %5343 = vrcp.f32 %v770_v52  ;;  %v764_v15 = vadd.f32 1.0, %v5316_v39  ;;  %v4730_v10 = vsel %vm4618_vm9, %v9388_v60, %v4708_v3  ;;  %vm4616_vm15 = vcmp.gt.f32.partialorder %v9400_v5, 20.0 }
 0x7e2   :  { %v5320_v13 = vpop.eup %5319  ;;  %5345 = vrcp.f32 %v763_v24  ;;  %v4710_v21 = vmul.f32 0.6931472, %v5318_v49  ;;  %vm4620_vm0 = vcmp.gt.f32.partialorder %v9420_v27, 20.0  ;;  %v4698_v18 = vmul.f32 0.6931472, %v9457_v42 }
 0x7e3   :  { %v5322_v9 = vpop.eup %5321  ;;  %v765_v54 = vadd.f32 1.0, %v5320_v13  ;;  %5347 = vrcp.f32 %v764_v15  ;;  %v4700_v0 = vmul.f32 0.6931472, %v9461_v46  ;;  %v4702_v26 = vmul.f32 0.6931472, %v9492_v23 }
 0x7e4   :  { %v5324_v59 = vpop.eup %5323  ;;  %v766_v58 = vadd.f32 1.0, %v5322_v9  ;;  %5349 = vpow2.f32 %v737_v44  ;;  %v4731_v45 = vsel %vm4619_vm14, %v9394_v28, %v4710_v21  ;;  %v4725_v7 = vsel %vm4613_vm5, %v9359_v38, %v4698_v18  ;;  %v5435_v9 = vld [vmem:[#allocation9 + $0x58] sm:$0xff] }
 0x7e5   :  { %v5326_v34 = vpop.eup %5325  ;;  %5351 = vrcp.f32 %v765_v54  ;;  %v4712_v56 = vmul.f32 0.6931472, %v5324_v59  ;;  %v4727_v24 = vsel %vm4615_vm8, %v9365_v2, %v4702_v26  ;;  %v5436_v2 = vld [vmem:[#allocation9 + $0x20] sm:$0xff]  ;;  %vm4621_vm10 = vcmp.gt.f32.partialorder %v9464_v14, 20.0 }
 0x7e6   :  { %v5328_v51 = vpop.eup %5327  ;;  %v4685_v36 = vadd.f32 1.0, %v5326_v34  ;;  %5353 = vrcp.f32 %v766_v58  ;;  %vm4622_vm11 = vcmp.gt.f32.partialorder %v9475_v37, 20.0  ;;  %vm4623_vm12 = vcmp.gt.f32.partialorder %v9486_v63, 20.0 }
 0x7e7   :  { %v5330_v31 = vpop.eup %5329  ;;  %5355 = vpow2.f32 %v739_v48  ;;  %v4732_v20 = vsel %vm4620_vm0, %v9420_v27, %v4712_v56  ;;  %v4704_v33 = vmul.f32 0.6931472, %v5328_v51  ;;  %v4726_v27 = vsel %vm4614_vm7, %v9362_v19, %v4700_v0  ;;  %v5437_v51 = vld [vmem:[#allocation9 + $0x28] sm:$0xff]  ;;  %v5439_v0 = vld [vmem:[#allocation9 + $0x38] sm:$0xff] }
 0x7e8   :  { %v5332_v62 = vpop.eup %5331  ;;  %5357 = vlog2.f32 %v4685_v36  ;;  %v4745_v57 = vsub.f32 1.0, %v5330_v31  ;;  %v4777_v6 = vmul.f32 %v5330_v31, %v4729_v30  ;;  %vm4624_vm13 = vcmp.gt.f32.partialorder %v9490_v55, 20.0 }
 0x7e9   :  { %v5334_v17 = vpop.eup %5333  ;;  %5359 = vpow2.f32 %v741_v22  ;;  %v771_v11 = vadd.f32 1.0, %v5332_v62  ;;  %v4728_v13 = vsel %vm4616_vm15, %v9400_v5, %v4704_v33 }
 0x7ea   :  { %v5336_v61 = vpop.eup %5335  ;;  %v4746_v60 = vsub.f32 1.0, %v5334_v17  ;;  %v4761_v53 = vmul.f32 %v5432_v29, %v4745_v57  ;;  %v4778_v4 = vmul.f32 %v5334_v17, %v4730_v10 }
 0x7eb   :  { %v5338_v12 = vpop.eup %5337  ;;  %v4686_v1 = vadd.f32 1.0, %v5336_v61  ;;  %5361 = vrcp.f32 %v771_v11 }
 0x7ec   :  { %v5340_v42 = vpop.eup %5339  ;;  %v4747_v28 = vsub.f32 1.0, %v5338_v12  ;;  %v4762_v41 = vmul.f32 %v5433_v32, %v4746_v60  ;;  %v4779_v35 = vmul.f32 %v5338_v12, %v4731_v45  ;;  %v4793_v50 = vadd.f32 %v4777_v6, %v4761_v53  ;;  %v5438_v6 = vld [vmem:[#allocation9 + $0x30] sm:$0xff]  ;;  %v5440_v32 = vld [vmem:[#allocation9 + $0x60] sm:$0xff] }
 0x7ed   :  { %v5342_v46 = vpop.eup %5341  ;;  %v4687_v25 = vadd.f32 1.0, %v5340_v42  ;;  %5363 = vlog2.f32 %v4686_v1 }
 0x7ee   :  { %v5344_v23 = vpop.eup %5343  ;;  %v4688_v40 = vadd.f32 1.0, %v5342_v46  ;;  %v4763_v52 = vmul.f32 %v5434_v43, %v4747_v28  ;;  %v4794_v47 = vadd.f32 %v4778_v4, %v4762_v41  ;;  %4876 = vst [vmem:[#allocation15 + $0x40] sm:$0xff] %v4793_v50 }
 0x7ef   :  { %v5346_v39 = vpop.eup %5345  ;;  %5365 = vlog2.f32 %v4687_v25  ;;  %v4748_v44 = vsub.f32 1.0, %v5344_v23  ;;  %v4780_v38 = vmul.f32 %v5344_v23, %v4732_v20 }
 0x7f0   :  { %v5348_v49 = vpop.eup %5347  ;;  %5367 = vlog2.f32 %v4688_v40  ;;  %v4795_v8 = vadd.f32 %v4779_v35, %v4763_v52  ;;  %4877 = vst [vmem:[#allocation15 + $0x48] sm:$0xff] %v4794_v47  ;;  %v4741_v15 = vsub.f32 1.0, %v5346_v39  ;;  %v4773_v16 = vmul.f32 %v5346_v39, %v4725_v7  ;;  %v5441_v47 = vld [vmem:[#allocation9 + $0x68] sm:$0xff] }
 0x7f1   :  { %v5350_v19 = vpop.eup %5349  ;;  %v4764_v3 = vmul.f32 %v5435_v9, %v4748_v44  ;;  %v4742_v54 = vsub.f32 1.0, %v5348_v49  ;;  %v4774_v48 = vmul.f32 %v5348_v49, %v4726_v27 }
 0x7f2   :  { %v5352_v59 = vpop.eup %5351  ;;  %4878 = vst [vmem:[#allocation15 + $0x50] sm:$0xff] %v4795_v8  ;;  %v4757_v58 = vmul.f32 %v5436_v2, %v4741_v15  ;;  %v772_v34 = vadd.f32 1.0, %v5350_v19  ;;  %v5442_v8 = vld [vmem:[#allocation9 + $0x70] sm:$0xff] }
 0x7f3   :  { %v5354_v21 = vpop.eup %5353  ;;  %v4796_v30 = vadd.f32 %v4780_v38, %v4764_v3  ;;  %v4743_v22 = vsub.f32 1.0, %v5352_v59  ;;  %v4758_v36 = vmul.f32 %v5437_v51, %v4742_v54  ;;  %v4775_v31 = vmul.f32 %v5352_v59, %v4727_v24 }
 0x7f4   :  { %v5356_v56 = vpop.eup %5355  ;;  %v4744_v10 = vsub.f32 1.0, %v5354_v21  ;;  %v4776_v62 = vmul.f32 %v5354_v21, %v4728_v13  ;;  %v4789_v57 = vadd.f32 %v4773_v16, %v4757_v58  ;;  %5369 = vrcp.f32 %v772_v34 }
 0x7f5   :  { %v5358_v5 = vpop.eup %5357  ;;  %4879 = vst [vmem:[#allocation15 + $0x58] sm:$0xff] %v4796_v30  ;;  %v4759_v17 = vmul.f32 %v5438_v6, %v4743_v22  ;;  %v4790_v18 = vadd.f32 %v4774_v48, %v4758_v36  ;;  %v773_v45 = vadd.f32 1.0, %v5356_v56 }
 0x7f6   :  { %v5360_v11 = vpop.eup %5359  ;;  %v4714_v61 = vmul.f32 0.6931472, %v5358_v5  ;;  %v4760_v60 = vmul.f32 %v5439_v0, %v4744_v10  ;;  %4872 = vst [vmem:[#allocation15 + $0x20] sm:$0xff] %v4789_v57 }
 0x7f7   :  { %v4791_v29 = vadd.f32 %v4775_v31, %v4759_v17  ;;  %4873 = vst [vmem:[#allocation15 + $0x28] sm:$0xff] %v4790_v18  ;;  %v774_v53 = vadd.f32 1.0, %v5360_v11  ;;  %5371 = vrcp.f32 %v773_v45 }
 0x7f8   :  { %v5362_v4 = vpop.eup %5361  ;;  %v4733_v12 = vsel %vm4621_vm10, %v9464_v14, %v4714_v61  ;;  %v4792_v26 = vadd.f32 %v4776_v62, %v4760_v60 }
 0x7f9   :  { %4874 = vst [vmem:[#allocation15 + $0x30] sm:$0xff] %v4791_v29  ;;  %5373 = vrcp.f32 %v774_v53  ;;  %v4749_v20 = vsub.f32 1.0, %v5362_v4  ;;  %v4781_v1 = vmul.f32 %v5362_v4, %v4733_v12 }
 0x7fa   :  { %v5364_v42 = vpop.eup %5363  ;;  %4875 = vst [vmem:[#allocation15 + $0x38] sm:$0xff] %v4792_v26 }
 0x7fb   :  { %v4716_v28 = vmul.f32 0.6931472, %v5364_v42  ;;  %v4765_v41 = vmul.f32 %v5440_v32, %v4749_v20 }
 0x7fc   :  { %v5366_v35 = vpop.eup %5365 }
 0x7fd   :  { %v5368_v50 = vpop.eup %5367  ;;  %v4797_v46 = vadd.f32 %v4781_v1, %v4765_v41  ;;  %v4718_v33 = vmul.f32 0.6931472, %v5366_v35  ;;  %v4734_v7 = vsel %vm4622_vm11, %v9475_v37, %v4716_v28 }
 0x7fe   :  { %v4720_v14 = vmul.f32 0.6931472, %v5368_v50 }
 0x7ff   :  { %4880 = vst [vmem:[#allocation15 + $0x60] sm:$0xff] %v4797_v46  ;;  %v4735_v23 = vsel %vm4623_vm12, %v9486_v63, %v4718_v33  ;;  %v5443_v63 = vld [vmem:[#allocation9 + $0x78] sm:$0xff] }
 0x800   :  { %v4736_v52 = vsel %vm4624_vm13, %v9490_v55, %v4720_v14 }
 0x801   :  { %v5370_v25 = vpop.eup %5369 }
 0x802   :  { %v4750_v27 = vsub.f32 1.0, %v5370_v25  ;;  %v4782_v40 = vmul.f32 %v5370_v25, %v4734_v7 }
 0x804   :  { %v5372_v43 = vpop.eup %5371  ;;  %v4766_v39 = vmul.f32 %v5441_v47, %v4750_v27 }
 0x805   :  { %v4751_v24 = vsub.f32 1.0, %v5372_v43  ;;  %v4783_v44 = vmul.f32 %v5372_v43, %v4735_v23 }
 0x806   :  { %v5374_v38 = vpop.eup %5373  ;;  %v4798_v37 = vadd.f32 %v4782_v40, %v4766_v39 }
 0x807   :  { %v4752_v49 = vsub.f32 1.0, %v5374_v38  ;;  %v4767_v15 = vmul.f32 %v5442_v8, %v4751_v24  ;;  %v4784_v16 = vmul.f32 %v5374_v38, %v4736_v52 }
 0x808   :  { %4881 = vst [vmem:[#allocation15 + $0x68] sm:$0xff] %v4798_v37 }
 0x809   :  { %v4768_v19 = vmul.f32 %v5443_v63, %v4752_v49  ;;  %v4799_v13 = vadd.f32 %v4783_v44, %v4767_v15 }
 0x80b   :  { %v4800_v9 = vadd.f32 %v4784_v16, %v4768_v19  ;;  %4882 = vst [vmem:[#allocation15 + $0x70] sm:$0xff] %v4799_v13 }
 0x80d   :  { %4883 = vst [vmem:[#allocation15 + $0x78] sm:$0xff] %v4800_v9 }
 0x80e   :  { %5555 = shalt.err (!%p5552_p1)
}
 0x80f   :  { %4907 = dma.vmem_to_hbm [thread:$0]  %s4902_s25, 2048, %s9560_s17, [#allocation16], %s9868_s26, %s9868_s26, %s9867_s24  }
 0x810   :  { %5570 = dma.done.wait [#allocation8], 2048  }
 0x811   :  { %5571 = vsyncadd [#allocation8], 4294965248 }
 0x812   :  { %5572 = dma.done.wait [#allocation16], 2048  }
 0x813   :  { %5573 = vsyncadd [#allocation16], 4294965248 }
 0x814   :  { %4914 = vsyncpa [#allocation7], 1 }
 0x815   :  { %4915 = vsyncpa [#allocation10], 1 }
 0x816   :  { %4916 = vsyncpa [#allocation13], 1 }
 0x817   :  { %4917 = vsyncpa [#allocation8], 1 }
 0x818   :  { %4918 = vsyncpa [#allocation16], 1 }

</bundles_post_ra>
